<compile_context>
chip_gen: v6e
topology: v6e:2x2x1
jax: 0.10.0
libtpu: 0.0.40
codegen_flags: <defaults>
</compile_context>

<pallas_src>
import functools

import jax
import jax.numpy as jnp
from jax.experimental import pallas as pl
from jax.experimental.pallas import tpu as pltpu

FEAT_DIM = 1280     # EfficientNet-B0 feature dim
HIDDEN = 512        # temporal_conv out_channels
NUM_CLASSES = 3
BN_EPS = 1e-5


def _temporal_head_kernel(x_ref, w_ref, shift_ref, out_ref, *, T, G):
    # x_ref:     (G*T, F)   bf16  frame features for G samples (rows grouped per sample)
    # w_ref:     (F, 3*H)   bf16  [tap0 | tap1 | tap2] conv weights with BN scale folded in
    # shift_ref: (1, H)     f32   folded conv-bias + BN shift
    # out_ref:   (G, H)     f32   per-sample max-pooled activations
    M = G * T

    # One MXU pass computes all three taps: acc[:, k*H:(k+1)*H] = x @ Wk'.
    acc = jnp.dot(x_ref[...], w_ref[...], preferred_element_type=jnp.float32)
    a0 = acc[:, :HIDDEN]
    a1 = acc[:, HIDDEN:2 * HIDDEN]
    a2 = acc[:, 2 * HIDDEN:]

    # Conv1d(k=3, padding=1): out[t] = a0[t-1] + a1[t] + a2[t+1], zero-padded at
    # the per-sample temporal boundaries. Sample boundaries inside the (G*T)-row
    # block are static multiples of T, so an (M, 1) iota mask is sufficient.
    t_in_sample = jax.lax.broadcasted_iota(jnp.int32, (M, 1), 0) % T
    prev = jnp.where(t_in_sample == 0, 0.0, pltpu.roll(a0, shift=1, axis=0))
    nxt = jnp.where(t_in_sample == T - 1, 0.0,
                    pltpu.roll(a2, shift=M - 1, axis=0))

    # BatchNorm (eval) is folded into the weights/shift; only add + ReLU remain.
    h = jnp.maximum(prev + a1 + nxt + shift_ref[...], 0.0)          # (M, H) f32

    # AdaptiveMaxPool1d(1) over time, per sample (static unrolled loop over G).
    for g in range(G):
        seg = h[g * T:(g + 1) * T, :]                               # (T, H)
        out_ref[pl.ds(g, 1), :] = jnp.max(seg, axis=0, keepdims=True)


def temporal_head(feats, w_conv, b_conv, bn_gamma, bn_beta, bn_mean, bn_var,
                  w_cls, b_cls):
    """feats: (B, T, FEAT_DIM) float32 -> logits (B, NUM_CLASSES) float32."""
    B, T, F = feats.shape
    assert F == FEAT_DIM

    # --- fold BatchNorm1d (eval mode) into the conv weights / bias ----------
    scale = (bn_gamma / jnp.sqrt(bn_var + BN_EPS)).astype(jnp.float32)   # (H,)
    shift = (bn_beta - bn_mean * scale + b_conv * scale)                 # (H,)
    shift = shift.reshape(1, HIDDEN).astype(jnp.float32)

    # PyTorch Conv1d weight: (out=H, in=F, k=3); tap k=0 multiplies x[t-1].
    # Fold the BN scale into each tap and concatenate along output channels so
    # the kernel sees a single resident (F, 3H) bf16 matrix (one DMA).
    taps = [(w_conv[:, :, k] * scale[:, None]).T for k in range(3)]  # (F, H) each
    w_cat = jnp.concatenate(taps, axis=1).astype(jnp.bfloat16)       # (F, 3H)

    # --- group G samples per grid step so the matmul M dim fills the MXU ----
    # Target ~256 rows (v6e/v7x MXU); for T=8 this gives G=32 (a multiple of 8,
    # so BlockSpec sublane constraints hold when the grid is > 1). For v7x,
    # larger B also yields a multi-step parallel grid that feeds both TCs.
    G = max(1, min(B, 256 // T if T <= 256 else 1))
    B_pad = pl.cdiv(B, G) * G
    if B_pad != B:
        feats = jnp.pad(feats, ((0, B_pad - B), (0, 0), (0, 0)))
    x_rows = feats.reshape(B_pad * T, F).astype(jnp.bfloat16)        # (B_pad*T, F)

    grid = (B_pad // G,)
    kernel = functools.partial(_temporal_head_kernel, T=T, G=G)

    pooled = pl.pallas_call(
        kernel,
        out_shape=jax.ShapeDtypeStruct((B_pad, HIDDEN), jnp.float32),
        grid_spec=pltpu.PrefetchScalarGridSpec(
            num_scalar_prefetch=0,
            grid=grid,
            in_specs=[
                pl.BlockSpec((G * T, F), lambda i: (i, 0)),       # frame features
                pl.BlockSpec((F, 3 * HIDDEN), lambda i: (0, 0)),  # conv taps (resident)
                pl.BlockSpec((1, HIDDEN), lambda i: (0, 0)),      # folded shift
            ],
            out_specs=pl.BlockSpec((G, HIDDEN), lambda i: (i, 0)),
        ),
        compiler_params=pltpu.CompilerParams(
            dimension_semantics=("parallel",),
            # bf16 weights (~3.9 MB, double-buffered ~7.9 MB) + small activation
            # blocks fit easily; 40 MiB is legal on v7x's 64 MiB physical VMEM.
            vmem_limit_bytes=40 << 20,
        ),
    )(x_rows, w_cat, shift)

    pooled = pooled[:B]                                             # (B, H) f32
    # Dropout is identity in eval mode; the tiny 512->3 classifier matmul stays
    # in plain XLA (avoids a 3-lane masked store and an M=1 MXU pass in-kernel).
    return pooled @ w_cls.T.astype(jnp.float32) + b_cls


def backbone_stub(x, proj_w, proj_b):
    # TODO(synk): full EfficientNet-B0 feature extractor is not reproduced; this
    # stand-in does global-average-pool over (h, w) + linear projection c -> 1280
    # so the temporal head sees the correct (B, T, 1280) feature layout.
    B, T, C, H, W = x.shape
    pooled = x.mean(axis=(3, 4))                         # (B, T, C)
    return pooled @ proj_w + proj_b                      # (B, T, FEAT_DIM)


def reference_head(feats, w_conv, b_conv, bn_gamma, bn_beta, bn_mean, bn_var,
                   w_cls, b_cls):
    """Pure-JAX f32 reference of the temporal head (for validation)."""
    scale = bn_gamma / jnp.sqrt(bn_var + BN_EPS)
    shift = bn_beta - bn_mean * scale
    pad = jnp.pad(feats, ((0, 0), (1, 1), (0, 0)))
    conv = (pad[:, :-2] @ w_conv[:, :, 0].T
            + pad[:, 1:-1] @ w_conv[:, :, 1].T
            + pad[:, 2:] @ w_conv[:, :, 2].T
            + b_conv)
    h = jnp.maximum(conv * scale + shift, 0.0)
    pooled = h.max(axis=1)
    return pooled @ w_cls.T + b_cls


if __name__ == "__main__":
    key = jax.random.PRNGKey(0)
    kx, kp, kpb, kw, kb, kg, kbe, km, kv, kwc, kbc = jax.random.split(key, 11)

    B, T, C, H, W = 2, 8, 3, 16, 16
    x = jax.random.normal(kx, (B, T, C, H, W), dtype=jnp.float32)

    # Stand-in backbone projection params.
    proj_w = jax.random.normal(kp, (C, FEAT_DIM), dtype=jnp.float32) * 0.1
    proj_b = jax.random.normal(kpb, (FEAT_DIM,), dtype=jnp.float32) * 0.01

    # Temporal head params (deterministic synthetic init).
    w_conv = jax.random.normal(kw, (HIDDEN, FEAT_DIM, 3), dtype=jnp.float32) * 0.02
    b_conv = jax.random.normal(kb, (HIDDEN,), dtype=jnp.float32) * 0.01
    bn_gamma = 1.0 + 0.05 * jax.random.normal(kg, (HIDDEN,), dtype=jnp.float32)
    bn_beta = 0.05 * jax.random.normal(kbe, (HIDDEN,), dtype=jnp.float32)
    bn_mean = 0.05 * jax.random.normal(km, (HIDDEN,), dtype=jnp.float32)
    bn_var = 1.0 + 0.05 * jax.random.uniform(kv, (HIDDEN,), dtype=jnp.float32)
    w_cls = jax.random.normal(kwc, (NUM_CLASSES, HIDDEN), dtype=jnp.float32) * 0.05
    b_cls = jax.random.normal(kbc, (NUM_CLASSES,), dtype=jnp.float32) * 0.01

    feats = backbone_stub(x, proj_w, proj_b)             # (B, T, 1280)

    logits = temporal_head(feats, w_conv, b_conv, bn_gamma, bn_beta, bn_mean,
                           bn_var, w_cls, b_cls)
    logits = jax.block_until_ready(logits)

    ref = reference_head(feats, w_conv, b_conv, bn_gamma, bn_beta, bn_mean,
                         bn_var, w_cls, b_cls)
    assert logits.shape == (B, NUM_CLASSES)
    # bf16 feats/weights inside the kernel -> loosened tolerance vs f32 reference.
    assert jnp.allclose(logits, ref, rtol=2e-2, atol=2e-3), "mismatch vs reference"

    print("KERNEL_OK")
</pallas_src>

<mosaic_0001>
module attributes {stable_mosaic.version = 11 : i64} {
  func.func @_temporal_head_kernel(%arg0: i32, %arg1: memref<16x1280xbf16, #tpu.memory_space<vmem>>, %arg2: memref<1280x1536xbf16, #tpu.memory_space<vmem>>, %arg3: memref<1x512xf32, #tpu.memory_space<vmem>>, %arg4: memref<2x512xf32, #tpu.memory_space<vmem>>) attributes {dimension_semantics = [#tpu.dimension_semantics<parallel>], iteration_bounds = array<i64: 1>, scalar_prefetch = 0 : i64, scratch_operands = 0 : i64, tpu.core_type = #tpu.core_type<tc>, window_params = [{transform_indices = @transform_0, window_bounds = array<i64: 16, 1280>}, {pipeline_mode = #tpu.pipeline_mode<synchronous>, transform_indices = @transform_1, window_bounds = array<i64: 1280, 1536>}, {pipeline_mode = #tpu.pipeline_mode<synchronous>, transform_indices = @transform_2, window_bounds = array<i64: 1, 512>}, {transform_indices = @transform_3, window_bounds = array<i64: 2, 512>}]} {
    %c0 = arith.constant 0 : index
    %c0_0 = arith.constant 0 : index
    %0 = vector.load %arg1[%c0, %c0_0] : memref<16x1280xbf16, #tpu.memory_space<vmem>>, vector<16x1280xbf16>
    %c0_1 = arith.constant 0 : index
    %c0_2 = arith.constant 0 : index
    %1 = vector.load %arg2[%c0_1, %c0_2] : memref<1280x1536xbf16, #tpu.memory_space<vmem>>, vector<1280x1536xbf16>
    %cst = arith.constant dense<0.000000e+00> : vector<16x1536xf32>
    %2 = tpu.matmul %0, %1, %cst {dimension_numbers = #tpu.dot_dimension_numbers<[1], [0], [0], [1], [0, 0, 1, 1], [], []>} : vector<16x1280xbf16>, vector<1280x1536xbf16>, vector<16x1536xf32> -> vector<16x1536xf32>
    %3 = vector.extract_strided_slice %2 {offsets = [0, 0], sizes = [16, 512], strides = [1, 1]} : vector<16x1536xf32> to vector<16x512xf32>
    %4 = vector.extract_strided_slice %2 {offsets = [0, 512], sizes = [16, 512], strides = [1, 1]} : vector<16x1536xf32> to vector<16x512xf32>
    %5 = vector.extract_strided_slice %2 {offsets = [0, 1024], sizes = [16, 512], strides = [1, 1]} : vector<16x1536xf32> to vector<16x512xf32>
    %6 = tpu.iota {dimensions = array<i32: 0>} : vector<16x1xi32>
    %c8_i32 = arith.constant 8 : i32
    %c0_i32 = arith.constant 0 : i32
    %7 = arith.cmpi eq, %c8_i32, %c0_i32 : i32
    %c1_i32 = arith.constant 1 : i32
    %8 = arith.select %7, %c1_i32, %c8_i32 : i32
    %9 = vector.broadcast %8 : i32 to vector<16x1xi32>
    %10 = arith.remsi %6, %9 : vector<16x1xi32>
    %c0_i32_3 = arith.constant 0 : i32
    %11 = vector.broadcast %c0_i32_3 : i32 to vector<16x1xi32>
    %12 = arith.cmpi ne, %10, %11 : vector<16x1xi32>
    %c0_i32_4 = arith.constant 0 : i32
    %13 = vector.broadcast %c0_i32_4 : i32 to vector<16x1xi32>
    %14 = arith.cmpi slt, %10, %13 : vector<16x1xi32>
    %c0_i32_5 = arith.constant 0 : i32
    %15 = arith.cmpi slt, %8, %c0_i32_5 : i32
    %16 = vector.broadcast %15 : i1 to vector<16x1xi1>
    %17 = vector.broadcast %16 : vector<16x1xi1> to vector<16x1xi1>
    %18 = arith.xori %14, %17 : vector<16x1xi1>
    %19 = arith.andi %18, %12 : vector<16x1xi1>
    %20 = vector.broadcast %8 : i32 to vector<16x1xi32>
    %21 = arith.addi %10, %20 : vector<16x1xi32>
    %22 = arith.select %19, %21, %10 : vector<16x1xi1>, vector<16x1xi32>
    %c0_i32_6 = arith.constant 0 : i32
    %23 = vector.broadcast %c0_i32_6 : i32 to vector<16x1xi32>
    %24 = arith.cmpi eq, %22, %23 : vector<16x1xi32>
    %c1_i32_7 = arith.constant 1 : i32
    %25 = tpu.dynamic_rotate %3 by %c1_i32_7 dim 0 : vector<16x512xf32>, i32 -> vector<16x512xf32>
    %cst_8 = arith.constant 0.000000e+00 : f32
    %26 = vector.shape_cast %24 : vector<16x1xi1> to vector<16x1xi1>
    %27 = vector.broadcast %26 : vector<16x1xi1> to vector<16x512xi1>
    %28 = vector.broadcast %cst_8 : f32 to vector<16x512xf32>
    %29 = arith.select %27, %28, %25 : vector<16x512xi1>, vector<16x512xf32>
    %c7_i32 = arith.constant 7 : i32
    %30 = vector.broadcast %c7_i32 : i32 to vector<16x1xi32>
    %31 = arith.cmpi eq, %22, %30 : vector<16x1xi32>
    %c15_i32 = arith.constant 15 : i32
    %32 = tpu.dynamic_rotate %5 by %c15_i32 dim 0 : vector<16x512xf32>, i32 -> vector<16x512xf32>
    %cst_9 = arith.constant 0.000000e+00 : f32
    %33 = vector.shape_cast %31 : vector<16x1xi1> to vector<16x1xi1>
    %34 = vector.broadcast %33 : vector<16x1xi1> to vector<16x512xi1>
    %35 = vector.broadcast %cst_9 : f32 to vector<16x512xf32>
    %36 = arith.select %34, %35, %32 : vector<16x512xi1>, vector<16x512xf32>
    %37 = arith.addf %29, %4 : vector<16x512xf32>
    %38 = arith.addf %37, %36 : vector<16x512xf32>
    %c0_10 = arith.constant 0 : index
    %c0_11 = arith.constant 0 : index
    %39 = vector.load %arg3[%c0_10, %c0_11] : memref<1x512xf32, #tpu.memory_space<vmem>>, vector<1x512xf32>
    %40 = vector.broadcast %39 : vector<1x512xf32> to vector<16x512xf32>
    %41 = arith.addf %38, %40 : vector<16x512xf32>
    %cst_12 = arith.constant 0.000000e+00 : f32
    %42 = vector.broadcast %cst_12 : f32 to vector<16x512xf32>
    %43 = arith.maximumf %41, %42 : vector<16x512xf32>
    %44 = vector.extract_strided_slice %43 {offsets = [0, 0], sizes = [8, 512], strides = [1, 1]} : vector<16x512xf32> to vector<8x512xf32>
    %cst_13 = arith.constant dense<0xFF800000> : vector<512xf32>
    %45 = vector.multi_reduction <maximumf>, %44, %cst_13 [0] : vector<8x512xf32> to vector<512xf32>
    %46 = vector.shape_cast %45 : vector<512xf32> to vector<1x512xf32>
    %c0_14 = arith.constant 0 : index
    %c0_15 = arith.constant 0 : index
    %47 = vector.load %arg4[%c0_14, %c0_15] : memref<2x512xf32, #tpu.memory_space<vmem>>, vector<1x512xf32>
    tpu.vector_store %arg4[%c0_14, %c0_15], %46 {strides = array<i32>} : memref<2x512xf32, #tpu.memory_space<vmem>>, vector<1x512xf32>,
    %48 = vector.extract_strided_slice %43 {offsets = [8, 0], sizes = [8, 512], strides = [1, 1]} : vector<16x512xf32> to vector<8x512xf32>
    %cst_16 = arith.constant dense<0xFF800000> : vector<512xf32>
    %49 = vector.multi_reduction <maximumf>, %48, %cst_16 [0] : vector<8x512xf32> to vector<512xf32>
    %50 = vector.shape_cast %49 : vector<512xf32> to vector<1x512xf32>
    %c1 = arith.constant 1 : index
    %c0_17 = arith.constant 0 : index
    %51 = vector.load %arg4[%c1, %c0_17] : memref<2x512xf32, #tpu.memory_space<vmem>>, vector<1x512xf32>
    tpu.vector_store %arg4[%c1, %c0_17], %50 {strides = array<i32>} : memref<2x512xf32, #tpu.memory_space<vmem>>, vector<1x512xf32>,
    return
  }
  func.func @transform_0(%arg0: i32) -> (i32, i32) {
    %c0_i32 = arith.constant 0 : i32
    %c0_i32_0 = arith.constant 0 : i32
    return %arg0, %c0_i32 : i32, i32
  }
  func.func @transform_1(%arg0: i32) -> (i32, i32) {
    %c0_i32 = arith.constant 0 : i32
    %c0_i32_0 = arith.constant 0 : i32
    %c0_i32_1 = arith.constant 0 : i32
    return %c0_i32, %c0_i32_0 : i32, i32
  }
  func.func @transform_2(%arg0: i32) -> (i32, i32) {
    %c0_i32 = arith.constant 0 : i32
    %c0_i32_0 = arith.constant 0 : i32
    %c0_i32_1 = arith.constant 0 : i32
    return %c0_i32, %c0_i32_0 : i32, i32
  }
  func.func @transform_3(%arg0: i32) -> (i32, i32) {
    %c0_i32 = arith.constant 0 : i32
    %c0_i32_0 = arith.constant 0 : i32
    return %arg0, %c0_i32 : i32, i32
  }
}

</mosaic_0001>

<bundles_post_ra>
// kernel: tpu_custom_call.1
= control target key start
LH: loop header
LB: loop body
LE: loop exit
PB: predicated region body
PF: predicated region fallthrough
CT: control target
= control target key end

     0   :  { %8 = vsyncpa [#allocation3], 0  ;;  %s10391_s0 = inlined_call_operand.hbm [shape: bf16[16,1280], index: 0, kind: input, shape index: {}]   ;;  %s10392_s1 = inlined_call_operand.hbm [shape: bf16[1280,1536], index: 1, kind: input, shape index: {}]   ;;  %s10393_s2 = inlined_call_operand.hbm [shape: f32[1,512], index: 2, kind: input, shape index: {}]   ;;  %s10394_s3 = inlined_call_operand.hbm [shape: f32[2,512], index: 3, kind: output, shape index: {}]  }
   0x1   :  { %9 = vsyncpa [#allocation6], 0 }
   0x2   :  { %10 = vsyncpa [#allocation4], 0  ;;  %s9986_s12 = smov [#allocation5]  }
   0x3   :  { %s28_s13 = sshll.u32 %s9986_s12, 4  ;;  %s29_s13 = int_to_ptr.vmem [resolvable:$true] %s28_s13 }
   0x4   :  { %s9908_s14 = scalar_lea.vmem %s29_s13, 122880  ;;  %p9913_p1 = scmp.lt.s32.totalorder %s29_s13, %s29_s13 }
   0x5   :  { %p9909_p0 = scmp.ne.s32.totalorder %s29_s13, %s9908_s14  ;;  %p9914_p2 = scmp.lt.s32.totalorder %s9908_s14, %s9908_s14 }
   0x7   :  { %p9915_p3 = por %p9914_p2, %p9913_p1 }
   0x9   :  { %p9916_p4 = pnand %p9915_p3, %p9909_p0 }
   0xb   :  { %9919 = shalt.err (!%p9916_p4)
}
   0xc   :  { %s9987_s15 = smov 768   ;;  %s9988_s16 = smov 48  }
   0xd   :  { %34 = dma.hbm_to_vmem [thread:$0]  %s10392_s1, 122880, %s29_s13, [#allocation6], %s9987_s15, %s9987_s15, %s9988_s16  }
   0xe   :  { %s9989_s19 = smov [#allocation2]  }
   0xf   :  { %s16_s20 = sshll.u32 %s9989_s19, 4  ;;  %s17_s20 = int_to_ptr.vmem [resolvable:$true] %s16_s20 }
  0x10   :  { %s9928_s21 = scalar_lea.vmem %s17_s20, 1280  ;;  %p9933_p6 = scmp.lt.s32.totalorder %s17_s20, %s17_s20 }
  0x11   :  { %p9929_p5 = scmp.ne.s32.totalorder %s17_s20, %s9928_s21  ;;  %p9934_p7 = scmp.lt.s32.totalorder %s9928_s21, %s9928_s21 }
  0x13   :  { %p9935_p8 = por %p9934_p7, %p9933_p6 }
  0x15   :  { %p9936_p9 = pnand %p9935_p8, %p9929_p5 }
  0x17   :  { %9939 = shalt.err (!%p9936_p9)
}
  0x18   :  { %s9990_s22 = smov 640   ;;  %s9991_s23 = smov 40  }
  0x19   :  { %22 = dma.hbm_to_vmem [thread:$0]  %s10391_s0, 1280, %s17_s20, [#allocation3], %s9990_s22, %s9990_s22, %s9991_s23  }
  0x1a   :  { %s9992_s26 = smov [#allocation7]  }
  0x1b   :  { %s41_s27 = sshll.u32 %s9992_s26, 4  ;;  %s42_s27 = int_to_ptr.vmem [resolvable:$true] %s41_s27 }
  0x1c   :  { %s9948_s1 = scalar_lea.vmem %s42_s27, 64  ;;  %p9953_p11 = scmp.lt.s32.totalorder %s42_s27, %s42_s27 }
  0x1d   :  { %p9949_p10 = scmp.ne.s32.totalorder %s42_s27, %s9948_s1  ;;  %p9954_p12 = scmp.lt.s32.totalorder %s9948_s1, %s9948_s1 }
  0x1f   :  { %p9955_p13 = por %p9954_p12, %p9953_p11 }
  0x21   :  { %p9956_p0 = pnand %p9955_p13, %p9949_p10 }
  0x23   :  { %9959 = shalt.err (!%p9956_p0)
}
  0x24   :  { %44 = dma.hbm_to_vmem [thread:$0]  %s10393_s2, 64, %s42_s27, [#allocation6]  }
  0x25   :  { %9980 = dma.done.wait [#allocation3], 1280  }
  0x26   :  { %9981 = vsyncadd [#allocation3], 4294966016 }
  0x27   :  { %9982 = dma.done.wait [#allocation6], 122944  }
  0x28   :  { %9983 = vsyncadd [#allocation6], 4294844352  ;;  %v8415_v0 = vld [vmem:[#allocation5 + $0x2a4] ss:$48 sps:$4 sm:$0xff]   ;;  %v8419_v2 = vld [vmem:[#allocation5 + $0x2a0] ss:$48 sps:$4 sm:$0xff]  }
  0x29   :  { %v8417_v1 = vld [vmem:[#allocation5 + $0x8a4] ss:$48 sps:$4 sm:$0xff]   ;;  %5874 = vmatprep.subr.bf16.mxu0 %v8415_v0  ;;  %v8420_v3 = vld [vmem:[#allocation5 + $0x8a0] ss:$48 sps:$4 sm:$0xff]   ;;  %s9994_s0 = smov [#allocation8]  }
  0x2a   :  { %5917 = vmatprep.subr.bf16.mxu1 %v8417_v1  ;;  %v8421_v4 = vld [vmem:[#allocation5 + $0x244] ss:$48 sps:$4 sm:$0xff]   ;;  %5875 = vmatpush1.bf16.msra.mxu0 %v8419_v2  ;;  %v8425_v6 = vld [vmem:[#allocation5 + $0x240] ss:$48 sps:$4 sm:$0xff]   ;;  %s7426_s2 = sshll.u32 %s9994_s0, 4  ;;  %s7427_s2 = int_to_ptr.vmem [resolvable:$true] %s7426_s2 }
  0x2b   :  { %5918 = vmatpush1.bf16.msra.mxu1 %v8420_v3  ;;  %v8423_v5 = vld [vmem:[#allocation5 + $0x844] ss:$48 sps:$4 sm:$0xff]   ;;  %5876 = vmatprep.subr.bf16.mxu0 %v8421_v4  ;;  %v8426_v7 = vld [vmem:[#allocation5 + $0x840] ss:$48 sps:$4 sm:$0xff]   ;;  %s9960_s30 = scalar_lea.vmem %s7427_s2, 128  ;;  %p9965_p2 = scmp.lt.s32.totalorder %s7427_s2, %s7427_s2 }
  0x2c   :  { %5919 = vmatprep.subr.bf16.mxu1 %v8423_v5  ;;  %v8427_v8 = vld [vmem:[#allocation5 + $0x1e4] ss:$48 sps:$4 sm:$0xff]   ;;  %v8431_v10 = vld [vmem:[#allocation5 + $0x1e0] ss:$48 sps:$4 sm:$0xff]   ;;  %p9961_p1 = scmp.ne.s32.totalorder %s7427_s2, %s9960_s30  ;;  %p9966_p3 = scmp.lt.s32.totalorder %s9960_s30, %s9960_s30 }
  0x2d   :  { %v8429_v9 = vld [vmem:[#allocation5 + $0x7e4] ss:$48 sps:$4 sm:$0xff]   ;;  %v8432_v11 = vld [vmem:[#allocation5 + $0x7e0] ss:$48 sps:$4 sm:$0xff]  }
  0x2e   :  { %5877 = vmatpush1.bf16.msra.mxu0 %v8425_v6  ;;  %v8433_v12 = vld [vmem:[#allocation5 + $0x184] ss:$48 sps:$4 sm:$0xff]   ;;  %v8437_v14 = vld [vmem:[#allocation5 + $0x180] ss:$48 sps:$4 sm:$0xff]   ;;  %p9967_p4 = por %p9966_p3, %p9965_p2 }
  0x2f   :  { %5920 = vmatpush1.bf16.msra.mxu1 %v8426_v7  ;;  %5878 = vmatprep.subr.bf16.mxu0 %v8427_v8  ;;  %v8435_v13 = vld [vmem:[#allocation5 + $0x784] ss:$48 sps:$4 sm:$0xff]   ;;  %v8438_v15 = vld [vmem:[#allocation5 + $0x780] ss:$48 sps:$4 sm:$0xff]  }
  0x30   :  { %5921 = vmatprep.subr.bf16.mxu1 %v8429_v9  ;;  %v8439_v16 = vld [vmem:[#allocation5 + $0x124] ss:$48 sps:$4 sm:$0xff]   ;;  %v8443_v18 = vld [vmem:[#allocation5 + $0x120] ss:$48 sps:$4 sm:$0xff]   ;;  %p9968_p5 = pnand %p9967_p4, %p9961_p1 }
  0x31   :  { %v8441_v17 = vld [vmem:[#allocation5 + $0x724] ss:$48 sps:$4 sm:$0xff]   ;;  %v8444_v19 = vld [vmem:[#allocation5 + $0x720] ss:$48 sps:$4 sm:$0xff]  }
  0x32   :  { %5879 = vmatpush1.bf16.msra.mxu0 %v8431_v10  ;;  %v8445_v20 = vld [vmem:[#allocation5 + $0xc4] ss:$48 sps:$4 sm:$0xff]   ;;  %v8449_v22 = vld [vmem:[#allocation5 + $0xc0] ss:$48 sps:$4 sm:$0xff]  }
  0x33   :  { %5922 = vmatpush1.bf16.msra.mxu1 %v8432_v11  ;;  %5880 = vmatprep.subr.bf16.mxu0 %v8433_v12  ;;  %v8447_v21 = vld [vmem:[#allocation5 + $0x6c4] ss:$48 sps:$4 sm:$0xff]   ;;  %v8450_v23 = vld [vmem:[#allocation5 + $0x6c0] ss:$48 sps:$4 sm:$0xff]  }
  0x34   :  { %5923 = vmatprep.subr.bf16.mxu1 %v8435_v13  ;;  %v8451_v24 = vld [vmem:[#allocation5 + $0x64] ss:$48 sps:$4 sm:$0xff]   ;;  %v8455_v26 = vld [vmem:[#allocation5 + $0x60] ss:$48 sps:$4 sm:$0xff]  }
  0x35   :  { %v8453_v25 = vld [vmem:[#allocation5 + $0x664] ss:$48 sps:$4 sm:$0xff]   ;;  %v8456_v27 = vld [vmem:[#allocation5 + $0x660] ss:$48 sps:$4 sm:$0xff]  }
  0x36   :  { %5881 = vmatpush1.bf16.msra.mxu0 %v8437_v14  ;;  %v8457_v28 = vld [vmem:[#allocation5 + $0x4] ss:$48 sps:$4 sm:$0xff]   ;;  %v8461_v30 = vld [vmem:[#allocation5] ss:$48 sps:$4 sm:$0xff]  }
  0x37   :  { %5924 = vmatpush1.bf16.msra.mxu1 %v8438_v15  ;;  %5882 = vmatprep.subr.bf16.mxu0 %v8439_v16  ;;  %v8459_v29 = vld [vmem:[#allocation5 + $0x604] ss:$48 sps:$4 sm:$0xff]   ;;  %v8462_v31 = vld [vmem:[#allocation5 + $0x600] ss:$48 sps:$4 sm:$0xff]  }
  0x38   :  { %5925 = vmatprep.subr.bf16.mxu1 %v8441_v17  ;;  %v8463_v32 = vld [vmem:[#allocation5 + $0x5a4] ss:$48 sps:$4 sm:$0xff]   ;;  %v8467_v34 = vld [vmem:[#allocation5 + $0x5a0] ss:$48 sps:$4 sm:$0xff]  }
  0x39   :  { %v8465_v33 = vld [vmem:[#allocation5 + $0xba4] ss:$48 sps:$4 sm:$0xff]   ;;  %v8468_v35 = vld [vmem:[#allocation5 + $0xba0] ss:$48 sps:$4 sm:$0xff]  }
  0x3a   :  { %5883 = vmatpush1.bf16.msra.mxu0 %v8443_v18  ;;  %v8469_v36 = vld [vmem:[#allocation5 + $0x544] ss:$48 sps:$4 sm:$0xff]   ;;  %v8473_v38 = vld [vmem:[#allocation5 + $0x540] ss:$48 sps:$4 sm:$0xff]  }
  0x3b   :  { %5926 = vmatpush1.bf16.msra.mxu1 %v8444_v19  ;;  %5884 = vmatprep.subr.bf16.mxu0 %v8445_v20  ;;  %v8471_v37 = vld [vmem:[#allocation5 + $0xb44] ss:$48 sps:$4 sm:$0xff]   ;;  %v8474_v39 = vld [vmem:[#allocation5 + $0xb40] ss:$48 sps:$4 sm:$0xff]  }
  0x3c   :  { %5927 = vmatprep.subr.bf16.mxu1 %v8447_v21  ;;  %v8475_v40 = vld [vmem:[#allocation5 + $0x4e4] ss:$48 sps:$4 sm:$0xff]   ;;  %v8479_v42 = vld [vmem:[#allocation5 + $0x4e0] ss:$48 sps:$4 sm:$0xff]  }
  0x3d   :  { %v8477_v41 = vld [vmem:[#allocation5 + $0xae4] ss:$48 sps:$4 sm:$0xff]   ;;  %v8480_v43 = vld [vmem:[#allocation5 + $0xae0] ss:$48 sps:$4 sm:$0xff]  }
  0x3e   :  { %5885 = vmatpush1.bf16.msra.mxu0 %v8449_v22  ;;  %v8481_v44 = vld [vmem:[#allocation5 + $0x484] ss:$48 sps:$4 sm:$0xff]   ;;  %v8485_v46 = vld [vmem:[#allocation5 + $0x480] ss:$48 sps:$4 sm:$0xff]  }
  0x3f   :  { %5928 = vmatpush1.bf16.msra.mxu1 %v8450_v23  ;;  %5886 = vmatprep.subr.bf16.mxu0 %v8451_v24  ;;  %v8483_v45 = vld [vmem:[#allocation5 + $0xa84] ss:$48 sps:$4 sm:$0xff]   ;;  %v8486_v47 = vld [vmem:[#allocation5 + $0xa80] ss:$48 sps:$4 sm:$0xff]  }
  0x40   :  { %5929 = vmatprep.subr.bf16.mxu1 %v8453_v25  ;;  %v10024_v48 = vld [vmem:[#allocation2 + $0x4] ss:$40 sps:$4 sm:$0xff]   ;;  %v8491_v52 = vld [vmem:[#allocation5 + $0x420] ss:$48 sps:$4 sm:$0xff]  }
  0x41   :  { %v8487_v49 = vld [vmem:[#allocation5 + $0x424] ss:$48 sps:$4 sm:$0xff]   ;;  %5906 = vmatprep.mubr.bf16.mxu0 %v10024_v48  ;;  %v8492_v53 = vld [vmem:[#allocation5 + $0xa20] ss:$48 sps:$4 sm:$0xff]  }
  0x42   :  { %5887 = vmatpush1.bf16.msra.mxu0 %v8455_v26  ;;  %v8513_v50 = vld [vmem:[#allocation2 + $0xc] ss:$40 sps:$4 sm:$0xff]   ;;  %v8497_v56 = vld [vmem:[#allocation5 + $0x3c0] ss:$48 sps:$4 sm:$0xff]  }
  0x43   :  { %5930 = vmatpush1.bf16.msra.mxu1 %v8456_v27  ;;  %5888 = vmatprep.subr.bf16.mxu0 %v8457_v28  ;;  %v8489_v51 = vld [vmem:[#allocation5 + $0xa24] ss:$48 sps:$4 sm:$0xff]   ;;  %v8498_v57 = vld [vmem:[#allocation5 + $0x9c0] ss:$48 sps:$4 sm:$0xff]  }
  0x44   :  { %5931 = vmatprep.subr.bf16.mxu1 %v8459_v29  ;;  %5949 = vmatprep.mubr.bf16.mxu1 %v8513_v50  ;;  %v8493_v54 = vld [vmem:[#allocation5 + $0x3c4] ss:$48 sps:$4 sm:$0xff]   ;;  %v8503_v60 = vld [vmem:[#allocation5 + $0x360] ss:$48 sps:$4 sm:$0xff]  }
  0x45   :  { %v8495_v55 = vld [vmem:[#allocation5 + $0x9c4] ss:$48 sps:$4 sm:$0xff]   ;;  %v8504_v61 = vld [vmem:[#allocation5 + $0x960] ss:$48 sps:$4 sm:$0xff]  }
  0x46   :  { %5889 = vmatpush1.bf16.msra.mxu0 %v8461_v30  ;;  %v8499_v58 = vld [vmem:[#allocation5 + $0x364] ss:$48 sps:$4 sm:$0xff]   ;;  %v8509_v0 = vld [vmem:[#allocation5 + $0x300] ss:$48 sps:$4 sm:$0xff]  }
  0x47   :  { %5932 = vmatpush1.bf16.msra.mxu1 %v8462_v31  ;;  %5890 = vmatprep.subr.bf16.mxu0 %v8463_v32  ;;  %v8501_v59 = vld [vmem:[#allocation5 + $0x964] ss:$48 sps:$4 sm:$0xff]   ;;  %v8510_v1 = vld [vmem:[#allocation5 + $0x900] ss:$48 sps:$4 sm:$0xff]  }
  0x48   :  { %5933 = vmatprep.subr.bf16.mxu1 %v8465_v33  ;;  %v8505_v62 = vld [vmem:[#allocation5 + $0x304] ss:$48 sps:$4 sm:$0xff]   ;;  %v10027_v4 = vld [vmem:[#allocation2] ss:$40 sps:$4 sm:$0xff]  }
  0x49   :  { %v8507_v63 = vld [vmem:[#allocation5 + $0x904] ss:$48 sps:$4 sm:$0xff]   ;;  %v8516_v5 = vld [vmem:[#allocation2 + $0x8] ss:$40 sps:$4 sm:$0xff]  }
  0x4a   :  { %5891 = vmatpush2.bf16.msra.mxu0 %v8467_v34  ;;  %v8519_v2 = vld [vmem:[#allocation5 + $0xea4] ss:$48 sps:$4 sm:$0xff]   ;;  %v8517_v6 = vld [vmem:[#allocation5 + $0xea0] ss:$48 sps:$4 sm:$0xff]  }
  0x4b   :  { %5934 = vmatpush2.bf16.msra.mxu1 %v8468_v35  ;;  %5892 = vmatprep.subr.bf16.mxu0 %v8469_v36  ;;  %v8522_v3 = vld [vmem:[#allocation5 + $0x14a4] ss:$48 sps:$4 sm:$0xff]   ;;  %v8520_v7 = vld [vmem:[#allocation5 + $0x14a0] ss:$48 sps:$4 sm:$0xff]  }
  0x4c   :  { %5935 = vmatprep.subr.bf16.mxu1 %v8471_v37  ;;  %v8525_v8 = vld [vmem:[#allocation5 + $0xe44] ss:$48 sps:$4 sm:$0xff]   ;;  %v8523_v10 = vld [vmem:[#allocation5 + $0xe40] ss:$48 sps:$4 sm:$0xff]  }
  0x4d   :  { %v8528_v9 = vld [vmem:[#allocation5 + $0x1444] ss:$48 sps:$4 sm:$0xff]   ;;  %v8526_v11 = vld [vmem:[#allocation5 + $0x1440] ss:$48 sps:$4 sm:$0xff]  }
  0x4e   :  { %5893 = vmatpush2.bf16.msra.mxu0 %v8473_v38  ;;  %v8531_v12 = vld [vmem:[#allocation5 + $0xde4] ss:$48 sps:$4 sm:$0xff]   ;;  %v8529_v14 = vld [vmem:[#allocation5 + $0xde0] ss:$48 sps:$4 sm:$0xff]  }
  0x4f   :  { %5936 = vmatpush2.bf16.msra.mxu1 %v8474_v39  ;;  %5894 = vmatprep.subr.bf16.mxu0 %v8475_v40  ;;  %v8534_v13 = vld [vmem:[#allocation5 + $0x13e4] ss:$48 sps:$4 sm:$0xff]   ;;  %v8532_v15 = vld [vmem:[#allocation5 + $0x13e0] ss:$48 sps:$4 sm:$0xff]  }
  0x50   :  { %5937 = vmatprep.subr.bf16.mxu1 %v8477_v41  ;;  %v8537_v16 = vld [vmem:[#allocation5 + $0xd84] ss:$48 sps:$4 sm:$0xff]   ;;  %v8535_v18 = vld [vmem:[#allocation5 + $0xd80] ss:$48 sps:$4 sm:$0xff]  }
  0x51   :  { %v8540_v17 = vld [vmem:[#allocation5 + $0x1384] ss:$48 sps:$4 sm:$0xff]   ;;  %v8538_v19 = vld [vmem:[#allocation5 + $0x1380] ss:$48 sps:$4 sm:$0xff]  }
  0x52   :  { %5895 = vmatpush2.bf16.msra.mxu0 %v8479_v42  ;;  %v8543_v20 = vld [vmem:[#allocation5 + $0xd24] ss:$48 sps:$4 sm:$0xff]   ;;  %v8541_v22 = vld [vmem:[#allocation5 + $0xd20] ss:$48 sps:$4 sm:$0xff]  }
  0x53   :  { %5938 = vmatpush2.bf16.msra.mxu1 %v8480_v43  ;;  %5896 = vmatprep.subr.bf16.mxu0 %v8481_v44  ;;  %v8546_v21 = vld [vmem:[#allocation5 + $0x1324] ss:$48 sps:$4 sm:$0xff]   ;;  %v8544_v23 = vld [vmem:[#allocation5 + $0x1320] ss:$48 sps:$4 sm:$0xff]  }
  0x54   :  { %5939 = vmatprep.subr.bf16.mxu1 %v8483_v45  ;;  %v8549_v24 = vld [vmem:[#allocation5 + $0xcc4] ss:$48 sps:$4 sm:$0xff]   ;;  %v8547_v26 = vld [vmem:[#allocation5 + $0xcc0] ss:$48 sps:$4 sm:$0xff]  }
  0x55   :  { %v8552_v25 = vld [vmem:[#allocation5 + $0x12c4] ss:$48 sps:$4 sm:$0xff]   ;;  %v8550_v27 = vld [vmem:[#allocation5 + $0x12c0] ss:$48 sps:$4 sm:$0xff]  }
  0x56   :  { %5897 = vmatpush2.bf16.msra.mxu0 %v8485_v46  ;;  %v8555_v28 = vld [vmem:[#allocation5 + $0xc64] ss:$48 sps:$4 sm:$0xff]   ;;  %v8553_v30 = vld [vmem:[#allocation5 + $0xc60] ss:$48 sps:$4 sm:$0xff]  }
  0x57   :  { %5940 = vmatpush2.bf16.msra.mxu1 %v8486_v47  ;;  %5898 = vmatprep.subr.bf16.mxu0 %v8487_v49  ;;  %v8558_v29 = vld [vmem:[#allocation5 + $0x1264] ss:$48 sps:$4 sm:$0xff]   ;;  %v8556_v31 = vld [vmem:[#allocation5 + $0x1260] ss:$48 sps:$4 sm:$0xff]  }
  0x58   :  { %5941 = vmatprep.subr.bf16.mxu1 %v8489_v51  ;;  %v8561_v32 = vld [vmem:[#allocation5 + $0xc04] ss:$48 sps:$4 sm:$0xff]   ;;  %v8559_v36 = vld [vmem:[#allocation5 + $0xc00] ss:$48 sps:$4 sm:$0xff]  }
  0x59   :  { %v8564_v33 = vld [vmem:[#allocation5 + $0x1204] ss:$48 sps:$4 sm:$0xff]   ;;  %v8562_v37 = vld [vmem:[#allocation5 + $0x1200] ss:$48 sps:$4 sm:$0xff]  }
  0x5a   :  { %5899 = vmatpush2.bf16.msra.mxu0 %v8491_v52  ;;  %v10030_v34 = vld [vmem:[#allocation2 + $0x14] ss:$40 sps:$4 sm:$0xff]   ;;  %v8565_v40 = vld [vmem:[#allocation5 + $0x11a0] ss:$48 sps:$4 sm:$0xff]  }
  0x5b   :  { %5942 = vmatpush2.bf16.msra.mxu1 %v8492_v53  ;;  %5900 = vmatprep.subr.bf16.mxu0 %v8493_v54  ;;  %v8615_v35 = vld [vmem:[#allocation2 + $0x1c] ss:$40 sps:$4 sm:$0xff]   ;;  %v8568_v41 = vld [vmem:[#allocation5 + $0x17a0] ss:$48 sps:$4 sm:$0xff]  }
  0x5c   :  { %5943 = vmatprep.subr.bf16.mxu1 %v8495_v55  ;;  %v8567_v38 = vld [vmem:[#allocation5 + $0x11a4] ss:$48 sps:$4 sm:$0xff]   ;;  %v8571_v44 = vld [vmem:[#allocation5 + $0x1140] ss:$48 sps:$4 sm:$0xff]  }
  0x5d   :  { %v8570_v39 = vld [vmem:[#allocation5 + $0x17a4] ss:$48 sps:$4 sm:$0xff]   ;;  %v8574_v45 = vld [vmem:[#allocation5 + $0x1740] ss:$48 sps:$4 sm:$0xff]  }
  0x5e   :  { %5901 = vmatpush2.bf16.msra.mxu0 %v8497_v56  ;;  %v8573_v42 = vld [vmem:[#allocation5 + $0x1144] ss:$48 sps:$4 sm:$0xff]   ;;  %v8577_v49 = vld [vmem:[#allocation5 + $0x10e0] ss:$48 sps:$4 sm:$0xff]  }
  0x5f   :  { %5944 = vmatpush2.bf16.msra.mxu1 %v8498_v57  ;;  %5902 = vmatprep.subr.bf16.mxu0 %v8499_v58  ;;  %v8576_v43 = vld [vmem:[#allocation5 + $0x1744] ss:$48 sps:$4 sm:$0xff]   ;;  %v8580_v50 = vld [vmem:[#allocation5 + $0x16e0] ss:$48 sps:$4 sm:$0xff]  }
  0x60   :  { %5945 = vmatprep.subr.bf16.mxu1 %v8501_v59  ;;  %v8579_v46 = vld [vmem:[#allocation5 + $0x10e4] ss:$48 sps:$4 sm:$0xff]   ;;  %v8583_v53 = vld [vmem:[#allocation5 + $0x1080] ss:$48 sps:$4 sm:$0xff]  }
  0x61   :  { %v8582_v47 = vld [vmem:[#allocation5 + $0x16e4] ss:$48 sps:$4 sm:$0xff]   ;;  %v8586_v54 = vld [vmem:[#allocation5 + $0x1680] ss:$48 sps:$4 sm:$0xff]  }
  0x62   :  { %5903 = vmatpush2.bf16.msra.mxu0 %v8503_v60  ;;  %v8585_v51 = vld [vmem:[#allocation5 + $0x1084] ss:$48 sps:$4 sm:$0xff]   ;;  %v8589_v57 = vld [vmem:[#allocation5 + $0x1020] ss:$48 sps:$4 sm:$0xff]  }
  0x63   :  { %5946 = vmatpush2.bf16.msra.mxu1 %v8504_v61  ;;  %5904 = vmatprep.subr.bf16.mxu0 %v8505_v62  ;;  %v8588_v52 = vld [vmem:[#allocation5 + $0x1684] ss:$48 sps:$4 sm:$0xff]   ;;  %v8592_v58 = vld [vmem:[#allocation5 + $0x1620] ss:$48 sps:$4 sm:$0xff]  }
  0x64   :  { %5947 = vmatprep.subr.bf16.mxu1 %v8507_v63  ;;  %v8591_v55 = vld [vmem:[#allocation5 + $0x1024] ss:$48 sps:$4 sm:$0xff]   ;;  %v8595_v61 = vld [vmem:[#allocation5 + $0xfc0] ss:$48 sps:$4 sm:$0xff]  }
  0x65   :  { %v8594_v56 = vld [vmem:[#allocation5 + $0x1624] ss:$48 sps:$4 sm:$0xff]   ;;  %v8598_v62 = vld [vmem:[#allocation5 + $0x15c0] ss:$48 sps:$4 sm:$0xff]  }
  0x66   :  { %5905 = vmatpush2.bf16.msra.mxu0 %v8509_v0  ;;  %v8597_v59 = vld [vmem:[#allocation5 + $0xfc4] ss:$48 sps:$4 sm:$0xff]  }
  0x67   :  { %5948 = vmatpush2.bf16.msra.mxu1 %v8510_v1  ;;  %5960 = vmatprep.subr.bf16.mxu0 %v8519_v2  ;;  %v8600_v60 = vld [vmem:[#allocation5 + $0x15c4] ss:$48 sps:$4 sm:$0xff]   ;;  %v8601_v1 = vld [vmem:[#allocation5 + $0xf60] ss:$48 sps:$4 sm:$0xff]  }
  0x68   :  { %6003 = vmatprep.subr.bf16.mxu1 %v8522_v3  ;;  %v8603_v63 = vld [vmem:[#allocation5 + $0xf64] ss:$48 sps:$4 sm:$0xff]   ;;  %v8604_v2 = vld [vmem:[#allocation5 + $0x1560] ss:$48 sps:$4 sm:$0xff]  }
  0x69   :  { %5907 = vmatmul.mubr.bf16.vlgmr.msra.gmra.mxu0 %v10027_v4  ;;  %v8606_v0 = vld [vmem:[#allocation5 + $0x1564] ss:$48 sps:$4 sm:$0xff]  }
  0x6a   :  { %5950 = vmatmul.mubr.bf16.vlgmr.msra.gmra.mxu1 %v8516_v5  ;;  %5961 = vmatpush1.bf16.msra.mxu0 %v8517_v6  ;;  %v8609_v3 = vld [vmem:[#allocation5 + $0xf04] ss:$48 sps:$4 sm:$0xff]   ;;  %v8607_v6 = vld [vmem:[#allocation5 + $0xf00] ss:$48 sps:$4 sm:$0xff]  }
  0x6b   :  { %6004 = vmatpush1.bf16.msra.mxu1 %v8520_v7  ;;  %5962 = vmatprep.subr.bf16.mxu0 %v8525_v8  ;;  %v8612_v5 = vld [vmem:[#allocation5 + $0x1504] ss:$48 sps:$4 sm:$0xff]   ;;  %v8610_v7 = vld [vmem:[#allocation5 + $0x1500] ss:$48 sps:$4 sm:$0xff]  }
  0x6c   :  { %6005 = vmatprep.subr.bf16.mxu1 %v8528_v9  ;;  %5992 = vmatprep.mubr.bf16.mxu0 %v10030_v34  ;;  %v8621_v8 = vld [vmem:[#allocation5 + $0x1aa4] ss:$48 sps:$4 sm:$0xff]   ;;  %v8624_v9 = vld [vmem:[#allocation5 + $0x2ac] ss:$48 sps:$4 sm:$0xff]  }
  0x6d   :  { %6035 = vmatprep.mubr.bf16.mxu1 %v8615_v35  ;;  %v8657_v35 = vld [vmem:[#allocation5 + $0x1864] ss:$48 sps:$4 sm:$0xff]  }
  0x6e   :  { %5963 = vmatpush1.bf16.msra.mxu0 %v8523_v10  ;;  %v10033_v10 = vld [vmem:[#allocation2 + $0x10] ss:$40 sps:$4 sm:$0xff]  }
  0x6f   :  { %6006 = vmatpush1.bf16.msra.mxu1 %v8526_v11  ;;  %5964 = vmatprep.subr.bf16.mxu0 %v8531_v12  ;;  %v8618_v11 = vld [vmem:[#allocation2 + $0x18] ss:$40 sps:$4 sm:$0xff]  }
  0x70   :  { %6007 = vmatprep.subr.bf16.mxu1 %v8534_v13  ;;  %v8619_v12 = vld [vmem:[#allocation5 + $0x1aa0] ss:$48 sps:$4 sm:$0xff]   ;;  %v8622_v13 = vld [vmem:[#allocation5 + $0x2a8] ss:$48 sps:$4 sm:$0xff]  }
  0x72   :  { %5965 = vmatpush1.bf16.msra.mxu0 %v8529_v14  ;;  %v8627_v14 = vld [vmem:[#allocation5 + $0x1a44] ss:$48 sps:$4 sm:$0xff]  }
  0x73   :  { %6008 = vmatpush1.bf16.msra.mxu1 %v8532_v15  ;;  %5966 = vmatprep.subr.bf16.mxu0 %v8537_v16  ;;  %v8630_v15 = vld [vmem:[#allocation5 + $0x24c] ss:$48 sps:$4 sm:$0xff]   ;;  %v8625_v16 = vld [vmem:[#allocation5 + $0x1a40] ss:$48 sps:$4 sm:$0xff]  }
  0x74   :  { %6009 = vmatprep.subr.bf16.mxu1 %v8540_v17  ;;  %v8628_v17 = vld [vmem:[#allocation5 + $0x248] ss:$48 sps:$4 sm:$0xff]  }
  0x76   :  { %5967 = vmatpush1.bf16.msra.mxu0 %v8535_v18  ;;  %v8633_v18 = vld [vmem:[#allocation5 + $0x19e4] ss:$48 sps:$4 sm:$0xff]  }
  0x77   :  { %6010 = vmatpush1.bf16.msra.mxu1 %v8538_v19  ;;  %5968 = vmatprep.subr.bf16.mxu0 %v8543_v20  ;;  %v8636_v19 = vld [vmem:[#allocation5 + $0x1ec] ss:$48 sps:$4 sm:$0xff]  }
  0x78   :  { %6011 = vmatprep.subr.bf16.mxu1 %v8546_v21  ;;  %v10036_v20 = vld [vmem:[#allocation2 + $0x24] ss:$40 sps:$4 sm:$0xff]   ;;  %v8631_v21 = vld [vmem:[#allocation5 + $0x19e0] ss:$48 sps:$4 sm:$0xff]  }
  0x7a   :  { %5969 = vmatpush1.bf16.msra.mxu0 %v8541_v22  ;;  %v8634_v22 = vld [vmem:[#allocation5 + $0x1e8] ss:$48 sps:$4 sm:$0xff]  }
  0x7b   :  { %6012 = vmatpush1.bf16.msra.mxu1 %v8544_v23  ;;  %5970 = vmatprep.subr.bf16.mxu0 %v8549_v24  ;;  %v8639_v23 = vld [vmem:[#allocation5 + $0x1984] ss:$48 sps:$4 sm:$0xff]   ;;  %v8642_v24 = vld [vmem:[#allocation5 + $0x18c] ss:$48 sps:$4 sm:$0xff]  }
  0x7c   :  { %6013 = vmatprep.subr.bf16.mxu1 %v8552_v25  ;;  %v8637_v25 = vld [vmem:[#allocation5 + $0x1980] ss:$48 sps:$4 sm:$0xff]  }
  0x7e   :  { %5971 = vmatpush1.bf16.msra.mxu0 %v8547_v26  ;;  %v8640_v26 = vld [vmem:[#allocation5 + $0x188] ss:$48 sps:$4 sm:$0xff]  }
  0x7f   :  { %6014 = vmatpush1.bf16.msra.mxu1 %v8550_v27  ;;  %5972 = vmatprep.subr.bf16.mxu0 %v8555_v28  ;;  %v8645_v27 = vld [vmem:[#allocation5 + $0x1924] ss:$48 sps:$4 sm:$0xff]   ;;  %v8648_v28 = vld [vmem:[#allocation5 + $0x12c] ss:$48 sps:$4 sm:$0xff]  }
  0x80   :  { %6015 = vmatprep.subr.bf16.mxu1 %v8558_v29  ;;  %v8643_v29 = vld [vmem:[#allocation5 + $0x1920] ss:$48 sps:$4 sm:$0xff]  }
  0x82   :  { %5973 = vmatpush1.bf16.msra.mxu0 %v8553_v30  ;;  %v8651_v30 = vld [vmem:[#allocation5 + $0x18c4] ss:$48 sps:$4 sm:$0xff]  }
  0x83   :  { %6016 = vmatpush1.bf16.msra.mxu1 %v8556_v31  ;;  %5974 = vmatprep.subr.bf16.mxu0 %v8561_v32  ;;  %v8654_v31 = vld [vmem:[#allocation5 + $0xcc] ss:$48 sps:$4 sm:$0xff]   ;;  %v8649_v32 = vld [vmem:[#allocation5 + $0x18c0] ss:$48 sps:$4 sm:$0xff]  }
  0x84   :  { %6017 = vmatprep.subr.bf16.mxu1 %v8564_v33  ;;  %v8652_v33 = vld [vmem:[#allocation5 + $0xc8] ss:$48 sps:$4 sm:$0xff]  }
  0x86   :  { %5975 = vmatpush1.bf16.msra.mxu0 %v8559_v36  ;;  %v8660_v36 = vld [vmem:[#allocation5 + $0x6c] ss:$48 sps:$4 sm:$0xff]  }
  0x87   :  { %6018 = vmatpush1.bf16.msra.mxu1 %v8562_v37  ;;  %5976 = vmatprep.subr.bf16.mxu0 %v8567_v38  ;;  %v8655_v37 = vld [vmem:[#allocation5 + $0x1860] ss:$48 sps:$4 sm:$0xff]   ;;  %v8658_v38 = vld [vmem:[#allocation5 + $0x68] ss:$48 sps:$4 sm:$0xff]  }
  0x88   :  { %6019 = vmatprep.subr.bf16.mxu1 %v8570_v39  ;;  %v8663_v39 = vld [vmem:[#allocation5 + $0x1804] ss:$48 sps:$4 sm:$0xff]  }
  0x8a   :  { %5977 = vmatpush2.bf16.msra.mxu0 %v8565_v40  ;;  %v8666_v40 = vld [vmem:[#allocation5 + $0xc] ss:$48 sps:$4 sm:$0xff]  }
  0x8b   :  { %6020 = vmatpush2.bf16.msra.mxu1 %v8568_v41  ;;  %5978 = vmatprep.subr.bf16.mxu0 %v8573_v42  ;;  %v8661_v41 = vld [vmem:[#allocation5 + $0x1800] ss:$48 sps:$4 sm:$0xff]   ;;  %v8664_v42 = vld [vmem:[#allocation5 + $0x8] ss:$48 sps:$4 sm:$0xff]  }
  0x8c   :  { %6021 = vmatprep.subr.bf16.mxu1 %v8576_v43  ;;  %v8669_v43 = vld [vmem:[#allocation5 + $0x1da4] ss:$48 sps:$4 sm:$0xff]  }
  0x8e   :  { %5979 = vmatpush2.bf16.msra.mxu0 %v8571_v44  ;;  %v8672_v44 = vld [vmem:[#allocation5 + $0x5ac] ss:$48 sps:$4 sm:$0xff]  }
  0x8f   :  { %6022 = vmatpush2.bf16.msra.mxu1 %v8574_v45  ;;  %5980 = vmatprep.subr.bf16.mxu0 %v8579_v46  ;;  %v8667_v45 = vld [vmem:[#allocation5 + $0x1da0] ss:$48 sps:$4 sm:$0xff]   ;;  %v8670_v46 = vld [vmem:[#allocation5 + $0x5a8] ss:$48 sps:$4 sm:$0xff]  }
  0x90   :  { %6023 = vmatprep.subr.bf16.mxu1 %v8582_v47  ;;  %v8675_v47 = vld [vmem:[#allocation5 + $0x1d44] ss:$48 sps:$4 sm:$0xff]  }
  0x92   :  { %5981 = vmatpush2.bf16.msra.mxu0 %v8577_v49  ;;  %v8678_v49 = vld [vmem:[#allocation5 + $0x54c] ss:$48 sps:$4 sm:$0xff]  }
  0x93   :  { %6024 = vmatpush2.bf16.msra.mxu1 %v8580_v50  ;;  %5982 = vmatprep.subr.bf16.mxu0 %v8585_v51  ;;  %v8673_v50 = vld [vmem:[#allocation5 + $0x1d40] ss:$48 sps:$4 sm:$0xff]   ;;  %v8676_v51 = vld [vmem:[#allocation5 + $0x548] ss:$48 sps:$4 sm:$0xff]  }
  0x94   :  { %6025 = vmatprep.subr.bf16.mxu1 %v8588_v52  ;;  %v8681_v52 = vld [vmem:[#allocation5 + $0x1ce4] ss:$48 sps:$4 sm:$0xff]  }
  0x96   :  { %5983 = vmatpush2.bf16.msra.mxu0 %v8583_v53  ;;  %v8684_v53 = vld [vmem:[#allocation5 + $0x4ec] ss:$48 sps:$4 sm:$0xff]  }
  0x97   :  { %6026 = vmatpush2.bf16.msra.mxu1 %v8586_v54  ;;  %5984 = vmatprep.subr.bf16.mxu0 %v8591_v55  ;;  %v8679_v54 = vld [vmem:[#allocation5 + $0x1ce0] ss:$48 sps:$4 sm:$0xff]   ;;  %v8682_v55 = vld [vmem:[#allocation5 + $0x4e8] ss:$48 sps:$4 sm:$0xff]  }
  0x98   :  { %6027 = vmatprep.subr.bf16.mxu1 %v8594_v56  ;;  %v8687_v56 = vld [vmem:[#allocation5 + $0x1c84] ss:$48 sps:$4 sm:$0xff]  }
  0x9a   :  { %5985 = vmatpush2.bf16.msra.mxu0 %v8589_v57  ;;  %v8690_v57 = vld [vmem:[#allocation5 + $0x48c] ss:$48 sps:$4 sm:$0xff]  }
  0x9b   :  { %6028 = vmatpush2.bf16.msra.mxu1 %v8592_v58  ;;  %5986 = vmatprep.subr.bf16.mxu0 %v8597_v59  ;;  %v8685_v58 = vld [vmem:[#allocation5 + $0x1c80] ss:$48 sps:$4 sm:$0xff]   ;;  %v8688_v59 = vld [vmem:[#allocation5 + $0x488] ss:$48 sps:$4 sm:$0xff]  }
  0x9c   :  { %6029 = vmatprep.subr.bf16.mxu1 %v8600_v60  ;;  %v8693_v60 = vld [vmem:[#allocation5 + $0x1c24] ss:$48 sps:$4 sm:$0xff]  }
  0x9e   :  { %5987 = vmatpush2.bf16.msra.mxu0 %v8595_v61  ;;  %v8696_v61 = vld [vmem:[#allocation5 + $0x42c] ss:$48 sps:$4 sm:$0xff]  }
  0x9f   :  { %6030 = vmatpush2.bf16.msra.mxu1 %v8598_v62  ;;  %5988 = vmatprep.subr.bf16.mxu0 %v8603_v63  ;;  %v8691_v62 = vld [vmem:[#allocation5 + $0x1c20] ss:$48 sps:$4 sm:$0xff]   ;;  %v8694_v63 = vld [vmem:[#allocation5 + $0x428] ss:$48 sps:$4 sm:$0xff]  }
  0xa0   :  { %6031 = vmatprep.subr.bf16.mxu1 %v8606_v0  ;;  %v8699_v0 = vld [vmem:[#allocation5 + $0x1bc4] ss:$48 sps:$4 sm:$0xff]  }
  0xa2   :  { %5989 = vmatpush2.bf16.msra.mxu0 %v8601_v1  ;;  %v8702_v1 = vld [vmem:[#allocation5 + $0x3cc] ss:$48 sps:$4 sm:$0xff]  }
  0xa3   :  { %6032 = vmatpush2.bf16.msra.mxu1 %v8604_v2  ;;  %5990 = vmatprep.subr.bf16.mxu0 %v8609_v3  ;;  %v8697_v2 = vld [vmem:[#allocation5 + $0x1bc0] ss:$48 sps:$4 sm:$0xff]   ;;  %v8700_v3 = vld [vmem:[#allocation5 + $0x3c8] ss:$48 sps:$4 sm:$0xff]  }
  0xa4   :  { %6033 = vmatprep.subr.bf16.mxu1 %v8612_v5  ;;  %v8705_v5 = vld [vmem:[#allocation5 + $0x1b64] ss:$48 sps:$4 sm:$0xff]  }
  0xa6   :  { %5991 = vmatpush2.bf16.msra.mxu0 %v8607_v6  ;;  %v8708_v6 = vld [vmem:[#allocation5 + $0x36c] ss:$48 sps:$4 sm:$0xff]  }
  0xa7   :  { %6034 = vmatpush2.bf16.msra.mxu1 %v8610_v7  ;;  %6046 = vmatprep.subr.bf16.mxu0 %v8621_v8  ;;  %v8703_v7 = vld [vmem:[#allocation5 + $0x1b60] ss:$48 sps:$4 sm:$0xff]   ;;  %v8706_v8 = vld [vmem:[#allocation5 + $0x368] ss:$48 sps:$4 sm:$0xff]  }
  0xa8   :  { %6089 = vmatprep.subr.bf16.mxu1 %v8624_v9  ;;  %v8711_v9 = vld [vmem:[#allocation5 + $0x1b04] ss:$48 sps:$4 sm:$0xff]  }
  0xa9   :  { %5993 = vmatmul.mubr.bf16.vlgmr.msra.gmra.mxu0 %v10033_v10 }
  0xaa   :  { %6036 = vmatmul.mubr.bf16.vlgmr.msra.gmra.mxu1 %v8618_v11  ;;  %6047 = vmatpush1.bf16.msra.mxu0 %v8619_v12  ;;  %v8714_v11 = vld [vmem:[#allocation5 + $0x30c] ss:$48 sps:$4 sm:$0xff]   ;;  %v8709_v12 = vld [vmem:[#allocation5 + $0x1b00] ss:$48 sps:$4 sm:$0xff]  }
  0xab   :  { %6090 = vmatpush1.bf16.msra.mxu1 %v8622_v13  ;;  %6048 = vmatprep.subr.bf16.mxu0 %v8627_v14  ;;  %v8712_v13 = vld [vmem:[#allocation5 + $0x308] ss:$48 sps:$4 sm:$0xff]   ;;  %v8720_v14 = vld [vmem:[#allocation5 + $0x8ac] ss:$48 sps:$4 sm:$0xff]  }
  0xac   :  { %6091 = vmatprep.subr.bf16.mxu1 %v8630_v15  ;;  %6121 = vmatprep.mubr.bf16.mxu1 %v10024_v48  ;;  %v8646_v48 = vld [vmem:[#allocation5 + $0x128] ss:$48 sps:$4 sm:$0xff]   ;;  %v8723_v15 = vld [vmem:[#allocation5 + $0xeac] ss:$48 sps:$4 sm:$0xff]  }
  0xad   :  { %6078 = vmatprep.mubr.bf16.mxu0 %v10036_v20 }
  0xae   :  { %6049 = vmatpush1.bf16.msra.mxu0 %v8625_v16  ;;  %v10040_v16 = vld [vmem:[#allocation2 + $0x20] ss:$40 sps:$4 sm:$0xff]  }
  0xaf   :  { %6092 = vmatpush1.bf16.msra.mxu1 %v8628_v17  ;;  %6050 = vmatprep.subr.bf16.mxu0 %v8633_v18  ;;  %v8718_v17 = vld [vmem:[#allocation5 + $0x8a8] ss:$48 sps:$4 sm:$0xff]  }
  0xb0   :  { %6093 = vmatprep.subr.bf16.mxu1 %v8636_v19  ;;  %v8721_v18 = vld [vmem:[#allocation5 + $0xea8] ss:$48 sps:$4 sm:$0xff]   ;;  %v8726_v19 = vld [vmem:[#allocation5 + $0x84c] ss:$48 sps:$4 sm:$0xff]  }
  0xb2   :  { %6051 = vmatpush1.bf16.msra.mxu0 %v8631_v21  ;;  %v8729_v21 = vld [vmem:[#allocation5 + $0xe4c] ss:$48 sps:$4 sm:$0xff]  }
  0xb3   :  { %6094 = vmatpush1.bf16.msra.mxu1 %v8634_v22  ;;  %6052 = vmatprep.subr.bf16.mxu0 %v8639_v23  ;;  %v8724_v22 = vld [vmem:[#allocation5 + $0x848] ss:$48 sps:$4 sm:$0xff]  }
  0xb4   :  { %6095 = vmatprep.subr.bf16.mxu1 %v8642_v24  ;;  %v8727_v23 = vld [vmem:[#allocation5 + $0xe48] ss:$48 sps:$4 sm:$0xff]   ;;  %v8732_v24 = vld [vmem:[#allocation5 + $0x7ec] ss:$48 sps:$4 sm:$0xff]  }
  0xb6   :  { %6053 = vmatpush1.bf16.msra.mxu0 %v8637_v25  ;;  %v8735_v25 = vld [vmem:[#allocation5 + $0xdec] ss:$48 sps:$4 sm:$0xff]  }
  0xb7   :  { %6096 = vmatpush1.bf16.msra.mxu1 %v8640_v26  ;;  %6054 = vmatprep.subr.bf16.mxu0 %v8645_v27  ;;  %v10044_v26 = vld [vmem:[#allocation2 + $0xc] ss:$40 sps:$4 sm:$0xff]   ;;  %v8730_v27 = vld [vmem:[#allocation5 + $0x7e8] ss:$48 sps:$4 sm:$0xff]  }
  0xb8   :  { %6097 = vmatprep.subr.bf16.mxu1 %v8648_v28  ;;  %v8733_v28 = vld [vmem:[#allocation5 + $0xde8] ss:$48 sps:$4 sm:$0xff]  }
  0xba   :  { %6055 = vmatpush1.bf16.msra.mxu0 %v8643_v29  ;;  %v8738_v29 = vld [vmem:[#allocation5 + $0x78c] ss:$48 sps:$4 sm:$0xff]  }
  0xbb   :  { %6098 = vmatpush1.bf16.msra.mxu1 %v8646_v48  ;;  %6056 = vmatprep.subr.bf16.mxu0 %v8651_v30  ;;  %v8736_v48 = vld [vmem:[#allocation5 + $0x788] ss:$48 sps:$4 sm:$0xff]  }
  0xbc   :  { %6099 = vmatprep.subr.bf16.mxu1 %v8654_v31  ;;  %v8739_v30 = vld [vmem:[#allocation5 + $0xd88] ss:$48 sps:$4 sm:$0xff]   ;;  %v8744_v31 = vld [vmem:[#allocation5 + $0x72c] ss:$48 sps:$4 sm:$0xff]  }
  0xbe   :  { %6057 = vmatpush1.bf16.msra.mxu0 %v8649_v32  ;;  %v8747_v32 = vld [vmem:[#allocation5 + $0xd2c] ss:$48 sps:$4 sm:$0xff]  }
  0xbf   :  { %6100 = vmatpush1.bf16.msra.mxu1 %v8652_v33  ;;  %6058 = vmatprep.subr.bf16.mxu0 %v8657_v35  ;;  %v8742_v33 = vld [vmem:[#allocation5 + $0x728] ss:$48 sps:$4 sm:$0xff]  }
  0xc0   :  { %6101 = vmatprep.subr.bf16.mxu1 %v8660_v36  ;;  %v8745_v35 = vld [vmem:[#allocation5 + $0xd28] ss:$48 sps:$4 sm:$0xff]   ;;  %v8753_v36 = vld [vmem:[#allocation5 + $0xccc] ss:$48 sps:$4 sm:$0xff]  }
  0xc2   :  { %6059 = vmatpush1.bf16.msra.mxu0 %v8655_v37  ;;  %v8748_v37 = vld [vmem:[#allocation5 + $0x6c8] ss:$48 sps:$4 sm:$0xff]  }
  0xc3   :  { %6102 = vmatpush1.bf16.msra.mxu1 %v8658_v38  ;;  %6060 = vmatprep.subr.bf16.mxu0 %v8663_v39  ;;  %v8751_v38 = vld [vmem:[#allocation5 + $0xcc8] ss:$48 sps:$4 sm:$0xff]   ;;  %v8756_v39 = vld [vmem:[#allocation5 + $0x66c] ss:$48 sps:$4 sm:$0xff]  }
  0xc4   :  { %6103 = vmatprep.subr.bf16.mxu1 %v8666_v40  ;;  %v8759_v40 = vld [vmem:[#allocation5 + $0xc6c] ss:$48 sps:$4 sm:$0xff]  }
  0xc6   :  { %6061 = vmatpush1.bf16.msra.mxu0 %v8661_v41  ;;  %v8754_v41 = vld [vmem:[#allocation5 + $0x668] ss:$48 sps:$4 sm:$0xff]  }
  0xc7   :  { %6104 = vmatpush1.bf16.msra.mxu1 %v8664_v42  ;;  %6062 = vmatprep.subr.bf16.mxu0 %v8669_v43  ;;  %v8757_v42 = vld [vmem:[#allocation5 + $0xc68] ss:$48 sps:$4 sm:$0xff]   ;;  %v8762_v43 = vld [vmem:[#allocation5 + $0x60c] ss:$48 sps:$4 sm:$0xff]  }
  0xc8   :  { %6105 = vmatprep.subr.bf16.mxu1 %v8672_v44  ;;  %v8765_v44 = vld [vmem:[#allocation5 + $0xc0c] ss:$48 sps:$4 sm:$0xff]  }
  0xca   :  { %6063 = vmatpush2.bf16.msra.mxu0 %v8667_v45  ;;  %v8760_v45 = vld [vmem:[#allocation5 + $0x608] ss:$48 sps:$4 sm:$0xff]  }
  0xcb   :  { %6106 = vmatpush2.bf16.msra.mxu1 %v8670_v46  ;;  %6064 = vmatprep.subr.bf16.mxu0 %v8675_v47  ;;  %v8763_v46 = vld [vmem:[#allocation5 + $0xc08] ss:$48 sps:$4 sm:$0xff]   ;;  %v8768_v47 = vld [vmem:[#allocation5 + $0xbac] ss:$48 sps:$4 sm:$0xff]  }
  0xcc   :  { %6107 = vmatprep.subr.bf16.mxu1 %v8678_v49  ;;  %v8771_v49 = vld [vmem:[#allocation5 + $0x11ac] ss:$48 sps:$4 sm:$0xff]  }
  0xce   :  { %6065 = vmatpush2.bf16.msra.mxu0 %v8673_v50  ;;  %v8766_v50 = vld [vmem:[#allocation5 + $0xba8] ss:$48 sps:$4 sm:$0xff]  }
  0xcf   :  { %6108 = vmatpush2.bf16.msra.mxu1 %v8676_v51  ;;  %6066 = vmatprep.subr.bf16.mxu0 %v8681_v52  ;;  %v8769_v51 = vld [vmem:[#allocation5 + $0x11a8] ss:$48 sps:$4 sm:$0xff]   ;;  %v8774_v52 = vld [vmem:[#allocation5 + $0xb4c] ss:$48 sps:$4 sm:$0xff]  }
  0xd0   :  { %6109 = vmatprep.subr.bf16.mxu1 %v8684_v53  ;;  %v8777_v53 = vld [vmem:[#allocation5 + $0x114c] ss:$48 sps:$4 sm:$0xff]  }
  0xd2   :  { %6067 = vmatpush2.bf16.msra.mxu0 %v8679_v54  ;;  %v8772_v54 = vld [vmem:[#allocation5 + $0xb48] ss:$48 sps:$4 sm:$0xff]  }
  0xd3   :  { %6110 = vmatpush2.bf16.msra.mxu1 %v8682_v55  ;;  %6068 = vmatprep.subr.bf16.mxu0 %v8687_v56  ;;  %v8775_v55 = vld [vmem:[#allocation5 + $0x1148] ss:$48 sps:$4 sm:$0xff]   ;;  %v8780_v56 = vld [vmem:[#allocation5 + $0xaec] ss:$48 sps:$4 sm:$0xff]  }
  0xd4   :  { %6111 = vmatprep.subr.bf16.mxu1 %v8690_v57  ;;  %v8783_v57 = vld [vmem:[#allocation5 + $0x10ec] ss:$48 sps:$4 sm:$0xff]  }
  0xd6   :  { %6069 = vmatpush2.bf16.msra.mxu0 %v8685_v58  ;;  %v8778_v58 = vld [vmem:[#allocation5 + $0xae8] ss:$48 sps:$4 sm:$0xff]  }
  0xd7   :  { %6112 = vmatpush2.bf16.msra.mxu1 %v8688_v59  ;;  %6070 = vmatprep.subr.bf16.mxu0 %v8693_v60  ;;  %v8781_v59 = vld [vmem:[#allocation5 + $0x10e8] ss:$48 sps:$4 sm:$0xff]   ;;  %v8786_v60 = vld [vmem:[#allocation5 + $0xa8c] ss:$48 sps:$4 sm:$0xff]  }
  0xd8   :  { %6113 = vmatprep.subr.bf16.mxu1 %v8696_v61  ;;  %v8789_v61 = vld [vmem:[#allocation5 + $0x108c] ss:$48 sps:$4 sm:$0xff]  }
  0xda   :  { %6071 = vmatpush2.bf16.msra.mxu0 %v8691_v62  ;;  %v8784_v62 = vld [vmem:[#allocation5 + $0xa88] ss:$48 sps:$4 sm:$0xff]  }
  0xdb   :  { %6114 = vmatpush2.bf16.msra.mxu1 %v8694_v63  ;;  %6072 = vmatprep.subr.bf16.mxu0 %v8699_v0  ;;  %v8787_v63 = vld [vmem:[#allocation5 + $0x1088] ss:$48 sps:$4 sm:$0xff]   ;;  %v8792_v0 = vld [vmem:[#allocation5 + $0xa2c] ss:$48 sps:$4 sm:$0xff]  }
  0xdc   :  { %6115 = vmatprep.subr.bf16.mxu1 %v8702_v1  ;;  %v8795_v1 = vld [vmem:[#allocation5 + $0x102c] ss:$48 sps:$4 sm:$0xff]  }
  0xde   :  { %6073 = vmatpush2.bf16.msra.mxu0 %v8697_v2  ;;  %v8790_v2 = vld [vmem:[#allocation5 + $0xa28] ss:$48 sps:$4 sm:$0xff]  }
  0xdf   :  { %6116 = vmatpush2.bf16.msra.mxu1 %v8700_v3  ;;  %6074 = vmatprep.subr.bf16.mxu0 %v8705_v5  ;;  %v8793_v3 = vld [vmem:[#allocation5 + $0x1028] ss:$48 sps:$4 sm:$0xff]   ;;  %v8798_v5 = vld [vmem:[#allocation5 + $0x9cc] ss:$48 sps:$4 sm:$0xff]  }
  0xe0   :  { %6117 = vmatprep.subr.bf16.mxu1 %v8708_v6  ;;  %v8801_v6 = vld [vmem:[#allocation5 + $0xfcc] ss:$48 sps:$4 sm:$0xff]  }
  0xe2   :  { %6075 = vmatpush2.bf16.msra.mxu0 %v8703_v7  ;;  %v8796_v7 = vld [vmem:[#allocation5 + $0x9c8] ss:$48 sps:$4 sm:$0xff]  }
  0xe3   :  { %6118 = vmatpush2.bf16.msra.mxu1 %v8706_v8  ;;  %6076 = vmatprep.subr.bf16.mxu0 %v8711_v9  ;;  %v8799_v8 = vld [vmem:[#allocation5 + $0xfc8] ss:$48 sps:$4 sm:$0xff]   ;;  %v8804_v9 = vld [vmem:[#allocation5 + $0x96c] ss:$48 sps:$4 sm:$0xff]  }
  0xe4   :  { %6119 = vmatprep.subr.bf16.mxu1 %v8714_v11  ;;  %v8807_v11 = vld [vmem:[#allocation5 + $0xf6c] ss:$48 sps:$4 sm:$0xff]  }
  0xe6   :  { %6077 = vmatpush2.bf16.msra.mxu0 %v8709_v12  ;;  %v8802_v12 = vld [vmem:[#allocation5 + $0x968] ss:$48 sps:$4 sm:$0xff]  }
  0xe7   :  { %6120 = vmatpush2.bf16.msra.mxu1 %v8712_v13  ;;  %6132 = vmatprep.subr.bf16.mxu0 %v8720_v14  ;;  %v8805_v13 = vld [vmem:[#allocation5 + $0xf68] ss:$48 sps:$4 sm:$0xff]   ;;  %v8810_v14 = vld [vmem:[#allocation5 + $0x90c] ss:$48 sps:$4 sm:$0xff]  }
  0xe8   :  { %6175 = vmatprep.subr.bf16.mxu1 %v8723_v15  ;;  %v8813_v15 = vld [vmem:[#allocation5 + $0xf0c] ss:$48 sps:$4 sm:$0xff]  }
  0xe9   :  { %6079 = vmatmul.mubr.bf16.vlgmr.msra.gmra.mxu0 %v10040_v16 }
  0xea   :  { %6122 = vmatmul.mubr.bf16.vlgmr.msra.gmra.mxu1 %v10027_v4  ;;  %6133 = vmatpush1.bf16.msra.mxu0 %v8718_v17  ;;  %v8741_v4 = vld [vmem:[#allocation5 + $0xd8c] ss:$48 sps:$4 sm:$0xff]   ;;  %v8808_v17 = vld [vmem:[#allocation5 + $0x908] ss:$48 sps:$4 sm:$0xff]  }
  0xeb   :  { %6176 = vmatpush1.bf16.msra.mxu1 %v8721_v18  ;;  %6134 = vmatprep.subr.bf16.mxu0 %v8726_v19  ;;  %v8811_v18 = vld [vmem:[#allocation5 + $0xf08] ss:$48 sps:$4 sm:$0xff]   ;;  %v8816_v19 = vld [vmem:[#allocation5 + $0x14ac] ss:$48 sps:$4 sm:$0xff]  }
  0xec   :  { %6177 = vmatprep.subr.bf16.mxu1 %v8729_v21  ;;  %6164 = vmatprep.mubr.bf16.mxu0 %v10044_v26  ;;  %v8819_v21 = vld [vmem:[#allocation5 + $0x1aac] ss:$48 sps:$4 sm:$0xff]  }
  0xed   :  { %6207 = vmatprep.mubr.bf16.mxu1 %v10030_v34  ;;  %v8750_v34 = vld [vmem:[#allocation5 + $0x6cc] ss:$48 sps:$4 sm:$0xff]  }
  0xee   :  { %6135 = vmatpush1.bf16.msra.mxu0 %v8724_v22  ;;  %v8814_v22 = vld [vmem:[#allocation5 + $0x14a8] ss:$48 sps:$4 sm:$0xff]  }
  0xef   :  { %6178 = vmatpush1.bf16.msra.mxu1 %v8727_v23  ;;  %6136 = vmatprep.subr.bf16.mxu0 %v8732_v24  ;;  %v8817_v23 = vld [vmem:[#allocation5 + $0x1aa8] ss:$48 sps:$4 sm:$0xff]   ;;  %v8822_v24 = vld [vmem:[#allocation5 + $0x144c] ss:$48 sps:$4 sm:$0xff]  }
  0xf0   :  { %6179 = vmatprep.subr.bf16.mxu1 %v8735_v25  ;;  %v8825_v25 = vld [vmem:[#allocation5 + $0x1a4c] ss:$48 sps:$4 sm:$0xff]  }
  0xf2   :  { %6137 = vmatpush1.bf16.msra.mxu0 %v8730_v27 }
  0xf3   :  { %6180 = vmatpush1.bf16.msra.mxu1 %v8733_v28  ;;  %6138 = vmatprep.subr.bf16.mxu0 %v8738_v29  ;;  %v9871_v29 = vld [vmem:[#allocation2 + $0x8] ss:$40 sps:$4 sm:$0xff]  }
  0xf4   :  { %6181 = vmatprep.subr.bf16.mxu1 %v8741_v4  ;;  %v8820_v4 = vld [vmem:[#allocation5 + $0x1448] ss:$48 sps:$4 sm:$0xff]  }
  0xf6   :  { %6139 = vmatpush1.bf16.msra.mxu0 %v8736_v48  ;;  %v8823_v48 = vld [vmem:[#allocation5 + $0x1a48] ss:$48 sps:$4 sm:$0xff]  }
  0xf7   :  { %6182 = vmatpush1.bf16.msra.mxu1 %v8739_v30  ;;  %6140 = vmatprep.subr.bf16.mxu0 %v8744_v31  ;;  %v8828_v31 = vld [vmem:[#allocation5 + $0x13ec] ss:$48 sps:$4 sm:$0xff]  }
  0xf8   :  { %6183 = vmatprep.subr.bf16.mxu1 %v8747_v32 }
  0xfa   :  { %6141 = vmatpush1.bf16.msra.mxu0 %v8742_v33 }
  0xfb   :  { %6184 = vmatpush1.bf16.msra.mxu1 %v8745_v35  ;;  %6142 = vmatprep.subr.bf16.mxu0 %v8750_v34  ;;  %v8831_v35 = vld [vmem:[#allocation5 + $0x19ec] ss:$48 sps:$4 sm:$0xff]  }
  0xfc   :  { %6185 = vmatprep.subr.bf16.mxu1 %v8753_v36  ;;  %v9872_v36 = vld [vmem:[#allocation2 + $0x1c] ss:$40 sps:$4 sm:$0xff]  }
  0xfe   :  { %6143 = vmatpush1.bf16.msra.mxu0 %v8748_v37 }
  0xff   :  { %6186 = vmatpush1.bf16.msra.mxu1 %v8751_v38  ;;  %6144 = vmatprep.subr.bf16.mxu0 %v8756_v39  ;;  %v8826_v38 = vld [vmem:[#allocation5 + $0x13e8] ss:$48 sps:$4 sm:$0xff]  }
 0x100   :  { %6187 = vmatprep.subr.bf16.mxu1 %v8759_v40  ;;  %v8829_v39 = vld [vmem:[#allocation5 + $0x19e8] ss:$48 sps:$4 sm:$0xff]  }
 0x102   :  { %6145 = vmatpush1.bf16.msra.mxu0 %v8754_v41  ;;  %v8834_v41 = vld [vmem:[#allocation5 + $0x138c] ss:$48 sps:$4 sm:$0xff]  }
 0x103   :  { %6188 = vmatpush1.bf16.msra.mxu1 %v8757_v42  ;;  %6146 = vmatprep.subr.bf16.mxu0 %v8762_v43 }
 0x104   :  { %6189 = vmatprep.subr.bf16.mxu1 %v8765_v44  ;;  %v8837_v44 = vld [vmem:[#allocation5 + $0x198c] ss:$48 sps:$4 sm:$0xff]  }
 0x106   :  { %6147 = vmatpush1.bf16.msra.mxu0 %v8760_v45 }
 0x107   :  { %6190 = vmatpush1.bf16.msra.mxu1 %v8763_v46  ;;  %6148 = vmatprep.subr.bf16.mxu0 %v8768_v47  ;;  %v8832_v46 = vld [vmem:[#allocation5 + $0x1388] ss:$48 sps:$4 sm:$0xff]  }
 0x108   :  { %6191 = vmatprep.subr.bf16.mxu1 %v8771_v49  ;;  %v8835_v47 = vld [vmem:[#allocation5 + $0x1988] ss:$48 sps:$4 sm:$0xff]   ;;  %v8843_v49 = vld [vmem:[#allocation5 + $0x192c] ss:$48 sps:$4 sm:$0xff]  }
 0x10a   :  { %6149 = vmatpush2.bf16.msra.mxu0 %v8766_v50  ;;  %v8838_v50 = vld [vmem:[#allocation5 + $0x1328] ss:$48 sps:$4 sm:$0xff]  }
 0x10b   :  { %6192 = vmatpush2.bf16.msra.mxu1 %v8769_v51  ;;  %6150 = vmatprep.subr.bf16.mxu0 %v8774_v52  ;;  %v8841_v51 = vld [vmem:[#allocation5 + $0x1928] ss:$48 sps:$4 sm:$0xff]   ;;  %v8846_v52 = vld [vmem:[#allocation5 + $0x12cc] ss:$48 sps:$4 sm:$0xff]  }
 0x10c   :  { %6193 = vmatprep.subr.bf16.mxu1 %v8777_v53  ;;  %v8849_v53 = vld [vmem:[#allocation5 + $0x18cc] ss:$48 sps:$4 sm:$0xff]  }
 0x10e   :  { %6151 = vmatpush2.bf16.msra.mxu0 %v8772_v54  ;;  %v8844_v54 = vld [vmem:[#allocation5 + $0x12c8] ss:$48 sps:$4 sm:$0xff]  }
 0x10f   :  { %6194 = vmatpush2.bf16.msra.mxu1 %v8775_v55  ;;  %6152 = vmatprep.subr.bf16.mxu0 %v8780_v56  ;;  %v8847_v55 = vld [vmem:[#allocation5 + $0x18c8] ss:$48 sps:$4 sm:$0xff]   ;;  %v8852_v56 = vld [vmem:[#allocation5 + $0x126c] ss:$48 sps:$4 sm:$0xff]  }
 0x110   :  { %6195 = vmatprep.subr.bf16.mxu1 %v8783_v57  ;;  %v8855_v57 = vld [vmem:[#allocation5 + $0x186c] ss:$48 sps:$4 sm:$0xff]  }
 0x112   :  { %6153 = vmatpush2.bf16.msra.mxu0 %v8778_v58  ;;  %v8850_v58 = vld [vmem:[#allocation5 + $0x1268] ss:$48 sps:$4 sm:$0xff]  }
 0x113   :  { %6196 = vmatpush2.bf16.msra.mxu1 %v8781_v59  ;;  %6154 = vmatprep.subr.bf16.mxu0 %v8786_v60  ;;  %v8853_v59 = vld [vmem:[#allocation5 + $0x1868] ss:$48 sps:$4 sm:$0xff]   ;;  %v8858_v60 = vld [vmem:[#allocation5 + $0x120c] ss:$48 sps:$4 sm:$0xff]  }
 0x114   :  { %6197 = vmatprep.subr.bf16.mxu1 %v8789_v61  ;;  %v8861_v61 = vld [vmem:[#allocation5 + $0x180c] ss:$48 sps:$4 sm:$0xff]  }
 0x116   :  { %6155 = vmatpush2.bf16.msra.mxu0 %v8784_v62  ;;  %v8856_v62 = vld [vmem:[#allocation5 + $0x1208] ss:$48 sps:$4 sm:$0xff]  }
 0x117   :  { %6198 = vmatpush2.bf16.msra.mxu1 %v8787_v63  ;;  %6156 = vmatprep.subr.bf16.mxu0 %v8792_v0  ;;  %v8859_v63 = vld [vmem:[#allocation5 + $0x1808] ss:$48 sps:$4 sm:$0xff]   ;;  %v8864_v0 = vld [vmem:[#allocation5 + $0x17ac] ss:$48 sps:$4 sm:$0xff]  }
 0x118   :  { %6199 = vmatprep.subr.bf16.mxu1 %v8795_v1  ;;  %v8867_v1 = vld [vmem:[#allocation5 + $0x1dac] ss:$48 sps:$4 sm:$0xff]  }
 0x11a   :  { %6157 = vmatpush2.bf16.msra.mxu0 %v8790_v2  ;;  %v8862_v2 = vld [vmem:[#allocation5 + $0x17a8] ss:$48 sps:$4 sm:$0xff]  }
 0x11b   :  { %6200 = vmatpush2.bf16.msra.mxu1 %v8793_v3  ;;  %6158 = vmatprep.subr.bf16.mxu0 %v8798_v5  ;;  %v8865_v3 = vld [vmem:[#allocation5 + $0x1da8] ss:$48 sps:$4 sm:$0xff]   ;;  %v8870_v5 = vld [vmem:[#allocation5 + $0x174c] ss:$48 sps:$4 sm:$0xff]  }
 0x11c   :  { %6201 = vmatprep.subr.bf16.mxu1 %v8801_v6  ;;  %v8873_v6 = vld [vmem:[#allocation5 + $0x1d4c] ss:$48 sps:$4 sm:$0xff]  }
 0x11e   :  { %6159 = vmatpush2.bf16.msra.mxu0 %v8796_v7  ;;  %v8868_v7 = vld [vmem:[#allocation5 + $0x1748] ss:$48 sps:$4 sm:$0xff]  }
 0x11f   :  { %6202 = vmatpush2.bf16.msra.mxu1 %v8799_v8  ;;  %6160 = vmatprep.subr.bf16.mxu0 %v8804_v9  ;;  %v8871_v8 = vld [vmem:[#allocation5 + $0x1d48] ss:$48 sps:$4 sm:$0xff]   ;;  %v8876_v9 = vld [vmem:[#allocation5 + $0x16ec] ss:$48 sps:$4 sm:$0xff]  }
 0x120   :  { %6203 = vmatprep.subr.bf16.mxu1 %v8807_v11  ;;  %v8879_v11 = vld [vmem:[#allocation5 + $0x1cec] ss:$48 sps:$4 sm:$0xff]  }
 0x122   :  { %6161 = vmatpush2.bf16.msra.mxu0 %v8802_v12  ;;  %v8874_v12 = vld [vmem:[#allocation5 + $0x16e8] ss:$48 sps:$4 sm:$0xff]  }
 0x123   :  { %6204 = vmatpush2.bf16.msra.mxu1 %v8805_v13  ;;  %6162 = vmatprep.subr.bf16.mxu0 %v8810_v14  ;;  %v8877_v13 = vld [vmem:[#allocation5 + $0x1ce8] ss:$48 sps:$4 sm:$0xff]   ;;  %v8882_v14 = vld [vmem:[#allocation5 + $0x168c] ss:$48 sps:$4 sm:$0xff]  }
 0x124   :  { %6205 = vmatprep.subr.bf16.mxu1 %v8813_v15  ;;  %v8885_v15 = vld [vmem:[#allocation5 + $0x1c8c] ss:$48 sps:$4 sm:$0xff]  }
 0x126   :  { %6163 = vmatpush2.bf16.msra.mxu0 %v8808_v17  ;;  %v8880_v17 = vld [vmem:[#allocation5 + $0x1688] ss:$48 sps:$4 sm:$0xff]  }
 0x127   :  { %6206 = vmatpush2.bf16.msra.mxu1 %v8811_v18  ;;  %6218 = vmatprep.subr.bf16.mxu0 %v8816_v19  ;;  %v8883_v18 = vld [vmem:[#allocation5 + $0x1c88] ss:$48 sps:$4 sm:$0xff]   ;;  %v8888_v19 = vld [vmem:[#allocation5 + $0x162c] ss:$48 sps:$4 sm:$0xff]  }
 0x128   :  { %6261 = vmatprep.subr.bf16.mxu1 %v8819_v21  ;;  %v8891_v21 = vld [vmem:[#allocation5 + $0x1c2c] ss:$48 sps:$4 sm:$0xff]  }
 0x129   :  { %v5908_v27 = vpop.f32.mrf.mxu0  ;;  %6165 = vmatmul.mubr.bf16.vlgmr.msra.gmra.mxu0 %v9871_v29  ;;  %v8900_v29 = vld [vmem:[#allocation5 + $0x156c] ss:$48 sps:$4 sm:$0xff]  }
 0x12a   :  { %v5951_v28 = vpop.f32.mrf.mxu1  ;;  %6208 = vmatmul.mubr.bf16.vlgmr.msra.gmra.mxu1 %v10033_v10  ;;  %6219 = vmatpush1.bf16.msra.mxu0 %v8814_v22  ;;  %v8886_v22 = vld [vmem:[#allocation5 + $0x1628] ss:$48 sps:$4 sm:$0xff]  }
 0x12b   :  { %v10049_v30 = vadd.f32 %v5951_v28, %v5908_v27  ;;  %6262 = vmatpush1.bf16.msra.mxu1 %v8817_v23  ;;  %v5910_v32 = vpop.f32.mrf.mxu0  ;;  %6220 = vmatprep.subr.bf16.mxu0 %v8822_v24  ;;  %v8889_v23 = vld [vmem:[#allocation5 + $0x1c28] ss:$48 sps:$4 sm:$0xff]   ;;  %v8894_v24 = vld [vmem:[#allocation5 + $0x15cc] ss:$48 sps:$4 sm:$0xff]  }
 0x12c   :  { %v5953_v33 = vpop.f32.mrf.mxu1  ;;  %6263 = vmatprep.subr.bf16.mxu1 %v8825_v25  ;;  %6250 = vmatprep.mubr.bf16.mxu0 %v9872_v36  ;;  %v8897_v25 = vld [vmem:[#allocation5 + $0x1bcc] ss:$48 sps:$4 sm:$0xff]   ;;  %v8892_v27 = vld [vmem:[#allocation5 + $0x15c8] ss:$48 sps:$4 sm:$0xff]  }
 0x12d   :  { %v10051_v34 = vadd.f32 %v5953_v33, %v5910_v32  ;;  %6293 = vmatprep.mubr.bf16.mxu1 %v10036_v20  ;;  %v5912_v37 = vpop.f32.mrf.mxu0  ;;  %v8840_v20 = vld [vmem:[#allocation5 + $0x132c] ss:$48 sps:$4 sm:$0xff]   ;;  %v8895_v28 = vld [vmem:[#allocation5 + $0x1bc8] ss:$48 sps:$4 sm:$0xff]  }
 0x12e   :  { %v5955_v10 = vpop.f32.mrf.mxu1  ;;  %6221 = vmatpush1.bf16.msra.mxu0 %v8820_v4  ;;  %v8903_v4 = vld [vmem:[#allocation5 + $0x1b6c] ss:$48 sps:$4 sm:$0xff]   ;;  %v8907_v36 = vld [vmem:[#allocation5 + $0x1b08] ss:$48 sps:$4 sm:$0xff]  }
 0x12f   :  { %v10054_v40 = vadd.f32 %v5955_v10, %v5912_v37  ;;  %6264 = vmatpush1.bf16.msra.mxu1 %v8823_v48  ;;  %v5914_v42 = vpop.f32.mrf.mxu0  ;;  %6222 = vmatprep.subr.bf16.mxu0 %v8828_v31  ;;  %v8898_v48 = vld [vmem:[#allocation5 + $0x1568] ss:$48 sps:$4 sm:$0xff]   ;;  %v8906_v32 = vld [vmem:[#allocation5 + $0x150c] ss:$48 sps:$4 sm:$0xff]   ;;  %v8912_v37 = vld [vmem:[#allocation5 + $0x2b4] ss:$48 sps:$4 sm:$0xff]  }
 0x130   :  { %v5957_v43 = vpop.f32.mrf.mxu1  ;;  %6265 = vmatprep.subr.bf16.mxu1 %v8831_v35  ;;  %v8901_v31 = vld [vmem:[#allocation5 + $0x1b68] ss:$48 sps:$4 sm:$0xff]   ;;  %v8909_v33 = vld [vmem:[#allocation5 + $0x1b0c] ss:$48 sps:$4 sm:$0xff]   ;;  %v8915_v10 = vld [vmem:[#allocation5 + $0x8b4] ss:$48 sps:$4 sm:$0xff]  }
 0x131   :  { %v10056_v45 = vadd.f32 %v5957_v43, %v5914_v42  ;;  %v8904_v35 = vld [vmem:[#allocation5 + $0x1508] ss:$48 sps:$4 sm:$0xff]   ;;  %v8921_v42 = vld [vmem:[#allocation5 + $0x854] ss:$48 sps:$4 sm:$0xff]   ;;  %v8916_v43 = vld [vmem:[#allocation5 + $0x250] ss:$48 sps:$4 sm:$0xff]  }
 0x132   :  { %6223 = vmatpush1.bf16.msra.mxu0 %v8826_v38  ;;  %v8910_v38 = vld [vmem:[#allocation5 + $0x2b0] ss:$48 sps:$4 sm:$0xff]  }
 0x133   :  { %6266 = vmatpush1.bf16.msra.mxu1 %v8829_v39  ;;  %6224 = vmatprep.subr.bf16.mxu0 %v8834_v41  ;;  %v8913_v39 = vld [vmem:[#allocation5 + $0x8b0] ss:$48 sps:$4 sm:$0xff]   ;;  %v8918_v41 = vld [vmem:[#allocation5 + $0x254] ss:$48 sps:$4 sm:$0xff]  }
 0x134   :  { %6267 = vmatprep.subr.bf16.mxu1 %v8837_v44  ;;  %v8919_v44 = vld [vmem:[#allocation5 + $0x850] ss:$48 sps:$4 sm:$0xff]  }
 0x136   :  { %6225 = vmatpush1.bf16.msra.mxu0 %v8832_v46 }
 0x137   :  { %6268 = vmatpush1.bf16.msra.mxu1 %v8835_v47  ;;  %6226 = vmatprep.subr.bf16.mxu0 %v8840_v20  ;;  %v9873_v20 = vld [vmem:[#allocation2 + $0x18] ss:$40 sps:$4 sm:$0xff]  }
 0x138   :  { %6269 = vmatprep.subr.bf16.mxu1 %v8843_v49 }
 0x13a   :  { %6227 = vmatpush1.bf16.msra.mxu0 %v8838_v50 }
 0x13b   :  { %6270 = vmatpush1.bf16.msra.mxu1 %v8841_v51  ;;  %6228 = vmatprep.subr.bf16.mxu0 %v8846_v52  ;;  %v8924_v52 = vld [vmem:[#allocation5 + $0x1f4] ss:$48 sps:$4 sm:$0xff]  }
 0x13c   :  { %6271 = vmatprep.subr.bf16.mxu1 %v8849_v53  ;;  %v8927_v53 = vld [vmem:[#allocation5 + $0x7f4] ss:$48 sps:$4 sm:$0xff]  }
 0x13e   :  { %6229 = vmatpush1.bf16.msra.mxu0 %v8844_v54 }
 0x13f   :  { %6272 = vmatpush1.bf16.msra.mxu1 %v8847_v55  ;;  %6230 = vmatprep.subr.bf16.mxu0 %v8852_v56  ;;  %v8922_v56 = vld [vmem:[#allocation5 + $0x1f0] ss:$48 sps:$4 sm:$0xff]  }
 0x140   :  { %6273 = vmatprep.subr.bf16.mxu1 %v8855_v57  ;;  %v8925_v57 = vld [vmem:[#allocation5 + $0x7f0] ss:$48 sps:$4 sm:$0xff]  }
 0x142   :  { %6231 = vmatpush1.bf16.msra.mxu0 %v8850_v58  ;;  %v9874_v58 = vld [vmem:[#allocation2 + $0x4] ss:$40 sps:$4 sm:$0xff]  }
 0x143   :  { %6274 = vmatpush1.bf16.msra.mxu1 %v8853_v59  ;;  %6232 = vmatprep.subr.bf16.mxu0 %v8858_v60 }
 0x144   :  { %6275 = vmatprep.subr.bf16.mxu1 %v8861_v61 }
 0x146   :  { %6233 = vmatpush1.bf16.msra.mxu0 %v8856_v62  ;;  %v8930_v62 = vld [vmem:[#allocation5 + $0x194] ss:$48 sps:$4 sm:$0xff]  }
 0x147   :  { %6276 = vmatpush1.bf16.msra.mxu1 %v8859_v63  ;;  %6234 = vmatprep.subr.bf16.mxu0 %v8864_v0  ;;  %v8933_v63 = vld [vmem:[#allocation5 + $0x794] ss:$48 sps:$4 sm:$0xff]  }
 0x148   :  { %6277 = vmatprep.subr.bf16.mxu1 %v8867_v1 }
 0x14a   :  { %6235 = vmatpush2.bf16.msra.mxu0 %v8862_v2 }
 0x14b   :  { %6278 = vmatpush2.bf16.msra.mxu1 %v8865_v3  ;;  %6236 = vmatprep.subr.bf16.mxu0 %v8870_v5  ;;  %v8931_v3 = vld [vmem:[#allocation5 + $0x790] ss:$48 sps:$4 sm:$0xff]   ;;  %v8939_v5 = vld [vmem:[#allocation5 + $0x734] ss:$48 sps:$4 sm:$0xff]  }
 0x14c   :  { %6279 = vmatprep.subr.bf16.mxu1 %v8873_v6  ;;  %v8934_v6 = vld [vmem:[#allocation5 + $0x130] ss:$48 sps:$4 sm:$0xff]  }
 0x14e   :  { %6237 = vmatpush2.bf16.msra.mxu0 %v8868_v7  ;;  %v8937_v7 = vld [vmem:[#allocation5 + $0x730] ss:$48 sps:$4 sm:$0xff]  }
 0x14f   :  { %6280 = vmatpush2.bf16.msra.mxu1 %v8871_v8  ;;  %6238 = vmatprep.subr.bf16.mxu0 %v8876_v9  ;;  %v8942_v8 = vld [vmem:[#allocation5 + $0xd4] ss:$48 sps:$4 sm:$0xff]  }
 0x150   :  { %6281 = vmatprep.subr.bf16.mxu1 %v8879_v11  ;;  %v8945_v9 = vld [vmem:[#allocation5 + $0x6d4] ss:$48 sps:$4 sm:$0xff]   ;;  %v8943_v11 = vld [vmem:[#allocation5 + $0x6d0] ss:$48 sps:$4 sm:$0xff]  }
 0x152   :  { %6239 = vmatpush2.bf16.msra.mxu0 %v8874_v12  ;;  %v8948_v12 = vld [vmem:[#allocation5 + $0x74] ss:$48 sps:$4 sm:$0xff]  }
 0x153   :  { %6282 = vmatpush2.bf16.msra.mxu1 %v8877_v13  ;;  %6240 = vmatprep.subr.bf16.mxu0 %v8882_v14  ;;  %v8951_v13 = vld [vmem:[#allocation5 + $0x674] ss:$48 sps:$4 sm:$0xff]   ;;  %v8946_v14 = vld [vmem:[#allocation5 + $0x70] ss:$48 sps:$4 sm:$0xff]  }
 0x154   :  { %6283 = vmatprep.subr.bf16.mxu1 %v8885_v15  ;;  %v8949_v15 = vld [vmem:[#allocation5 + $0x670] ss:$48 sps:$4 sm:$0xff]  }
 0x156   :  { %6241 = vmatpush2.bf16.msra.mxu0 %v8880_v17  ;;  %v8954_v17 = vld [vmem:[#allocation5 + $0x14] ss:$48 sps:$4 sm:$0xff]  }
 0x157   :  { %6284 = vmatpush2.bf16.msra.mxu1 %v8883_v18  ;;  %6242 = vmatprep.subr.bf16.mxu0 %v8888_v19  ;;  %v8957_v18 = vld [vmem:[#allocation5 + $0x614] ss:$48 sps:$4 sm:$0xff]   ;;  %v8952_v19 = vld [vmem:[#allocation5 + $0x10] ss:$48 sps:$4 sm:$0xff]  }
 0x158   :  { %6285 = vmatprep.subr.bf16.mxu1 %v8891_v21  ;;  %v8955_v21 = vld [vmem:[#allocation5 + $0x610] ss:$48 sps:$4 sm:$0xff]  }
 0x15a   :  { %6243 = vmatpush2.bf16.msra.mxu0 %v8886_v22  ;;  %v8960_v22 = vld [vmem:[#allocation5 + $0x5b4] ss:$48 sps:$4 sm:$0xff]  }
 0x15b   :  { %6286 = vmatpush2.bf16.msra.mxu1 %v8889_v23  ;;  %6244 = vmatprep.subr.bf16.mxu0 %v8894_v24  ;;  %v8963_v23 = vld [vmem:[#allocation5 + $0xbb4] ss:$48 sps:$4 sm:$0xff]   ;;  %v8958_v24 = vld [vmem:[#allocation5 + $0x5b0] ss:$48 sps:$4 sm:$0xff]  }
 0x15c   :  { %6287 = vmatprep.subr.bf16.mxu1 %v8897_v25  ;;  %v8961_v25 = vld [vmem:[#allocation5 + $0xbb0] ss:$48 sps:$4 sm:$0xff]  }
 0x15e   :  { %6245 = vmatpush2.bf16.msra.mxu0 %v8892_v27  ;;  %v8966_v27 = vld [vmem:[#allocation5 + $0x554] ss:$48 sps:$4 sm:$0xff]  }
 0x15f   :  { %6288 = vmatpush2.bf16.msra.mxu1 %v8895_v28  ;;  %6246 = vmatprep.subr.bf16.mxu0 %v8900_v29  ;;  %v8969_v28 = vld [vmem:[#allocation5 + $0xb54] ss:$48 sps:$4 sm:$0xff]   ;;  %v8964_v29 = vld [vmem:[#allocation5 + $0x550] ss:$48 sps:$4 sm:$0xff]  }
 0x160   :  { %6289 = vmatprep.subr.bf16.mxu1 %v8903_v4  ;;  %v8967_v4 = vld [vmem:[#allocation5 + $0xb50] ss:$48 sps:$4 sm:$0xff]  }
 0x162   :  { %6247 = vmatpush2.bf16.msra.mxu0 %v8898_v48  ;;  %v8972_v48 = vld [vmem:[#allocation5 + $0x4f4] ss:$48 sps:$4 sm:$0xff]  }
 0x163   :  { %6290 = vmatpush2.bf16.msra.mxu1 %v8901_v31  ;;  %6248 = vmatprep.subr.bf16.mxu0 %v8906_v32  ;;  %v8975_v31 = vld [vmem:[#allocation5 + $0xaf4] ss:$48 sps:$4 sm:$0xff]   ;;  %v8970_v32 = vld [vmem:[#allocation5 + $0x4f0] ss:$48 sps:$4 sm:$0xff]  }
 0x164   :  { %6291 = vmatprep.subr.bf16.mxu1 %v8909_v33  ;;  %v8973_v33 = vld [vmem:[#allocation5 + $0xaf0] ss:$48 sps:$4 sm:$0xff]  }
 0x166   :  { %6249 = vmatpush2.bf16.msra.mxu0 %v8904_v35  ;;  %v8978_v35 = vld [vmem:[#allocation5 + $0x494] ss:$48 sps:$4 sm:$0xff]  }
 0x167   :  { %6292 = vmatpush2.bf16.msra.mxu1 %v8907_v36  ;;  %6304 = vmatprep.subr.bf16.mxu0 %v8912_v37  ;;  %v8981_v36 = vld [vmem:[#allocation5 + $0xa94] ss:$48 sps:$4 sm:$0xff]   ;;  %v8976_v37 = vld [vmem:[#allocation5 + $0x490] ss:$48 sps:$4 sm:$0xff]  }
 0x168   :  { %6347 = vmatprep.subr.bf16.mxu1 %v8915_v10  ;;  %v8979_v10 = vld [vmem:[#allocation5 + $0xa90] ss:$48 sps:$4 sm:$0xff]  }
 0x169   :  { %v5994_v46 = vpop.f32.mrf.mxu0  ;;  %6251 = vmatmul.mubr.bf16.vlgmr.msra.gmra.mxu0 %v9873_v20  ;;  %v8996_v20 = vld [vmem:[#allocation5 + $0x374] ss:$48 sps:$4 sm:$0xff]  }
 0x16a   :  { %v6037_v47 = vpop.f32.mrf.mxu1  ;;  %6294 = vmatmul.mubr.bf16.vlgmr.msra.gmra.mxu1 %v10040_v16  ;;  %v5995_v49 = vadd.f32 %v5994_v46, %v10049_v30  ;;  %6305 = vmatpush1.bf16.msra.mxu0 %v8910_v38  ;;  %v8984_v38 = vld [vmem:[#allocation5 + $0x434] ss:$48 sps:$4 sm:$0xff]   ;;  %v8988_v46 = vld [vmem:[#allocation5 + $0x3d0] ss:$48 sps:$4 sm:$0xff]  }
 0x16b   :  { %6348 = vmatpush1.bf16.msra.mxu1 %v8913_v39  ;;  %v5996_v50 = vpop.f32.mrf.mxu0  ;;  %6306 = vmatprep.subr.bf16.mxu0 %v8918_v41  ;;  %v8987_v39 = vld [vmem:[#allocation5 + $0xa34] ss:$48 sps:$4 sm:$0xff]   ;;  %v8982_v41 = vld [vmem:[#allocation5 + $0x430] ss:$48 sps:$4 sm:$0xff]  }
 0x16c   :  { %v6039_v51 = vpop.f32.mrf.mxu1  ;;  %6349 = vmatprep.subr.bf16.mxu1 %v8921_v42  ;;  %v10060_v54 = vadd.f32 %v6037_v47, %v5995_v49  ;;  %v5997_v55 = vadd.f32 %v5996_v50, %v10051_v34  ;;  %6336 = vmatprep.mubr.bf16.mxu0 %v9874_v58  ;;  %v8985_v42 = vld [vmem:[#allocation5 + $0xa30] ss:$48 sps:$4 sm:$0xff]   ;;  %v8999_v49 = vld [vmem:[#allocation5 + $0x974] ss:$48 sps:$4 sm:$0xff]  }
 0x16d   :  { %6379 = vmatprep.mubr.bf16.mxu1 %v10044_v26  ;;  %v5998_v16 = vpop.f32.mrf.mxu0  ;;  %v8928_v26 = vld [vmem:[#allocation5 + $0x190] ss:$48 sps:$4 sm:$0xff]   ;;  %v9011_v58 = vld [vmem:[#allocation5 + $0x14b4] ss:$48 sps:$4 sm:$0xff]  }
 0x16e   :  { %v6041_v30 = vpop.f32.mrf.mxu1  ;;  %v10064_v59 = vadd.f32 %v6039_v51, %v5997_v55  ;;  %v5999_v60 = vadd.f32 %v5998_v16, %v10054_v40  ;;  %6307 = vmatpush1.bf16.msra.mxu0 %v8916_v43  ;;  %v8936_v40 = vld [vmem:[#allocation5 + $0x134] ss:$48 sps:$4 sm:$0xff]   ;;  %v8991_v47 = vld [vmem:[#allocation5 + $0x9d0] ss:$48 sps:$4 sm:$0xff]  }
 0x16f   :  { %6350 = vmatpush1.bf16.msra.mxu1 %v8919_v44  ;;  %v6000_v61 = vpop.f32.mrf.mxu0  ;;  %6308 = vmatprep.subr.bf16.mxu0 %v8924_v52  ;;  %v8990_v43 = vld [vmem:[#allocation5 + $0x3d4] ss:$48 sps:$4 sm:$0xff]   ;;  %v8994_v50 = vld [vmem:[#allocation5 + $0x370] ss:$48 sps:$4 sm:$0xff]  }
 0x170   :  { %6351 = vmatprep.subr.bf16.mxu1 %v8927_v53  ;;  %v10067_v34 = vadd.f32 %v6041_v30, %v5999_v60  ;;  %v6001_v0 = vadd.f32 %v6000_v61, %v10056_v45  ;;  %v6043_v1 = vpop.f32.mrf.mxu1  ;;  %v8940_v45 = vld [vmem:[#allocation5 + $0xd0] ss:$48 sps:$4 sm:$0xff]   ;;  %v8993_v44 = vld [vmem:[#allocation5 + $0x9d4] ss:$48 sps:$4 sm:$0xff]  }
 0x171   :  { %v8997_v51 = vld [vmem:[#allocation5 + $0x970] ss:$48 sps:$4 sm:$0xff]   ;;  %v9002_v52 = vld [vmem:[#allocation5 + $0x314] ss:$48 sps:$4 sm:$0xff]  }
 0x172   :  { %v10070_v2 = vadd.f32 %v6043_v1, %v6001_v0  ;;  %6309 = vmatpush1.bf16.msra.mxu0 %v8922_v56  ;;  %v9005_v53 = vld [vmem:[#allocation5 + $0x914] ss:$48 sps:$4 sm:$0xff]   ;;  %v9000_v55 = vld [vmem:[#allocation5 + $0x310] ss:$48 sps:$4 sm:$0xff]  }
 0x173   :  { %6352 = vmatpush1.bf16.msra.mxu1 %v8925_v57  ;;  %6310 = vmatprep.subr.bf16.mxu0 %v8930_v62  ;;  %v9003_v56 = vld [vmem:[#allocation5 + $0x910] ss:$48 sps:$4 sm:$0xff]   ;;  %v9008_v57 = vld [vmem:[#allocation5 + $0xeb4] ss:$48 sps:$4 sm:$0xff]  }
 0x174   :  { %6353 = vmatprep.subr.bf16.mxu1 %v8933_v63  ;;  %v9006_v16 = vld [vmem:[#allocation5 + $0xeb0] ss:$48 sps:$4 sm:$0xff]   ;;  %v9014_v60 = vld [vmem:[#allocation5 + $0xe54] ss:$48 sps:$4 sm:$0xff]  }
 0x175   :  { %v9009_v30 = vld [vmem:[#allocation5 + $0x14b0] ss:$48 sps:$4 sm:$0xff]   ;;  %v9017_v61 = vld [vmem:[#allocation5 + $0x1454] ss:$48 sps:$4 sm:$0xff]  }
 0x176   :  { %6311 = vmatpush1.bf16.msra.mxu0 %v8928_v26  ;;  %v9012_v62 = vld [vmem:[#allocation5 + $0xe50] ss:$48 sps:$4 sm:$0xff]  }
 0x177   :  { %6354 = vmatpush1.bf16.msra.mxu1 %v8931_v3  ;;  %6312 = vmatprep.subr.bf16.mxu0 %v8936_v40  ;;  %v9015_v63 = vld [vmem:[#allocation5 + $0x1450] ss:$48 sps:$4 sm:$0xff]   ;;  %v10395_v3 = vlaneseq }
 0x178   :  { %6355 = vmatprep.subr.bf16.mxu1 %v8939_v5  ;;  %v9875_v1 = vld [vmem:[#allocation2] ss:$40 sps:$4 sm:$0xff]  }
 0x179   :  { %v9876_v26 = vld [vmem:[#allocation2 + $0x8] ss:$40 sps:$4 sm:$0xff]  }
 0x17a   :  { %6313 = vmatpush1.bf16.msra.mxu0 %v8934_v6  ;;  %v9020_v6 = vld [vmem:[#allocation5 + $0xdf4] ss:$48 sps:$4 sm:$0xff]  }
 0x17b   :  { %6356 = vmatpush1.bf16.msra.mxu1 %v8937_v7  ;;  %6314 = vmatprep.subr.bf16.mxu0 %v8942_v8  ;;  %v9023_v7 = vld [vmem:[#allocation5 + $0x13f4] ss:$48 sps:$4 sm:$0xff]  }
 0x17c   :  { %6357 = vmatprep.subr.bf16.mxu1 %v8945_v9  ;;  %v9018_v9 = vld [vmem:[#allocation5 + $0xdf0] ss:$48 sps:$4 sm:$0xff]  }
 0x17e   :  { %6315 = vmatpush1.bf16.msra.mxu0 %v8940_v45  ;;  %v9021_v45 = vld [vmem:[#allocation5 + $0x13f0] ss:$48 sps:$4 sm:$0xff]  }
 0x17f   :  { %6358 = vmatpush1.bf16.msra.mxu1 %v8943_v11  ;;  %6316 = vmatprep.subr.bf16.mxu0 %v8948_v12  ;;  %v9877_v11 = vld [vmem:[#allocation2 + $0x14] ss:$40 sps:$4 sm:$0xff]  }
 0x180   :  { %6359 = vmatprep.subr.bf16.mxu1 %v8951_v13  ;;  %v9878_v12 = vld [vmem:[#allocation2 + $0x1c] ss:$40 sps:$4 sm:$0xff]  }
 0x182   :  { %6317 = vmatpush1.bf16.msra.mxu0 %v8946_v14  ;;  %v10075_v14 = vshrl.u32 %v10395_v3, 7 }
 0x183   :  { %6360 = vmatpush1.bf16.msra.mxu1 %v8949_v15  ;;  %6318 = vmatprep.subr.bf16.mxu0 %v8954_v17  ;;  %v9026_v17 = vld [vmem:[#allocation5 + $0xd94] ss:$48 sps:$4 sm:$0xff]  }
 0x184   :  { %6361 = vmatprep.subr.bf16.mxu1 %v8957_v18  ;;  %v9029_v18 = vld [vmem:[#allocation5 + $0x1394] ss:$48 sps:$4 sm:$0xff]   ;;  %vm7201_vm0 = vcmp.lt.s32.totalorder %v10075_v14, 1  ;;  %vm7232_vm4 = vcmp.lt.s32.totalorder %v10075_v14, 7 }
 0x186   :  { %6319 = vmatpush1.bf16.msra.mxu0 %v8952_v19 }
 0x187   :  { %6362 = vmatpush1.bf16.msra.mxu1 %v8955_v21  ;;  %6320 = vmatprep.subr.bf16.mxu0 %v8960_v22  ;;  %v9024_v22 = vld [vmem:[#allocation5 + $0xd90] ss:$48 sps:$4 sm:$0xff]  }
 0x188   :  { %6363 = vmatprep.subr.bf16.mxu1 %v8963_v23  ;;  %v9027_v23 = vld [vmem:[#allocation5 + $0x1390] ss:$48 sps:$4 sm:$0xff]  }
 0x18a   :  { %6321 = vmatpush2.bf16.msra.mxu0 %v8958_v24 }
 0x18b   :  { %6364 = vmatpush2.bf16.msra.mxu1 %v8961_v25  ;;  %6322 = vmatprep.subr.bf16.mxu0 %v8966_v27 }
 0x18c   :  { %6365 = vmatprep.subr.bf16.mxu1 %v8969_v28  ;;  %v9032_v28 = vld [vmem:[#allocation5 + $0xd34] ss:$48 sps:$4 sm:$0xff]  }
 0x18e   :  { %6323 = vmatpush2.bf16.msra.mxu0 %v8964_v29  ;;  %v9035_v29 = vld [vmem:[#allocation5 + $0x1334] ss:$48 sps:$4 sm:$0xff]  }
 0x18f   :  { %6366 = vmatpush2.bf16.msra.mxu1 %v8967_v4  ;;  %6324 = vmatprep.subr.bf16.mxu0 %v8972_v48  ;;  %v9030_v48 = vld [vmem:[#allocation5 + $0xd30] ss:$48 sps:$4 sm:$0xff]  }
 0x190   :  { %6367 = vmatprep.subr.bf16.mxu1 %v8975_v31  ;;  %v9033_v31 = vld [vmem:[#allocation5 + $0x1330] ss:$48 sps:$4 sm:$0xff]  }
 0x192   :  { %6325 = vmatpush2.bf16.msra.mxu0 %v8970_v32  ;;  %v9038_v32 = vld [vmem:[#allocation5 + $0xcd4] ss:$48 sps:$4 sm:$0xff]  }
 0x193   :  { %6368 = vmatpush2.bf16.msra.mxu1 %v8973_v33  ;;  %6326 = vmatprep.subr.bf16.mxu0 %v8978_v35  ;;  %v9041_v33 = vld [vmem:[#allocation5 + $0x12d4] ss:$48 sps:$4 sm:$0xff]   ;;  %v9036_v35 = vld [vmem:[#allocation5 + $0xcd0] ss:$48 sps:$4 sm:$0xff]  }
 0x194   :  { %6369 = vmatprep.subr.bf16.mxu1 %v8981_v36  ;;  %v9039_v36 = vld [vmem:[#allocation5 + $0x12d0] ss:$48 sps:$4 sm:$0xff]  }
 0x196   :  { %6327 = vmatpush2.bf16.msra.mxu0 %v8976_v37  ;;  %v9044_v37 = vld [vmem:[#allocation5 + $0xc74] ss:$48 sps:$4 sm:$0xff]  }
 0x197   :  { %6370 = vmatpush2.bf16.msra.mxu1 %v8979_v10  ;;  %6328 = vmatprep.subr.bf16.mxu0 %v8984_v38  ;;  %v9047_v10 = vld [vmem:[#allocation5 + $0x1274] ss:$48 sps:$4 sm:$0xff]   ;;  %v9042_v38 = vld [vmem:[#allocation5 + $0xc70] ss:$48 sps:$4 sm:$0xff]  }
 0x198   :  { %6371 = vmatprep.subr.bf16.mxu1 %v8987_v39  ;;  %v9045_v39 = vld [vmem:[#allocation5 + $0x1270] ss:$48 sps:$4 sm:$0xff]  }
 0x19a   :  { %6329 = vmatpush2.bf16.msra.mxu0 %v8982_v41  ;;  %v9050_v41 = vld [vmem:[#allocation5 + $0xc14] ss:$48 sps:$4 sm:$0xff]  }
 0x19b   :  { %6372 = vmatpush2.bf16.msra.mxu1 %v8985_v42  ;;  %6330 = vmatprep.subr.bf16.mxu0 %v8990_v43  ;;  %v9053_v42 = vld [vmem:[#allocation5 + $0x1214] ss:$48 sps:$4 sm:$0xff]   ;;  %v9048_v43 = vld [vmem:[#allocation5 + $0xc10] ss:$48 sps:$4 sm:$0xff]  }
 0x19c   :  { %6373 = vmatprep.subr.bf16.mxu1 %v8993_v44  ;;  %v9051_v44 = vld [vmem:[#allocation5 + $0x1210] ss:$48 sps:$4 sm:$0xff]  }
 0x19e   :  { %6331 = vmatpush2.bf16.msra.mxu0 %v8988_v46  ;;  %v9056_v46 = vld [vmem:[#allocation5 + $0x11b4] ss:$48 sps:$4 sm:$0xff]  }
 0x19f   :  { %6374 = vmatpush2.bf16.msra.mxu1 %v8991_v47  ;;  %6332 = vmatprep.subr.bf16.mxu0 %v8996_v20  ;;  %v9059_v47 = vld [vmem:[#allocation5 + $0x17b4] ss:$48 sps:$4 sm:$0xff]   ;;  %v9054_v20 = vld [vmem:[#allocation5 + $0x11b0] ss:$48 sps:$4 sm:$0xff]  }
 0x1a0   :  { %6375 = vmatprep.subr.bf16.mxu1 %v8999_v49  ;;  %v9057_v49 = vld [vmem:[#allocation5 + $0x17b0] ss:$48 sps:$4 sm:$0xff]  }
 0x1a2   :  { %6333 = vmatpush2.bf16.msra.mxu0 %v8994_v50  ;;  %v9062_v50 = vld [vmem:[#allocation5 + $0x1154] ss:$48 sps:$4 sm:$0xff]  }
 0x1a3   :  { %6376 = vmatpush2.bf16.msra.mxu1 %v8997_v51  ;;  %6334 = vmatprep.subr.bf16.mxu0 %v9002_v52  ;;  %v9065_v51 = vld [vmem:[#allocation5 + $0x1754] ss:$48 sps:$4 sm:$0xff]   ;;  %v9060_v52 = vld [vmem:[#allocation5 + $0x1150] ss:$48 sps:$4 sm:$0xff]  }
 0x1a4   :  { %6377 = vmatprep.subr.bf16.mxu1 %v9005_v53  ;;  %v9063_v53 = vld [vmem:[#allocation5 + $0x1750] ss:$48 sps:$4 sm:$0xff]  }
 0x1a6   :  { %6335 = vmatpush2.bf16.msra.mxu0 %v9000_v55  ;;  %v9068_v55 = vld [vmem:[#allocation5 + $0x10f4] ss:$48 sps:$4 sm:$0xff]  }
 0x1a7   :  { %6378 = vmatpush2.bf16.msra.mxu1 %v9003_v56  ;;  %6390 = vmatprep.subr.bf16.mxu0 %v9008_v57  ;;  %v9071_v56 = vld [vmem:[#allocation5 + $0x16f4] ss:$48 sps:$4 sm:$0xff]   ;;  %v9066_v57 = vld [vmem:[#allocation5 + $0x10f0] ss:$48 sps:$4 sm:$0xff]  }
 0x1a8   :  { %6433 = vmatprep.subr.bf16.mxu1 %v9011_v58  ;;  %v9069_v58 = vld [vmem:[#allocation5 + $0x16f0] ss:$48 sps:$4 sm:$0xff]  }
 0x1a9   :  { %v6080_v0 = vpop.f32.mrf.mxu0  ;;  %6337 = vmatmul.mubr.bf16.vlgmr.msra.gmra.mxu0 %v9875_v1  ;;  %v9081_v1 = vld [vmem:[#allocation5 + $0x1630] ss:$48 sps:$4 sm:$0xff]  }
 0x1aa   :  { %6380 = vmatmul.mubr.bf16.vlgmr.msra.gmra.mxu1 %v9876_v26  ;;  %v6081_v40 = vadd.f32 %v6080_v0, %v10060_v54  ;;  %6391 = vmatpush1.bf16.msra.mxu0 %v9006_v16  ;;  %v9074_v16 = vld [vmem:[#allocation5 + $0x1094] ss:$48 sps:$4 sm:$0xff]   ;;  %v9078_v0 = vld [vmem:[#allocation5 + $0x1030] ss:$48 sps:$4 sm:$0xff]  }
 0x1ab   :  { %6434 = vmatpush1.bf16.msra.mxu1 %v9009_v30  ;;  %v6082_v5 = vpop.f32.mrf.mxu0  ;;  %6392 = vmatprep.subr.bf16.mxu0 %v9014_v60  ;;  %v9077_v30 = vld [vmem:[#allocation5 + $0x1694] ss:$48 sps:$4 sm:$0xff]   ;;  %v9072_v60 = vld [vmem:[#allocation5 + $0x1090] ss:$48 sps:$4 sm:$0xff]  }
 0x1ac   :  { %6435 = vmatprep.subr.bf16.mxu1 %v9017_v61  ;;  %v6083_v8 = vadd.f32 %v6082_v5, %v10064_v59  ;;  %6422 = vmatprep.mubr.bf16.mxu0 %v9877_v11  ;;  %v7193_v59 = vrot.slane %v6081_v40, 7  ;;  %v9075_v61 = vld [vmem:[#allocation5 + $0x1690] ss:$48 sps:$4 sm:$0xff]   ;;  %v9086_v26 = vld [vmem:[#allocation5 + $0xfd4] ss:$48 sps:$4 sm:$0xff]  }
 0x1ad   :  { %6465 = vmatprep.mubr.bf16.mxu1 %v9878_v12  ;;  %v6084_v13 = vpop.f32.mrf.mxu0  ;;  %v9089_v40 = vld [vmem:[#allocation5 + $0x15d4] ss:$48 sps:$4 sm:$0xff]   ;;  %v9084_v5 = vld [vmem:[#allocation5 + $0xfd0] ss:$48 sps:$4 sm:$0xff]  }
 0x1ae   :  { %v6085_v54 = vadd.f32 %v6084_v13, %v10067_v34  ;;  %6393 = vmatpush1.bf16.msra.mxu0 %v9012_v62  ;;  %v7194_v24 = vrot.slane %v6083_v8, 7  ;;  %v9080_v62 = vld [vmem:[#allocation5 + $0x1034] ss:$48 sps:$4 sm:$0xff]   ;;  %v9093_v11 = vld [vmem:[#allocation5 + $0x1570] ss:$48 sps:$4 sm:$0xff]  }
 0x1af   :  { %6436 = vmatpush1.bf16.msra.mxu1 %v9015_v63  ;;  %v6086_v15 = vpop.f32.mrf.mxu0  ;;  %6394 = vmatprep.subr.bf16.mxu0 %v9020_v6  ;;  %v9083_v63 = vld [vmem:[#allocation5 + $0x1634] ss:$48 sps:$4 sm:$0xff]   ;;  %v9087_v6 = vld [vmem:[#allocation5 + $0x15d0] ss:$48 sps:$4 sm:$0xff]  }
 0x1b0   :  { %6437 = vmatprep.subr.bf16.mxu1 %v9023_v7  ;;  %v7197_v19 = vrot.slane %v6085_v54, 7  ;;  %v6087_v21 = vadd.f32 %v6086_v15, %v10070_v2  ;;  %v6123_v7 = vpop.f32.mrf.mxu1  ;;  %v9092_v8 = vld [vmem:[#allocation5 + $0xf74] ss:$48 sps:$4 sm:$0xff]   ;;  %v9096_v15 = vld [vmem:[#allocation5 + $0xf10] ss:$48 sps:$4 sm:$0xff]  }
 0x1b1   :  { %v9098_v13 = vld [vmem:[#allocation5 + $0xf14] ss:$48 sps:$4 sm:$0xff]  }
 0x1b2   :  { %v7198_v25 = vrot.slane %v6087_v21, 7  ;;  %6395 = vmatpush1.bf16.msra.mxu0 %v9018_v9  ;;  %v10082_v34 = vsel %vm7201_vm0, %v7197_v19, %v7193_v59  ;;  %v10086_v27 = vsel %vm7201_vm0, %v7193_v59, %v7197_v19  ;;  %v9095_v9 = vld [vmem:[#allocation5 + $0x1574] ss:$48 sps:$4 sm:$0xff]   ;;  %v6125_v12 = vpop.f32.mrf.mxu1  ;;  %v9107_v19 = vld [vmem:[#allocation5 + $0x2bc] ss:$48 sps:$4 sm:$0xff]  }
 0x1b3   :  { %6438 = vmatpush1.bf16.msra.mxu1 %v9021_v45  ;;  %6396 = vmatprep.subr.bf16.mxu0 %v9026_v17  ;;  %v9090_v45 = vld [vmem:[#allocation5 + $0xf70] ss:$48 sps:$4 sm:$0xff]   ;;  %v9101_v54 = vld [vmem:[#allocation5 + $0x1514] ss:$48 sps:$4 sm:$0xff]  }
 0x1b4   :  { %6439 = vmatprep.subr.bf16.mxu1 %v9029_v18  ;;  %v10090_v2 = vsel %vm7201_vm0, %v7198_v25, %v7194_v24  ;;  %v10094_v4 = vsel %vm7201_vm0, %v7194_v24, %v7198_v25  ;;  %v9099_v17 = vld [vmem:[#allocation5 + $0x1510] ss:$48 sps:$4 sm:$0xff]   ;;  %v6127_v18 = vpop.f32.mrf.mxu1  ;;  %v9104_v59 = vld [vmem:[#allocation5 + $0x1ab4] ss:$48 sps:$4 sm:$0xff]   ;;  %v9113_v25 = vld [vmem:[#allocation5 + $0x25c] ss:$48 sps:$4 sm:$0xff]  }
 0x1b5   :  { %v9102_v21 = vld [vmem:[#allocation5 + $0x1ab0] ss:$48 sps:$4 sm:$0xff]   ;;  %v9110_v24 = vld [vmem:[#allocation5 + $0x1a54] ss:$48 sps:$4 sm:$0xff]  }
 0x1b6   :  { %6397 = vmatpush1.bf16.msra.mxu0 %v9024_v22  ;;  %v9105_v22 = vld [vmem:[#allocation5 + $0x2b8] ss:$48 sps:$4 sm:$0xff]  }
 0x1b7   :  { %6440 = vmatpush1.bf16.msra.mxu1 %v9027_v23  ;;  %6398 = vmatprep.subr.bf16.mxu0 %v9032_v28  ;;  %v6129_v23 = vpop.f32.mrf.mxu1  ;;  %v9108_v28 = vld [vmem:[#allocation5 + $0x1a50] ss:$48 sps:$4 sm:$0xff]  }
 0x1b8   :  { %6441 = vmatprep.subr.bf16.mxu1 %v9035_v29  ;;  %v9111_v29 = vld [vmem:[#allocation5 + $0x258] ss:$48 sps:$4 sm:$0xff]  }
 0x1ba   :  { %6399 = vmatpush1.bf16.msra.mxu0 %v9030_v48 }
 0x1bb   :  { %6442 = vmatpush1.bf16.msra.mxu1 %v9033_v31  ;;  %6400 = vmatprep.subr.bf16.mxu0 %v9038_v32  ;;  %v10096_v32 = vld [vmem:[#allocation2 + $0x10] ss:$40 sps:$4 sm:$0xff]  }
 0x1bc   :  { %6443 = vmatprep.subr.bf16.mxu1 %v9041_v33  ;;  %v9880_v33 = vld [vmem:[#allocation2 + $0x18] ss:$40 sps:$4 sm:$0xff]  }
 0x1be   :  { %6401 = vmatpush1.bf16.msra.mxu0 %v9036_v35 }
 0x1bf   :  { %6444 = vmatpush1.bf16.msra.mxu1 %v9039_v36  ;;  %6402 = vmatprep.subr.bf16.mxu0 %v9044_v37 }
 0x1c0   :  { %6445 = vmatprep.subr.bf16.mxu1 %v9047_v10  ;;  %v9116_v10 = vld [vmem:[#allocation5 + $0x19f4] ss:$48 sps:$4 sm:$0xff]  }
 0x1c2   :  { %6403 = vmatpush1.bf16.msra.mxu0 %v9042_v38  ;;  %v9119_v38 = vld [vmem:[#allocation5 + $0x1fc] ss:$48 sps:$4 sm:$0xff]  }
 0x1c3   :  { %6446 = vmatpush1.bf16.msra.mxu1 %v9045_v39  ;;  %6404 = vmatprep.subr.bf16.mxu0 %v9050_v41 }
 0x1c4   :  { %6447 = vmatprep.subr.bf16.mxu1 %v9053_v42  ;;  %v9114_v42 = vld [vmem:[#allocation5 + $0x19f0] ss:$48 sps:$4 sm:$0xff]  }
 0x1c6   :  { %6405 = vmatpush1.bf16.msra.mxu0 %v9048_v43  ;;  %v9117_v43 = vld [vmem:[#allocation5 + $0x1f8] ss:$48 sps:$4 sm:$0xff]  }
 0x1c7   :  { %6448 = vmatpush1.bf16.msra.mxu1 %v9051_v44  ;;  %6406 = vmatprep.subr.bf16.mxu0 %v9056_v46  ;;  %v10101_v44 = vld [vmem:[#allocation2 + $0x24] ss:$40 sps:$4 sm:$0xff]  }
 0x1c8   :  { %6449 = vmatprep.subr.bf16.mxu1 %v9059_v47  ;;  %v9882_v46 = vld [vmem:[#allocation2 + $0x4] ss:$40 sps:$4 sm:$0xff]  }
 0x1ca   :  { %6407 = vmatpush2.bf16.msra.mxu0 %v9054_v20 }
 0x1cb   :  { %6450 = vmatpush2.bf16.msra.mxu1 %v9057_v49  ;;  %6408 = vmatprep.subr.bf16.mxu0 %v9062_v50 }
 0x1cc   :  { %6451 = vmatprep.subr.bf16.mxu1 %v9065_v51 }
 0x1ce   :  { %6409 = vmatpush2.bf16.msra.mxu0 %v9060_v52  ;;  %v9122_v52 = vld [vmem:[#allocation5 + $0x1994] ss:$48 sps:$4 sm:$0xff]  }
 0x1cf   :  { %6452 = vmatpush2.bf16.msra.mxu1 %v9063_v53  ;;  %6410 = vmatprep.subr.bf16.mxu0 %v9068_v55  ;;  %v9125_v53 = vld [vmem:[#allocation5 + $0x19c] ss:$48 sps:$4 sm:$0xff]  }
 0x1d0   :  { %6453 = vmatprep.subr.bf16.mxu1 %v9071_v56 }
 0x1d2   :  { %6411 = vmatpush2.bf16.msra.mxu0 %v9066_v57 }
 0x1d3   :  { %6454 = vmatpush2.bf16.msra.mxu1 %v9069_v58  ;;  %6412 = vmatprep.subr.bf16.mxu0 %v9074_v16  ;;  %v9120_v16 = vld [vmem:[#allocation5 + $0x1990] ss:$48 sps:$4 sm:$0xff]  }
 0x1d4   :  { %6455 = vmatprep.subr.bf16.mxu1 %v9077_v30  ;;  %v9123_v30 = vld [vmem:[#allocation5 + $0x198] ss:$48 sps:$4 sm:$0xff]  }
 0x1d6   :  { %6413 = vmatpush2.bf16.msra.mxu0 %v9072_v60  ;;  %v9128_v60 = vld [vmem:[#allocation5 + $0x1934] ss:$48 sps:$4 sm:$0xff]  }
 0x1d7   :  { %6456 = vmatpush2.bf16.msra.mxu1 %v9075_v61  ;;  %6414 = vmatprep.subr.bf16.mxu0 %v9080_v62  ;;  %v9131_v61 = vld [vmem:[#allocation5 + $0x13c] ss:$48 sps:$4 sm:$0xff]   ;;  %v9126_v62 = vld [vmem:[#allocation5 + $0x1930] ss:$48 sps:$4 sm:$0xff]  }
 0x1d8   :  { %6457 = vmatprep.subr.bf16.mxu1 %v9083_v63  ;;  %v9129_v63 = vld [vmem:[#allocation5 + $0x138] ss:$48 sps:$4 sm:$0xff]  }
 0x1da   :  { %6415 = vmatpush2.bf16.msra.mxu0 %v9078_v0  ;;  %v9134_v0 = vld [vmem:[#allocation5 + $0x18d4] ss:$48 sps:$4 sm:$0xff]  }
 0x1db   :  { %6458 = vmatpush2.bf16.msra.mxu1 %v9081_v1  ;;  %6416 = vmatprep.subr.bf16.mxu0 %v9086_v26  ;;  %v9137_v1 = vld [vmem:[#allocation5 + $0xdc] ss:$48 sps:$4 sm:$0xff]   ;;  %v9132_v26 = vld [vmem:[#allocation5 + $0x18d0] ss:$48 sps:$4 sm:$0xff]  }
 0x1dc   :  { %6459 = vmatprep.subr.bf16.mxu1 %v9089_v40  ;;  %v9135_v40 = vld [vmem:[#allocation5 + $0xd8] ss:$48 sps:$4 sm:$0xff]  }
 0x1de   :  { %6417 = vmatpush2.bf16.msra.mxu0 %v9084_v5  ;;  %v9140_v5 = vld [vmem:[#allocation5 + $0x1874] ss:$48 sps:$4 sm:$0xff]  }
 0x1df   :  { %6460 = vmatpush2.bf16.msra.mxu1 %v9087_v6  ;;  %6418 = vmatprep.subr.bf16.mxu0 %v9092_v8  ;;  %v9143_v6 = vld [vmem:[#allocation5 + $0x7c] ss:$48 sps:$4 sm:$0xff]   ;;  %v9141_v8 = vld [vmem:[#allocation5 + $0x78] ss:$48 sps:$4 sm:$0xff]  }
 0x1e0   :  { %6461 = vmatprep.subr.bf16.mxu1 %v9095_v9  ;;  %v9146_v9 = vld [vmem:[#allocation5 + $0x1814] ss:$48 sps:$4 sm:$0xff]  }
 0x1e2   :  { %6419 = vmatpush2.bf16.msra.mxu0 %v9090_v45  ;;  %v9149_v45 = vld [vmem:[#allocation5 + $0x1c] ss:$48 sps:$4 sm:$0xff]  }
 0x1e3   :  { %6462 = vmatpush2.bf16.msra.mxu1 %v9093_v11  ;;  %6420 = vmatprep.subr.bf16.mxu0 %v9098_v13  ;;  %v9144_v11 = vld [vmem:[#allocation5 + $0x1810] ss:$48 sps:$4 sm:$0xff]   ;;  %v9152_v13 = vld [vmem:[#allocation5 + $0x1db4] ss:$48 sps:$4 sm:$0xff]  }
 0x1e4   :  { %6463 = vmatprep.subr.bf16.mxu1 %v9101_v54  ;;  %v9155_v54 = vld [vmem:[#allocation5 + $0x5bc] ss:$48 sps:$4 sm:$0xff]  }
 0x1e6   :  { %6421 = vmatpush2.bf16.msra.mxu0 %v9096_v15  ;;  %v9150_v15 = vld [vmem:[#allocation5 + $0x1db0] ss:$48 sps:$4 sm:$0xff]  }
 0x1e7   :  { %6464 = vmatpush2.bf16.msra.mxu1 %v9099_v17  ;;  %6476 = vmatprep.subr.bf16.mxu0 %v9104_v59  ;;  %v9153_v17 = vld [vmem:[#allocation5 + $0x5b8] ss:$48 sps:$4 sm:$0xff]   ;;  %v9161_v59 = vld [vmem:[#allocation5 + $0x55c] ss:$48 sps:$4 sm:$0xff]  }
 0x1e8   :  { %6519 = vmatprep.subr.bf16.mxu1 %v9107_v19  ;;  %v9156_v19 = vld [vmem:[#allocation5 + $0x1d50] ss:$48 sps:$4 sm:$0xff]  }
 0x1e9   :  { %v6166_v48 = vpop.f32.mrf.mxu0  ;;  %6423 = vmatmul.mubr.bf16.vlgmr.msra.gmra.mxu0 %v10096_v32 }
 0x1ea   :  { %v6209_v31 = vpop.f32.mrf.mxu1  ;;  %6466 = vmatmul.mubr.bf16.vlgmr.msra.gmra.mxu1 %v9880_v33  ;;  %v6167_v35 = vadd.f32 %v6166_v48, %v6123_v7  ;;  %6477 = vmatpush1.bf16.msra.mxu0 %v9102_v21  ;;  %v9138_v7 = vld [vmem:[#allocation5 + $0x1870] ss:$48 sps:$4 sm:$0xff]   ;;  %v9159_v21 = vld [vmem:[#allocation5 + $0x558] ss:$48 sps:$4 sm:$0xff]   ;;  %v9176_v33 = vld [vmem:[#allocation5 + $0x1c34] ss:$48 sps:$4 sm:$0xff]  }
 0x1eb   :  { %6520 = vmatpush1.bf16.msra.mxu1 %v9105_v22  ;;  %v6168_v36 = vpop.f32.mrf.mxu0  ;;  %6478 = vmatprep.subr.bf16.mxu0 %v9110_v24  ;;  %v9164_v22 = vld [vmem:[#allocation5 + $0x1cf4] ss:$48 sps:$4 sm:$0xff]   ;;  %v9162_v24 = vld [vmem:[#allocation5 + $0x1cf0] ss:$48 sps:$4 sm:$0xff]  }
 0x1ec   :  { %v6211_v37 = vpop.f32.mrf.mxu1  ;;  %6521 = vmatprep.subr.bf16.mxu1 %v9113_v25  ;;  %v10099_v39 = vadd.f32 %v6209_v31, %v6167_v35  ;;  %v6169_v41 = vadd.f32 %v6168_v36, %v6125_v12  ;;  %6508 = vmatprep.mubr.bf16.mxu0 %v10101_v44  ;;  %v9147_v12 = vld [vmem:[#allocation5 + $0x18] ss:$48 sps:$4 sm:$0xff]   ;;  %v9168_v48 = vld [vmem:[#allocation5 + $0x1c90] ss:$48 sps:$4 sm:$0xff]   ;;  %v9179_v35 = vld [vmem:[#allocation5 + $0x43c] ss:$48 sps:$4 sm:$0xff]  }
 0x1ed   :  { %6551 = vmatprep.mubr.bf16.mxu1 %v9882_v46  ;;  %v6170_v47 = vpop.f32.mrf.mxu0  ;;  %v9165_v25 = vld [vmem:[#allocation5 + $0x4f8] ss:$48 sps:$4 sm:$0xff]   ;;  %v9174_v36 = vld [vmem:[#allocation5 + $0x1c30] ss:$48 sps:$4 sm:$0xff]   ;;  %v9191_v46 = vld [vmem:[#allocation5 + $0x37c] ss:$48 sps:$4 sm:$0xff]  }
 0x1ee   :  { %v6213_v20 = vpop.f32.mrf.mxu1  ;;  %v10104_v49 = vadd.f32 %v6211_v37, %v6169_v41  ;;  %v6171_v50 = vadd.f32 %v6170_v47, %v6127_v18  ;;  %6479 = vmatpush1.bf16.msra.mxu0 %v9108_v28  ;;  %v9158_v18 = vld [vmem:[#allocation5 + $0x1d54] ss:$48 sps:$4 sm:$0xff]   ;;  %v9171_v31 = vld [vmem:[#allocation5 + $0x498] ss:$48 sps:$4 sm:$0xff]   ;;  %v9180_v41 = vld [vmem:[#allocation5 + $0x1bd0] ss:$48 sps:$4 sm:$0xff]  }
 0x1ef   :  { %6522 = vmatpush1.bf16.msra.mxu1 %v9111_v29  ;;  %v6172_v51 = vpop.f32.mrf.mxu0  ;;  %6480 = vmatprep.subr.bf16.mxu0 %v9116_v10  ;;  %v9170_v28 = vld [vmem:[#allocation5 + $0x1c94] ss:$48 sps:$4 sm:$0xff]   ;;  %v9173_v29 = vld [vmem:[#allocation5 + $0x49c] ss:$48 sps:$4 sm:$0xff]   ;;  %v9177_v37 = vld [vmem:[#allocation5 + $0x438] ss:$48 sps:$4 sm:$0xff]  }
 0x1f0   :  { %6523 = vmatprep.subr.bf16.mxu1 %v9119_v38  ;;  %v10106_v55 = vadd.f32 %v6213_v20, %v6171_v50  ;;  %v6173_v56 = vadd.f32 %v6172_v51, %v6129_v23  ;;  %v6215_v57 = vpop.f32.mrf.mxu1  ;;  %v9167_v23 = vld [vmem:[#allocation5 + $0x4fc] ss:$48 sps:$4 sm:$0xff]   ;;  %v9182_v10 = vld [vmem:[#allocation5 + $0x1bd4] ss:$48 sps:$4 sm:$0xff]   ;;  %v9186_v47 = vld [vmem:[#allocation5 + $0x1b70] ss:$48 sps:$4 sm:$0xff]  }
 0x1f1   :  { %v9185_v38 = vld [vmem:[#allocation5 + $0x3dc] ss:$48 sps:$4 sm:$0xff]   ;;  %v9189_v20 = vld [vmem:[#allocation5 + $0x378] ss:$48 sps:$4 sm:$0xff]   ;;  %v9194_v50 = vld [vmem:[#allocation5 + $0x1b14] ss:$48 sps:$4 sm:$0xff]  }
 0x1f2   :  { %v10108_v58 = vadd.f32 %v6215_v57, %v6173_v56  ;;  %6481 = vmatpush1.bf16.msra.mxu0 %v9114_v42  ;;  %v9183_v42 = vld [vmem:[#allocation5 + $0x3d8] ss:$48 sps:$4 sm:$0xff]   ;;  %v9197_v51 = vld [vmem:[#allocation5 + $0x31c] ss:$48 sps:$4 sm:$0xff]  }
 0x1f3   :  { %6524 = vmatpush1.bf16.msra.mxu1 %v9117_v43  ;;  %6482 = vmatprep.subr.bf16.mxu0 %v9122_v52  ;;  %v9188_v43 = vld [vmem:[#allocation5 + $0x1b74] ss:$48 sps:$4 sm:$0xff]   ;;  %v9192_v52 = vld [vmem:[#allocation5 + $0x1b10] ss:$48 sps:$4 sm:$0xff]   ;;  %v9200_v56 = vld [vmem:[#allocation5 + $0x8bc] ss:$48 sps:$4 sm:$0xff]  }
 0x1f4   :  { %6525 = vmatprep.subr.bf16.mxu1 %v9125_v53  ;;  %v9195_v53 = vld [vmem:[#allocation5 + $0x318] ss:$48 sps:$4 sm:$0xff]   ;;  %v9203_v57 = vld [vmem:[#allocation5 + $0xebc] ss:$48 sps:$4 sm:$0xff]  }
 0x1f6   :  { %6483 = vmatpush1.bf16.msra.mxu0 %v9120_v16  ;;  %v9198_v16 = vld [vmem:[#allocation5 + $0x8b8] ss:$48 sps:$4 sm:$0xff]  }
 0x1f7   :  { %6526 = vmatpush1.bf16.msra.mxu1 %v9123_v30  ;;  %6484 = vmatprep.subr.bf16.mxu0 %v9128_v60  ;;  %v9201_v30 = vld [vmem:[#allocation5 + $0xeb8] ss:$48 sps:$4 sm:$0xff]   ;;  %v9206_v60 = vld [vmem:[#allocation5 + $0x85c] ss:$48 sps:$4 sm:$0xff]  }
 0x1f8   :  { %6527 = vmatprep.subr.bf16.mxu1 %v9131_v61  ;;  %v9209_v61 = vld [vmem:[#allocation5 + $0xe5c] ss:$48 sps:$4 sm:$0xff]  }
 0x1fa   :  { %6485 = vmatpush1.bf16.msra.mxu0 %v9126_v62  ;;  %v9204_v62 = vld [vmem:[#allocation5 + $0x858] ss:$48 sps:$4 sm:$0xff]  }
 0x1fb   :  { %6528 = vmatpush1.bf16.msra.mxu1 %v9129_v63  ;;  %6486 = vmatprep.subr.bf16.mxu0 %v9134_v0  ;;  %v9207_v63 = vld [vmem:[#allocation5 + $0xe58] ss:$48 sps:$4 sm:$0xff]  }
 0x1fc   :  { %6529 = vmatprep.subr.bf16.mxu1 %v9137_v1 }
 0x1fe   :  { %6487 = vmatpush1.bf16.msra.mxu0 %v9132_v26  ;;  %v10110_v26 = vld [vmem:[#allocation2 + $0x20] ss:$40 sps:$4 sm:$0xff]  }
 0x1ff   :  { %6530 = vmatpush1.bf16.msra.mxu1 %v9135_v40  ;;  %6488 = vmatprep.subr.bf16.mxu0 %v9140_v5  ;;  %v9884_v40 = vld [vmem:[#allocation2] ss:$40 sps:$4 sm:$0xff]  }
 0x200   :  { %6531 = vmatprep.subr.bf16.mxu1 %v9143_v6 }
 0x202   :  { %6489 = vmatpush1.bf16.msra.mxu0 %v9138_v7 }
 0x203   :  { %6532 = vmatpush1.bf16.msra.mxu1 %v9141_v8  ;;  %6490 = vmatprep.subr.bf16.mxu0 %v9146_v9  ;;  %v9212_v8 = vld [vmem:[#allocation5 + $0x7fc] ss:$48 sps:$4 sm:$0xff]  }
 0x204   :  { %6533 = vmatprep.subr.bf16.mxu1 %v9149_v45  ;;  %v9215_v9 = vld [vmem:[#allocation5 + $0xdfc] ss:$48 sps:$4 sm:$0xff]  }
 0x206   :  { %6491 = vmatpush1.bf16.msra.mxu0 %v9144_v11 }
 0x207   :  { %6534 = vmatpush1.bf16.msra.mxu1 %v9147_v12  ;;  %6492 = vmatprep.subr.bf16.mxu0 %v9152_v13  ;;  %v9210_v12 = vld [vmem:[#allocation5 + $0x7f8] ss:$48 sps:$4 sm:$0xff]  }
 0x208   :  { %6535 = vmatprep.subr.bf16.mxu1 %v9155_v54  ;;  %v9213_v13 = vld [vmem:[#allocation5 + $0xdf8] ss:$48 sps:$4 sm:$0xff]   ;;  %v10115_v54 = vld [vmem:[#allocation2 + $0xc] ss:$40 sps:$4 sm:$0xff]  }
 0x20a   :  { %6493 = vmatpush2.bf16.msra.mxu0 %v9150_v15  ;;  %v9886_v15 = vld [vmem:[#allocation2 + $0x14] ss:$40 sps:$4 sm:$0xff]  }
 0x20b   :  { %6536 = vmatpush2.bf16.msra.mxu1 %v9153_v17  ;;  %6494 = vmatprep.subr.bf16.mxu0 %v9158_v18 }
 0x20c   :  { %6537 = vmatprep.subr.bf16.mxu1 %v9161_v59 }
 0x20e   :  { %6495 = vmatpush2.bf16.msra.mxu0 %v9156_v19 }
 0x20f   :  { %6538 = vmatpush2.bf16.msra.mxu1 %v9159_v21  ;;  %6496 = vmatprep.subr.bf16.mxu0 %v9164_v22  ;;  %v9218_v21 = vld [vmem:[#allocation5 + $0x79c] ss:$48 sps:$4 sm:$0xff]  }
 0x210   :  { %6539 = vmatprep.subr.bf16.mxu1 %v9167_v23 }
 0x212   :  { %6497 = vmatpush2.bf16.msra.mxu0 %v9162_v24  ;;  %v9216_v24 = vld [vmem:[#allocation5 + $0x798] ss:$48 sps:$4 sm:$0xff]  }
 0x213   :  { %6540 = vmatpush2.bf16.msra.mxu1 %v9165_v25  ;;  %6498 = vmatprep.subr.bf16.mxu0 %v9170_v28 }
 0x214   :  { %6541 = vmatprep.subr.bf16.mxu1 %v9173_v29 }
 0x216   :  { %6499 = vmatpush2.bf16.msra.mxu0 %v9168_v48 }
 0x217   :  { %6542 = vmatpush2.bf16.msra.mxu1 %v9171_v31  ;;  %6500 = vmatprep.subr.bf16.mxu0 %v9176_v33  ;;  %v9219_v31 = vld [vmem:[#allocation5 + $0xd98] ss:$48 sps:$4 sm:$0xff]   ;;  %v9227_v33 = vld [vmem:[#allocation5 + $0xd3c] ss:$48 sps:$4 sm:$0xff]  }
 0x218   :  { %6543 = vmatprep.subr.bf16.mxu1 %v9179_v35 }
 0x21a   :  { %6501 = vmatpush2.bf16.msra.mxu0 %v9174_v36 }
 0x21b   :  { %6544 = vmatpush2.bf16.msra.mxu1 %v9177_v37  ;;  %6502 = vmatprep.subr.bf16.mxu0 %v9182_v10  ;;  %v9222_v10 = vld [vmem:[#allocation5 + $0x738] ss:$48 sps:$4 sm:$0xff]  }
 0x21c   :  { %6545 = vmatprep.subr.bf16.mxu1 %v9185_v38  ;;  %v9225_v38 = vld [vmem:[#allocation5 + $0xd38] ss:$48 sps:$4 sm:$0xff]  }
 0x21e   :  { %6503 = vmatpush2.bf16.msra.mxu0 %v9180_v41 }
 0x21f   :  { %6546 = vmatpush2.bf16.msra.mxu1 %v9183_v42  ;;  %6504 = vmatprep.subr.bf16.mxu0 %v9188_v43  ;;  %v9230_v43 = vld [vmem:[#allocation5 + $0x6dc] ss:$48 sps:$4 sm:$0xff]  }
 0x220   :  { %6547 = vmatprep.subr.bf16.mxu1 %v9191_v46  ;;  %v9233_v46 = vld [vmem:[#allocation5 + $0xcdc] ss:$48 sps:$4 sm:$0xff]  }
 0x222   :  { %6505 = vmatpush2.bf16.msra.mxu0 %v9186_v47  ;;  %v9228_v47 = vld [vmem:[#allocation5 + $0x6d8] ss:$48 sps:$4 sm:$0xff]  }
 0x223   :  { %6548 = vmatpush2.bf16.msra.mxu1 %v9189_v20  ;;  %6506 = vmatprep.subr.bf16.mxu0 %v9194_v50  ;;  %v9231_v20 = vld [vmem:[#allocation5 + $0xcd8] ss:$48 sps:$4 sm:$0xff]   ;;  %v9236_v50 = vld [vmem:[#allocation5 + $0x67c] ss:$48 sps:$4 sm:$0xff]  }
 0x224   :  { %6549 = vmatprep.subr.bf16.mxu1 %v9197_v51  ;;  %v9239_v51 = vld [vmem:[#allocation5 + $0xc7c] ss:$48 sps:$4 sm:$0xff]  }
 0x226   :  { %6507 = vmatpush2.bf16.msra.mxu0 %v9192_v52  ;;  %v9234_v52 = vld [vmem:[#allocation5 + $0x678] ss:$48 sps:$4 sm:$0xff]  }
 0x227   :  { %6550 = vmatpush2.bf16.msra.mxu1 %v9195_v53  ;;  %6562 = vmatprep.subr.bf16.mxu0 %v9200_v56  ;;  %v9237_v53 = vld [vmem:[#allocation5 + $0xc78] ss:$48 sps:$4 sm:$0xff]   ;;  %v9242_v56 = vld [vmem:[#allocation5 + $0x61c] ss:$48 sps:$4 sm:$0xff]  }
 0x228   :  { %6605 = vmatprep.subr.bf16.mxu1 %v9203_v57  ;;  %v9245_v57 = vld [vmem:[#allocation5 + $0xc1c] ss:$48 sps:$4 sm:$0xff]  }
 0x229   :  { %v6252_v0 = vpop.f32.mrf.mxu0  ;;  %6509 = vmatmul.mubr.bf16.vlgmr.msra.gmra.mxu0 %v10110_v26 }
 0x22a   :  { %v6295_v1 = vpop.f32.mrf.mxu1  ;;  %6552 = vmatmul.mubr.bf16.vlgmr.msra.gmra.mxu1 %v9884_v40  ;;  %v6253_v5 = vadd.f32 %v6252_v0, %v10099_v39  ;;  %6563 = vmatpush1.bf16.msra.mxu0 %v9198_v16  ;;  %v9240_v16 = vld [vmem:[#allocation5 + $0x618] ss:$48 sps:$4 sm:$0xff]   ;;  %v9254_v0 = vld [vmem:[#allocation5 + $0xb5c] ss:$48 sps:$4 sm:$0xff]  }
 0x22b   :  { %6606 = vmatpush1.bf16.msra.mxu1 %v9201_v30  ;;  %v6254_v6 = vpop.f32.mrf.mxu0  ;;  %6564 = vmatprep.subr.bf16.mxu0 %v9206_v60  ;;  %v9243_v30 = vld [vmem:[#allocation5 + $0xc18] ss:$48 sps:$4 sm:$0xff]   ;;  %v9248_v60 = vld [vmem:[#allocation5 + $0xbbc] ss:$48 sps:$4 sm:$0xff]  }
 0x22c   :  { %v6297_v7 = vpop.f32.mrf.mxu1  ;;  %6607 = vmatprep.subr.bf16.mxu1 %v9209_v61  ;;  %v6296_v45 = vadd.f32 %v6295_v1, %v6253_v5  ;;  %v6255_v11 = vadd.f32 %v6254_v6, %v10104_v49  ;;  %6594 = vmatprep.mubr.bf16.mxu0 %v10115_v54  ;;  %v9221_v49 = vld [vmem:[#allocation5 + $0xd9c] ss:$48 sps:$4 sm:$0xff]   ;;  %v9252_v40 = vld [vmem:[#allocation5 + $0xb58] ss:$48 sps:$4 sm:$0xff]  }
 0x22d   :  { %6637 = vmatprep.mubr.bf16.mxu1 %v9886_v15  ;;  %v6256_v39 = vpop.f32.mrf.mxu0  ;;  %v9251_v61 = vld [vmem:[#allocation5 + $0x11bc] ss:$48 sps:$4 sm:$0xff]   ;;  %v9255_v5 = vld [vmem:[#allocation5 + $0x1158] ss:$48 sps:$4 sm:$0xff]  }
 0x22e   :  { %v6299_v17 = vpop.f32.mrf.mxu1  ;;  %v6298_v18 = vadd.f32 %v6297_v7, %v6255_v11  ;;  %v6257_v59 = vadd.f32 %v6256_v39, %v10106_v55  ;;  %6565 = vmatpush1.bf16.msra.mxu0 %v9204_v62  ;;  %v7195_v28 = vrot.slane %v6296_v45, 7  ;;  %v9224_v55 = vld [vmem:[#allocation5 + $0x73c] ss:$48 sps:$4 sm:$0xff]   ;;  %v9246_v62 = vld [vmem:[#allocation5 + $0xbb8] ss:$48 sps:$4 sm:$0xff]  }
 0x22f   :  { %6608 = vmatpush1.bf16.msra.mxu1 %v9207_v63  ;;  %v6258_v19 = vpop.f32.mrf.mxu0  ;;  %6566 = vmatprep.subr.bf16.mxu0 %v9212_v8  ;;  %v9249_v63 = vld [vmem:[#allocation5 + $0x11b8] ss:$48 sps:$4 sm:$0xff]   ;;  %v9257_v1 = vld [vmem:[#allocation5 + $0x115c] ss:$48 sps:$4 sm:$0xff]  }
 0x230   :  { %6609 = vmatprep.subr.bf16.mxu1 %v9215_v9  ;;  %v6300_v22 = vadd.f32 %v6299_v17, %v6257_v59  ;;  %v6259_v23 = vadd.f32 %v6258_v19, %v10108_v58  ;;  %v6301_v25 = vpop.f32.mrf.mxu1  ;;  %v7196_v35 = vrot.slane %v6298_v18, 7  ;;  %v9260_v6 = vld [vmem:[#allocation5 + $0xafc] ss:$48 sps:$4 sm:$0xff]   ;;  %v9258_v8 = vld [vmem:[#allocation5 + $0xaf8] ss:$48 sps:$4 sm:$0xff]  }
 0x231   :  { %v9263_v7 = vld [vmem:[#allocation5 + $0x10fc] ss:$48 sps:$4 sm:$0xff]   ;;  %v9261_v9 = vld [vmem:[#allocation5 + $0x10f8] ss:$48 sps:$4 sm:$0xff]  }
 0x232   :  { %v7199_v29 = vrot.slane %v6300_v22, 7  ;;  %v6302_v48 = vadd.f32 %v6301_v25, %v6259_v23  ;;  %6567 = vmatpush1.bf16.msra.mxu0 %v9210_v12  ;;  %v9266_v45 = vld [vmem:[#allocation5 + $0xa9c] ss:$48 sps:$4 sm:$0xff]   ;;  %v9264_v12 = vld [vmem:[#allocation5 + $0xa98] ss:$48 sps:$4 sm:$0xff]  }
 0x233   :  { %6610 = vmatpush1.bf16.msra.mxu1 %v9213_v13  ;;  %6568 = vmatprep.subr.bf16.mxu0 %v9218_v21  ;;  %v9269_v11 = vld [vmem:[#allocation5 + $0x109c] ss:$48 sps:$4 sm:$0xff]   ;;  %v9267_v13 = vld [vmem:[#allocation5 + $0x1098] ss:$48 sps:$4 sm:$0xff]  }
 0x234   :  { %6611 = vmatprep.subr.bf16.mxu1 %v9221_v49  ;;  %v7200_v36 = vrot.slane %v6302_v48, 7  ;;  %v10122_v37 = vsel %vm7201_vm0, %v7199_v29, %v7195_v28  ;;  %v10126_v58 = vsel %vm7201_vm0, %v7195_v28, %v7199_v29  ;;  %v9272_v15 = vld [vmem:[#allocation5 + $0xa3c] ss:$48 sps:$4 sm:$0xff]   ;;  %v9270_v17 = vld [vmem:[#allocation5 + $0xa38] ss:$48 sps:$4 sm:$0xff]  }
 0x235   :  { %v9275_v39 = vld [vmem:[#allocation5 + $0x103c] ss:$48 sps:$4 sm:$0xff]   ;;  %v9273_v18 = vld [vmem:[#allocation5 + $0x1038] ss:$48 sps:$4 sm:$0xff]  }
 0x236   :  { %6569 = vmatpush1.bf16.msra.mxu0 %v9216_v24  ;;  %v10130_v41 = vsel %vm7201_vm0, %v7200_v36, %v7196_v35  ;;  %v10134_v42 = vsel %vm7201_vm0, %v7196_v35, %v7200_v36  ;;  %v9278_v59 = vld [vmem:[#allocation5 + $0x9dc] ss:$48 sps:$4 sm:$0xff]   ;;  %v9276_v21 = vld [vmem:[#allocation5 + $0x9d8] ss:$48 sps:$4 sm:$0xff]  }
 0x237   :  { %6612 = vmatpush1.bf16.msra.mxu1 %v9219_v31  ;;  %6570 = vmatprep.subr.bf16.mxu0 %v9224_v55  ;;  %v9281_v19 = vld [vmem:[#allocation5 + $0xfdc] ss:$48 sps:$4 sm:$0xff]   ;;  %v9279_v49 = vld [vmem:[#allocation5 + $0xfd8] ss:$48 sps:$4 sm:$0xff]  }
 0x238   :  { %6613 = vmatprep.subr.bf16.mxu1 %v9227_v33  ;;  %v9284_v22 = vld [vmem:[#allocation5 + $0x97c] ss:$48 sps:$4 sm:$0xff]   ;;  %v9282_v24 = vld [vmem:[#allocation5 + $0x978] ss:$48 sps:$4 sm:$0xff]  }
 0x239   :  { %v9287_v23 = vld [vmem:[#allocation5 + $0xf7c] ss:$48 sps:$4 sm:$0xff]   ;;  %v9285_v25 = vld [vmem:[#allocation5 + $0xf78] ss:$48 sps:$4 sm:$0xff]  }
 0x23a   :  { %6571 = vmatpush1.bf16.msra.mxu0 %v9222_v10  ;;  %v9290_v28 = vld [vmem:[#allocation5 + $0x91c] ss:$48 sps:$4 sm:$0xff]   ;;  %v9288_v48 = vld [vmem:[#allocation5 + $0x918] ss:$48 sps:$4 sm:$0xff]  }
 0x23b   :  { %6614 = vmatpush1.bf16.msra.mxu1 %v9225_v38  ;;  %6572 = vmatprep.subr.bf16.mxu0 %v9230_v43  ;;  %v9293_v29 = vld [vmem:[#allocation5 + $0xf1c] ss:$48 sps:$4 sm:$0xff]   ;;  %v9291_v31 = vld [vmem:[#allocation5 + $0xf18] ss:$48 sps:$4 sm:$0xff]  }
 0x23c   :  { %6615 = vmatprep.subr.bf16.mxu1 %v9233_v46  ;;  %v9296_v55 = vld [vmem:[#allocation5 + $0x14bc] ss:$48 sps:$4 sm:$0xff]   ;;  %v9294_v35 = vld [vmem:[#allocation5 + $0x14b8] ss:$48 sps:$4 sm:$0xff]  }
 0x23d   :  { %v9299_v33 = vld [vmem:[#allocation5 + $0x1abc] ss:$48 sps:$4 sm:$0xff]   ;;  %v9297_v36 = vld [vmem:[#allocation5 + $0x1ab8] ss:$48 sps:$4 sm:$0xff]  }
 0x23e   :  { %6573 = vmatpush1.bf16.msra.mxu0 %v9228_v47  ;;  %v9302_v10 = vld [vmem:[#allocation5 + $0x145c] ss:$48 sps:$4 sm:$0xff]   ;;  %v10136_v47 = vld [vmem:[#allocation2 + $0x8] ss:$40 sps:$4 sm:$0xff]  }
 0x23f   :  { %6616 = vmatpush1.bf16.msra.mxu1 %v9231_v20  ;;  %6574 = vmatprep.subr.bf16.mxu0 %v9236_v50  ;;  %v9305_v38 = vld [vmem:[#allocation5 + $0x1a5c] ss:$48 sps:$4 sm:$0xff]   ;;  %v9300_v50 = vld [vmem:[#allocation5 + $0x1458] ss:$48 sps:$4 sm:$0xff]  }
 0x240   :  { %6617 = vmatprep.subr.bf16.mxu1 %v9239_v51  ;;  %v9303_v51 = vld [vmem:[#allocation5 + $0x1a58] ss:$48 sps:$4 sm:$0xff]  }
 0x242   :  { %6575 = vmatpush1.bf16.msra.mxu0 %v9234_v52 }
 0x243   :  { %6618 = vmatpush1.bf16.msra.mxu1 %v9237_v53  ;;  %6576 = vmatprep.subr.bf16.mxu0 %v9242_v56  ;;  %v9308_v56 = vld [vmem:[#allocation5 + $0x13fc] ss:$48 sps:$4 sm:$0xff]  }
 0x244   :  { %6619 = vmatprep.subr.bf16.mxu1 %v9245_v57  ;;  %v9311_v57 = vld [vmem:[#allocation5 + $0x19fc] ss:$48 sps:$4 sm:$0xff]  }
 0x246   :  { %6577 = vmatpush1.bf16.msra.mxu0 %v9240_v16 }
 0x247   :  { %6620 = vmatpush1.bf16.msra.mxu1 %v9243_v30  ;;  %6578 = vmatprep.subr.bf16.mxu0 %v9248_v60  ;;  %v10144_v30 = vld [vmem:[#allocation2 + $0x1c] ss:$40 sps:$4 sm:$0xff]  }
 0x248   :  { %6621 = vmatprep.subr.bf16.mxu1 %v9251_v61 }
 0x24a   :  { %6579 = vmatpush2.bf16.msra.mxu0 %v9246_v62  ;;  %v9306_v62 = vld [vmem:[#allocation5 + $0x13f8] ss:$48 sps:$4 sm:$0xff]  }
 0x24b   :  { %6622 = vmatpush2.bf16.msra.mxu1 %v9249_v63  ;;  %6580 = vmatprep.subr.bf16.mxu0 %v9254_v0  ;;  %v9309_v63 = vld [vmem:[#allocation5 + $0x19f8] ss:$48 sps:$4 sm:$0xff]  }
 0x24c   :  { %6623 = vmatprep.subr.bf16.mxu1 %v9257_v1 }
 0x24e   :  { %6581 = vmatpush2.bf16.msra.mxu0 %v9252_v40  ;;  %v9314_v40 = vld [vmem:[#allocation5 + $0x139c] ss:$48 sps:$4 sm:$0xff]  }
 0x24f   :  { %6624 = vmatpush2.bf16.msra.mxu1 %v9255_v5  ;;  %6582 = vmatprep.subr.bf16.mxu0 %v9260_v6  ;;  %v9317_v5 = vld [vmem:[#allocation5 + $0x199c] ss:$48 sps:$4 sm:$0xff]  }
 0x250   :  { %6625 = vmatprep.subr.bf16.mxu1 %v9263_v7  ;;  %v9312_v7 = vld [vmem:[#allocation5 + $0x1398] ss:$48 sps:$4 sm:$0xff]  }
 0x252   :  { %6583 = vmatpush2.bf16.msra.mxu0 %v9258_v8  ;;  %v9320_v8 = vld [vmem:[#allocation5 + $0x133c] ss:$48 sps:$4 sm:$0xff]  }
 0x253   :  { %6626 = vmatpush2.bf16.msra.mxu1 %v9261_v9  ;;  %6584 = vmatprep.subr.bf16.mxu0 %v9266_v45  ;;  %v9323_v9 = vld [vmem:[#allocation5 + $0x193c] ss:$48 sps:$4 sm:$0xff]   ;;  %v9318_v45 = vld [vmem:[#allocation5 + $0x1338] ss:$48 sps:$4 sm:$0xff]  }
 0x254   :  { %6627 = vmatprep.subr.bf16.mxu1 %v9269_v11  ;;  %v9321_v11 = vld [vmem:[#allocation5 + $0x1938] ss:$48 sps:$4 sm:$0xff]  }
 0x256   :  { %6585 = vmatpush2.bf16.msra.mxu0 %v9264_v12  ;;  %v9326_v12 = vld [vmem:[#allocation5 + $0x12dc] ss:$48 sps:$4 sm:$0xff]  }
 0x257   :  { %6628 = vmatpush2.bf16.msra.mxu1 %v9267_v13  ;;  %6586 = vmatprep.subr.bf16.mxu0 %v9272_v15  ;;  %v9329_v13 = vld [vmem:[#allocation5 + $0x18dc] ss:$48 sps:$4 sm:$0xff]   ;;  %v9324_v15 = vld [vmem:[#allocation5 + $0x12d8] ss:$48 sps:$4 sm:$0xff]  }
 0x258   :  { %6629 = vmatprep.subr.bf16.mxu1 %v9275_v39  ;;  %v9327_v39 = vld [vmem:[#allocation5 + $0x18d8] ss:$48 sps:$4 sm:$0xff]  }
 0x25a   :  { %6587 = vmatpush2.bf16.msra.mxu0 %v9270_v17  ;;  %v9332_v17 = vld [vmem:[#allocation5 + $0x127c] ss:$48 sps:$4 sm:$0xff]  }
 0x25b   :  { %6630 = vmatpush2.bf16.msra.mxu1 %v9273_v18  ;;  %6588 = vmatprep.subr.bf16.mxu0 %v9278_v59  ;;  %v9335_v18 = vld [vmem:[#allocation5 + $0x187c] ss:$48 sps:$4 sm:$0xff]   ;;  %v9330_v59 = vld [vmem:[#allocation5 + $0x1278] ss:$48 sps:$4 sm:$0xff]  }
 0x25c   :  { %6631 = vmatprep.subr.bf16.mxu1 %v9281_v19  ;;  %v9333_v19 = vld [vmem:[#allocation5 + $0x1878] ss:$48 sps:$4 sm:$0xff]  }
 0x25e   :  { %6589 = vmatpush2.bf16.msra.mxu0 %v9276_v21  ;;  %v9338_v21 = vld [vmem:[#allocation5 + $0x121c] ss:$48 sps:$4 sm:$0xff]  }
 0x25f   :  { %6632 = vmatpush2.bf16.msra.mxu1 %v9279_v49  ;;  %6590 = vmatprep.subr.bf16.mxu0 %v9284_v22  ;;  %v9341_v49 = vld [vmem:[#allocation5 + $0x181c] ss:$48 sps:$4 sm:$0xff]   ;;  %v9336_v22 = vld [vmem:[#allocation5 + $0x1218] ss:$48 sps:$4 sm:$0xff]  }
 0x260   :  { %6633 = vmatprep.subr.bf16.mxu1 %v9287_v23  ;;  %v9339_v23 = vld [vmem:[#allocation5 + $0x1818] ss:$48 sps:$4 sm:$0xff]  }
 0x262   :  { %6591 = vmatpush2.bf16.msra.mxu0 %v9282_v24  ;;  %v9344_v24 = vld [vmem:[#allocation5 + $0x17bc] ss:$48 sps:$4 sm:$0xff]  }
 0x263   :  { %6634 = vmatpush2.bf16.msra.mxu1 %v9285_v25  ;;  %6592 = vmatprep.subr.bf16.mxu0 %v9290_v28  ;;  %v9347_v25 = vld [vmem:[#allocation5 + $0x1dbc] ss:$48 sps:$4 sm:$0xff]   ;;  %v9342_v28 = vld [vmem:[#allocation5 + $0x17b8] ss:$48 sps:$4 sm:$0xff]  }
 0x264   :  { %6635 = vmatprep.subr.bf16.mxu1 %v9293_v29  ;;  %v9345_v29 = vld [vmem:[#allocation5 + $0x1db8] ss:$48 sps:$4 sm:$0xff]  }
 0x266   :  { %6593 = vmatpush2.bf16.msra.mxu0 %v9288_v48  ;;  %v9350_v48 = vld [vmem:[#allocation5 + $0x175c] ss:$48 sps:$4 sm:$0xff]  }
 0x267   :  { %6636 = vmatpush2.bf16.msra.mxu1 %v9291_v31  ;;  %6648 = vmatprep.subr.bf16.mxu0 %v9296_v55  ;;  %v9353_v31 = vld [vmem:[#allocation5 + $0x1d5c] ss:$48 sps:$4 sm:$0xff]   ;;  %v9348_v55 = vld [vmem:[#allocation5 + $0x1758] ss:$48 sps:$4 sm:$0xff]  }
 0x268   :  { %6691 = vmatprep.subr.bf16.mxu1 %v9299_v33  ;;  %v9351_v33 = vld [vmem:[#allocation5 + $0x1d58] ss:$48 sps:$4 sm:$0xff]  }
 0x269   :  { %v6338_v43 = vpop.f32.mrf.mxu0  ;;  %6595 = vmatmul.mubr.bf16.vlgmr.msra.gmra.mxu0 %v10136_v47 }
 0x26a   :  { %v6381_v46 = vpop.f32.mrf.mxu1  ;;  %6638 = vmatmul.mubr.bf16.vlgmr.msra.gmra.mxu1 %v10096_v32  ;;  %6649 = vmatpush1.bf16.msra.mxu0 %v9294_v35  ;;  %v9356_v35 = vld [vmem:[#allocation5 + $0x16fc] ss:$48 sps:$4 sm:$0xff]  }
 0x26b   :  { %v10140_v20 = vadd.f32 %v6381_v46, %v6338_v43  ;;  %6692 = vmatpush1.bf16.msra.mxu1 %v9297_v36  ;;  %v6340_v52 = vpop.f32.mrf.mxu0  ;;  %6650 = vmatprep.subr.bf16.mxu0 %v9302_v10  ;;  %v9359_v36 = vld [vmem:[#allocation5 + $0x1cfc] ss:$48 sps:$4 sm:$0xff]   ;;  %v9354_v10 = vld [vmem:[#allocation5 + $0x16f8] ss:$48 sps:$4 sm:$0xff]  }
 0x26c   :  { %v6383_v53 = vpop.f32.mrf.mxu1  ;;  %6693 = vmatprep.subr.bf16.mxu1 %v9305_v38  ;;  %6680 = vmatprep.mubr.bf16.mxu0 %v10144_v30  ;;  %v9357_v38 = vld [vmem:[#allocation5 + $0x1cf8] ss:$48 sps:$4 sm:$0xff]   ;;  %v9362_v43 = vld [vmem:[#allocation5 + $0x169c] ss:$48 sps:$4 sm:$0xff]  }
 0x26d   :  { %v10142_v16 = vadd.f32 %v6383_v53, %v6340_v52  ;;  %6723 = vmatprep.mubr.bf16.mxu1 %v10101_v44  ;;  %v6342_v32 = vpop.f32.mrf.mxu0  ;;  %v9315_v44 = vld [vmem:[#allocation5 + $0x1998] ss:$48 sps:$4 sm:$0xff]   ;;  %v9365_v46 = vld [vmem:[#allocation5 + $0x1c9c] ss:$48 sps:$4 sm:$0xff]  }
 0x26e   :  { %v6385_v60 = vpop.f32.mrf.mxu1  ;;  %6651 = vmatpush1.bf16.msra.mxu0 %v9300_v50  ;;  %v9360_v50 = vld [vmem:[#allocation5 + $0x1698] ss:$48 sps:$4 sm:$0xff]   ;;  %v9368_v52 = vld [vmem:[#allocation5 + $0x163c] ss:$48 sps:$4 sm:$0xff]  }
 0x26f   :  { %v10148_v61 = vadd.f32 %v6385_v60, %v6342_v32  ;;  %6694 = vmatpush1.bf16.msra.mxu1 %v9303_v51  ;;  %v6344_v0 = vpop.f32.mrf.mxu0  ;;  %6652 = vmatprep.subr.bf16.mxu0 %v9308_v56  ;;  %v9363_v51 = vld [vmem:[#allocation5 + $0x1c98] ss:$48 sps:$4 sm:$0xff]   ;;  %v9371_v53 = vld [vmem:[#allocation5 + $0x1c3c] ss:$48 sps:$4 sm:$0xff]  }
 0x270   :  { %v6387_v1 = vpop.f32.mrf.mxu1  ;;  %6695 = vmatprep.subr.bf16.mxu1 %v9311_v57  ;;  %v9366_v56 = vld [vmem:[#allocation5 + $0x1638] ss:$48 sps:$4 sm:$0xff]   ;;  %v9374_v32 = vld [vmem:[#allocation5 + $0x15dc] ss:$48 sps:$4 sm:$0xff]  }
 0x271   :  { %v10150_v6 = vadd.f32 %v6387_v1, %v6344_v0  ;;  %v9369_v57 = vld [vmem:[#allocation5 + $0x1c38] ss:$48 sps:$4 sm:$0xff]   ;;  %v9377_v60 = vld [vmem:[#allocation5 + $0x1bdc] ss:$48 sps:$4 sm:$0xff]  }
 0x272   :  { %6653 = vmatpush1.bf16.msra.mxu0 %v9306_v62  ;;  %v9372_v62 = vld [vmem:[#allocation5 + $0x15d8] ss:$48 sps:$4 sm:$0xff]   ;;  %v9380_v0 = vld [vmem:[#allocation5 + $0x157c] ss:$48 sps:$4 sm:$0xff]  }
 0x273   :  { %6696 = vmatpush1.bf16.msra.mxu1 %v9309_v63  ;;  %6654 = vmatprep.subr.bf16.mxu0 %v9314_v40  ;;  %v9375_v63 = vld [vmem:[#allocation5 + $0x1bd8] ss:$48 sps:$4 sm:$0xff]   ;;  %v9383_v1 = vld [vmem:[#allocation5 + $0x1b7c] ss:$48 sps:$4 sm:$0xff]  }
 0x274   :  { %6697 = vmatprep.subr.bf16.mxu1 %v9317_v5  ;;  %v9378_v40 = vld [vmem:[#allocation5 + $0x1578] ss:$48 sps:$4 sm:$0xff]  }
 0x275   :  { %v9381_v5 = vld [vmem:[#allocation5 + $0x1b78] ss:$48 sps:$4 sm:$0xff]  }
 0x276   :  { %6655 = vmatpush1.bf16.msra.mxu0 %v9312_v7  ;;  %v9386_v7 = vld [vmem:[#allocation5 + $0x151c] ss:$48 sps:$4 sm:$0xff]  }
 0x277   :  { %6698 = vmatpush1.bf16.msra.mxu1 %v9315_v44  ;;  %6656 = vmatprep.subr.bf16.mxu0 %v9320_v8  ;;  %v9389_v44 = vld [vmem:[#allocation5 + $0x1b1c] ss:$48 sps:$4 sm:$0xff]   ;;  %v9384_v8 = vld [vmem:[#allocation5 + $0x1518] ss:$48 sps:$4 sm:$0xff]  }
 0x278   :  { %6699 = vmatprep.subr.bf16.mxu1 %v9323_v9  ;;  %v9387_v9 = vld [vmem:[#allocation5 + $0x1b18] ss:$48 sps:$4 sm:$0xff]  }
 0x27a   :  { %6657 = vmatpush1.bf16.msra.mxu0 %v9318_v45  ;;  %v9392_v45 = vld [vmem:[#allocation5 + $0x2c4] ss:$48 sps:$4 sm:$0xff]  }
 0x27b   :  { %6700 = vmatpush1.bf16.msra.mxu1 %v9321_v11  ;;  %6658 = vmatprep.subr.bf16.mxu0 %v9326_v12  ;;  %v9395_v11 = vld [vmem:[#allocation5 + $0x8c4] ss:$48 sps:$4 sm:$0xff]   ;;  %v9390_v12 = vld [vmem:[#allocation5 + $0x2c0] ss:$48 sps:$4 sm:$0xff]  }
 0x27c   :  { %6701 = vmatprep.subr.bf16.mxu1 %v9329_v13  ;;  %v9393_v13 = vld [vmem:[#allocation5 + $0x8c0] ss:$48 sps:$4 sm:$0xff]  }
 0x27e   :  { %6659 = vmatpush1.bf16.msra.mxu0 %v9324_v15  ;;  %v9398_v15 = vld [vmem:[#allocation5 + $0x264] ss:$48 sps:$4 sm:$0xff]  }
 0x27f   :  { %6702 = vmatpush1.bf16.msra.mxu1 %v9327_v39  ;;  %6660 = vmatprep.subr.bf16.mxu0 %v9332_v17  ;;  %v9401_v39 = vld [vmem:[#allocation5 + $0x864] ss:$48 sps:$4 sm:$0xff]  }
 0x280   :  { %6703 = vmatprep.subr.bf16.mxu1 %v9335_v18 }
 0x282   :  { %6661 = vmatpush1.bf16.msra.mxu0 %v9330_v59  ;;  %v10152_v59 = vld [vmem:[#allocation2 + $0x18] ss:$40 sps:$4 sm:$0xff]  }
 0x283   :  { %6704 = vmatpush1.bf16.msra.mxu1 %v9333_v19  ;;  %6662 = vmatprep.subr.bf16.mxu0 %v9338_v21  ;;  %v9396_v21 = vld [vmem:[#allocation5 + $0x260] ss:$48 sps:$4 sm:$0xff]  }
 0x284   :  { %6705 = vmatprep.subr.bf16.mxu1 %v9341_v49  ;;  %v9399_v49 = vld [vmem:[#allocation5 + $0x860] ss:$48 sps:$4 sm:$0xff]  }
 0x286   :  { %6663 = vmatpush1.bf16.msra.mxu0 %v9336_v22 }
 0x287   :  { %6706 = vmatpush1.bf16.msra.mxu1 %v9339_v23  ;;  %6664 = vmatprep.subr.bf16.mxu0 %v9344_v24  ;;  %v9404_v24 = vld [vmem:[#allocation5 + $0x204] ss:$48 sps:$4 sm:$0xff]  }
 0x288   :  { %6707 = vmatprep.subr.bf16.mxu1 %v9347_v25  ;;  %v9407_v25 = vld [vmem:[#allocation5 + $0x804] ss:$48 sps:$4 sm:$0xff]  }
 0x28a   :  { %6665 = vmatpush2.bf16.msra.mxu0 %v9342_v28 }
 0x28b   :  { %6708 = vmatpush2.bf16.msra.mxu1 %v9345_v29  ;;  %6666 = vmatprep.subr.bf16.mxu0 %v9350_v48  ;;  %v10160_v48 = vld [vmem:[#allocation2 + $0x4] ss:$40 sps:$4 sm:$0xff]  }
 0x28c   :  { %6709 = vmatprep.subr.bf16.mxu1 %v9353_v31 }
 0x28e   :  { %6667 = vmatpush2.bf16.msra.mxu0 %v9348_v55 }
 0x28f   :  { %6710 = vmatpush2.bf16.msra.mxu1 %v9351_v33  ;;  %6668 = vmatprep.subr.bf16.mxu0 %v9356_v35  ;;  %v9402_v33 = vld [vmem:[#allocation5 + $0x200] ss:$48 sps:$4 sm:$0xff]  }
 0x290   :  { %6711 = vmatprep.subr.bf16.mxu1 %v9359_v36  ;;  %v9405_v35 = vld [vmem:[#allocation5 + $0x800] ss:$48 sps:$4 sm:$0xff]  }
 0x292   :  { %6669 = vmatpush2.bf16.msra.mxu0 %v9354_v10  ;;  %v9413_v10 = vld [vmem:[#allocation5 + $0x7a4] ss:$48 sps:$4 sm:$0xff]  }
 0x293   :  { %6712 = vmatpush2.bf16.msra.mxu1 %v9357_v38  ;;  %6670 = vmatprep.subr.bf16.mxu0 %v9362_v43 }
 0x294   :  { %6713 = vmatprep.subr.bf16.mxu1 %v9365_v46 }
 0x296   :  { %6671 = vmatpush2.bf16.msra.mxu0 %v9360_v50  ;;  %v9408_v50 = vld [vmem:[#allocation5 + $0x1a0] ss:$48 sps:$4 sm:$0xff]  }
 0x297   :  { %6714 = vmatpush2.bf16.msra.mxu1 %v9363_v51  ;;  %6672 = vmatprep.subr.bf16.mxu0 %v9368_v52  ;;  %v9416_v51 = vld [vmem:[#allocation5 + $0x144] ss:$48 sps:$4 sm:$0xff]  }
 0x298   :  { %6715 = vmatprep.subr.bf16.mxu1 %v9371_v53  ;;  %v9419_v52 = vld [vmem:[#allocation5 + $0x744] ss:$48 sps:$4 sm:$0xff]   ;;  %v9414_v53 = vld [vmem:[#allocation5 + $0x140] ss:$48 sps:$4 sm:$0xff]  }
 0x29a   :  { %6673 = vmatpush2.bf16.msra.mxu0 %v9366_v56  ;;  %v9417_v56 = vld [vmem:[#allocation5 + $0x740] ss:$48 sps:$4 sm:$0xff]  }
 0x29b   :  { %6716 = vmatpush2.bf16.msra.mxu1 %v9369_v57  ;;  %6674 = vmatprep.subr.bf16.mxu0 %v9374_v32  ;;  %v9422_v57 = vld [vmem:[#allocation5 + $0xe4] ss:$48 sps:$4 sm:$0xff]  }
 0x29c   :  { %6717 = vmatprep.subr.bf16.mxu1 %v9377_v60  ;;  %v9425_v32 = vld [vmem:[#allocation5 + $0x6e4] ss:$48 sps:$4 sm:$0xff]   ;;  %v9423_v60 = vld [vmem:[#allocation5 + $0x6e0] ss:$48 sps:$4 sm:$0xff]  }
 0x29e   :  { %6675 = vmatpush2.bf16.msra.mxu0 %v9372_v62  ;;  %v9428_v62 = vld [vmem:[#allocation5 + $0x84] ss:$48 sps:$4 sm:$0xff]  }
 0x29f   :  { %6718 = vmatpush2.bf16.msra.mxu1 %v9375_v63  ;;  %6676 = vmatprep.subr.bf16.mxu0 %v9380_v0  ;;  %v9431_v63 = vld [vmem:[#allocation5 + $0x684] ss:$48 sps:$4 sm:$0xff]   ;;  %v9426_v0 = vld [vmem:[#allocation5 + $0x80] ss:$48 sps:$4 sm:$0xff]  }
 0x2a0   :  { %6719 = vmatprep.subr.bf16.mxu1 %v9383_v1  ;;  %v9429_v1 = vld [vmem:[#allocation5 + $0x680] ss:$48 sps:$4 sm:$0xff]  }
 0x2a2   :  { %6677 = vmatpush2.bf16.msra.mxu0 %v9378_v40  ;;  %v9434_v40 = vld [vmem:[#allocation5 + $0x24] ss:$48 sps:$4 sm:$0xff]  }
 0x2a3   :  { %6720 = vmatpush2.bf16.msra.mxu1 %v9381_v5  ;;  %6678 = vmatprep.subr.bf16.mxu0 %v9386_v7  ;;  %v9437_v5 = vld [vmem:[#allocation5 + $0x624] ss:$48 sps:$4 sm:$0xff]   ;;  %v9432_v7 = vld [vmem:[#allocation5 + $0x20] ss:$48 sps:$4 sm:$0xff]  }
 0x2a4   :  { %6721 = vmatprep.subr.bf16.mxu1 %v9389_v44  ;;  %v9435_v44 = vld [vmem:[#allocation5 + $0x620] ss:$48 sps:$4 sm:$0xff]  }
 0x2a6   :  { %6679 = vmatpush2.bf16.msra.mxu0 %v9384_v8  ;;  %v9440_v8 = vld [vmem:[#allocation5 + $0x5c4] ss:$48 sps:$4 sm:$0xff]  }
 0x2a7   :  { %6722 = vmatpush2.bf16.msra.mxu1 %v9387_v9  ;;  %6734 = vmatprep.subr.bf16.mxu0 %v9392_v45  ;;  %v9443_v9 = vld [vmem:[#allocation5 + $0xbc4] ss:$48 sps:$4 sm:$0xff]   ;;  %v9438_v45 = vld [vmem:[#allocation5 + $0x5c0] ss:$48 sps:$4 sm:$0xff]  }
 0x2a8   :  { %6777 = vmatprep.subr.bf16.mxu1 %v9395_v11  ;;  %v9441_v11 = vld [vmem:[#allocation5 + $0xbc0] ss:$48 sps:$4 sm:$0xff]  }
 0x2a9   :  { %v6424_v17 = vpop.f32.mrf.mxu0  ;;  %6681 = vmatmul.mubr.bf16.vlgmr.msra.gmra.mxu0 %v10152_v59 }
 0x2aa   :  { %v6467_v18 = vpop.f32.mrf.mxu1  ;;  %6724 = vmatmul.mubr.bf16.vlgmr.msra.gmra.mxu1 %v10110_v26  ;;  %v6425_v19 = vadd.f32 %v6424_v17, %v10140_v20  ;;  %6735 = vmatpush1.bf16.msra.mxu0 %v9390_v12  ;;  %v9446_v12 = vld [vmem:[#allocation5 + $0x564] ss:$48 sps:$4 sm:$0xff]  }
 0x2ab   :  { %6778 = vmatpush1.bf16.msra.mxu1 %v9393_v13  ;;  %v6426_v22 = vpop.f32.mrf.mxu0  ;;  %6736 = vmatprep.subr.bf16.mxu0 %v9398_v15  ;;  %v9449_v13 = vld [vmem:[#allocation5 + $0xb64] ss:$48 sps:$4 sm:$0xff]   ;;  %v9444_v15 = vld [vmem:[#allocation5 + $0x560] ss:$48 sps:$4 sm:$0xff]  }
 0x2ac   :  { %v6469_v23 = vpop.f32.mrf.mxu1  ;;  %6779 = vmatprep.subr.bf16.mxu1 %v9401_v39  ;;  %v10157_v28 = vadd.f32 %v6467_v18, %v6425_v19  ;;  %v6427_v29 = vadd.f32 %v6426_v22, %v10142_v16  ;;  %6766 = vmatprep.mubr.bf16.mxu0 %v10160_v48  ;;  %v9410_v16 = vld [vmem:[#allocation5 + $0x1a4] ss:$48 sps:$4 sm:$0xff]   ;;  %v9447_v39 = vld [vmem:[#allocation5 + $0xb60] ss:$48 sps:$4 sm:$0xff]  }
 0x2ad   :  { %6809 = vmatprep.mubr.bf16.mxu1 %v10115_v54  ;;  %v6428_v26 = vpop.f32.mrf.mxu0  ;;  %v9452_v17 = vld [vmem:[#allocation5 + $0x504] ss:$48 sps:$4 sm:$0xff]   ;;  %v9450_v19 = vld [vmem:[#allocation5 + $0x500] ss:$48 sps:$4 sm:$0xff]  }
 0x2ae   :  { %v6471_v20 = vpop.f32.mrf.mxu1  ;;  %v10164_v31 = vadd.f32 %v6469_v23, %v6427_v29  ;;  %v6429_v55 = vadd.f32 %v6428_v26, %v10148_v61  ;;  %6737 = vmatpush1.bf16.msra.mxu0 %v9396_v21  ;;  %v9411_v61 = vld [vmem:[#allocation5 + $0x7a0] ss:$48 sps:$4 sm:$0xff]   ;;  %v9455_v18 = vld [vmem:[#allocation5 + $0xb04] ss:$48 sps:$4 sm:$0xff]  }
 0x2af   :  { %6780 = vmatpush1.bf16.msra.mxu1 %v9399_v49  ;;  %v6430_v36 = vpop.f32.mrf.mxu0  ;;  %6738 = vmatprep.subr.bf16.mxu0 %v9404_v24  ;;  %v9453_v21 = vld [vmem:[#allocation5 + $0xb00] ss:$48 sps:$4 sm:$0xff]   ;;  %v9458_v49 = vld [vmem:[#allocation5 + $0x4a4] ss:$48 sps:$4 sm:$0xff]  }
 0x2b0   :  { %6781 = vmatprep.subr.bf16.mxu1 %v9407_v25  ;;  %v10167_v38 = vadd.f32 %v6471_v20, %v6429_v55  ;;  %v6431_v43 = vadd.f32 %v6430_v36, %v10150_v6  ;;  %v6473_v54 = vpop.f32.mrf.mxu1  ;;  %v9420_v6 = vld [vmem:[#allocation5 + $0xe0] ss:$48 sps:$4 sm:$0xff]   ;;  %v9461_v22 = vld [vmem:[#allocation5 + $0xaa4] ss:$48 sps:$4 sm:$0xff]  }
 0x2b1   :  { %v9456_v23 = vld [vmem:[#allocation5 + $0x4a0] ss:$48 sps:$4 sm:$0xff]   ;;  %v9464_v25 = vld [vmem:[#allocation5 + $0x444] ss:$48 sps:$4 sm:$0xff]  }
 0x2b2   :  { %v10170_v46 = vadd.f32 %v6473_v54, %v6431_v43  ;;  %6739 = vmatpush1.bf16.msra.mxu0 %v9402_v33  ;;  %v9459_v24 = vld [vmem:[#allocation5 + $0xaa0] ss:$48 sps:$4 sm:$0xff]   ;;  %v9467_v29 = vld [vmem:[#allocation5 + $0xa44] ss:$48 sps:$4 sm:$0xff]  }
 0x2b3   :  { %6782 = vmatpush1.bf16.msra.mxu1 %v9405_v35  ;;  %6740 = vmatprep.subr.bf16.mxu0 %v9410_v16  ;;  %v9462_v26 = vld [vmem:[#allocation5 + $0x440] ss:$48 sps:$4 sm:$0xff]   ;;  %v9470_v55 = vld [vmem:[#allocation5 + $0x3e4] ss:$48 sps:$4 sm:$0xff]  }
 0x2b4   :  { %6783 = vmatprep.subr.bf16.mxu1 %v9413_v10  ;;  %v9465_v20 = vld [vmem:[#allocation5 + $0xa40] ss:$48 sps:$4 sm:$0xff]   ;;  %v9473_v33 = vld [vmem:[#allocation5 + $0x9e4] ss:$48 sps:$4 sm:$0xff]  }
 0x2b5   :  { %v9468_v35 = vld [vmem:[#allocation5 + $0x3e0] ss:$48 sps:$4 sm:$0xff]   ;;  %v9476_v16 = vld [vmem:[#allocation5 + $0x384] ss:$48 sps:$4 sm:$0xff]  }
 0x2b6   :  { %6741 = vmatpush1.bf16.msra.mxu0 %v9408_v50  ;;  %v9471_v36 = vld [vmem:[#allocation5 + $0x9e0] ss:$48 sps:$4 sm:$0xff]   ;;  %v9479_v10 = vld [vmem:[#allocation5 + $0x984] ss:$48 sps:$4 sm:$0xff]  }
 0x2b7   :  { %6784 = vmatpush1.bf16.msra.mxu1 %v9411_v61  ;;  %6742 = vmatprep.subr.bf16.mxu0 %v9416_v51  ;;  %v9474_v43 = vld [vmem:[#allocation5 + $0x380] ss:$48 sps:$4 sm:$0xff]   ;;  %v9482_v50 = vld [vmem:[#allocation5 + $0x324] ss:$48 sps:$4 sm:$0xff]  }
 0x2b8   :  { %6785 = vmatprep.subr.bf16.mxu1 %v9419_v52  ;;  %v9477_v54 = vld [vmem:[#allocation5 + $0x980] ss:$48 sps:$4 sm:$0xff]   ;;  %v9485_v61 = vld [vmem:[#allocation5 + $0x924] ss:$48 sps:$4 sm:$0xff]  }
 0x2b9   :  { %v9480_v51 = vld [vmem:[#allocation5 + $0x320] ss:$48 sps:$4 sm:$0xff]  }
 0x2ba   :  { %6743 = vmatpush1.bf16.msra.mxu0 %v9414_v53  ;;  %v9483_v52 = vld [vmem:[#allocation5 + $0x920] ss:$48 sps:$4 sm:$0xff]   ;;  %v9488_v53 = vld [vmem:[#allocation5 + $0xec4] ss:$48 sps:$4 sm:$0xff]  }
 0x2bb   :  { %6786 = vmatpush1.bf16.msra.mxu1 %v9417_v56  ;;  %6744 = vmatprep.subr.bf16.mxu0 %v9422_v57  ;;  %v9491_v56 = vld [vmem:[#allocation5 + $0x14c4] ss:$48 sps:$4 sm:$0xff]   ;;  %v7171_v57 = vand.u32 7, %v10075_v14 }
 0x2bc   :  { %6787 = vmatprep.subr.bf16.mxu1 %v9425_v32  ;;  %v10174_v32 = vadd.s32 8, %v10075_v14 }
 0x2bd   :  { %vm10178_vm1 = vcmp.eq.s32.totalorder %v7171_v57, 0  ;;  %vm10282_vm3 = vcmp.eq.s32.totalorder %v7171_v57, 7 }
 0x2be   :  { %6745 = vmatpush1.bf16.msra.mxu0 %v9420_v6  ;;  %v9486_v6 = vld [vmem:[#allocation5 + $0xec0] ss:$48 sps:$4 sm:$0xff]  }
 0x2bf   :  { %6788 = vmatpush1.bf16.msra.mxu1 %v9423_v60  ;;  %6746 = vmatprep.subr.bf16.mxu0 %v9428_v62  ;;  %v9489_v60 = vld [vmem:[#allocation5 + $0x14c0] ss:$48 sps:$4 sm:$0xff]   ;;  %v9494_v62 = vld [vmem:[#allocation5 + $0xe64] ss:$48 sps:$4 sm:$0xff]  }
 0x2c0   :  { %6789 = vmatprep.subr.bf16.mxu1 %v9431_v63  ;;  %v9497_v63 = vld [vmem:[#allocation5 + $0x1464] ss:$48 sps:$4 sm:$0xff]  }
 0x2c2   :  { %6747 = vmatpush1.bf16.msra.mxu0 %v9426_v0 }
 0x2c3   :  { %6790 = vmatpush1.bf16.msra.mxu1 %v9429_v1  ;;  %6748 = vmatprep.subr.bf16.mxu0 %v9434_v40  ;;  %v10396_v1 = vand.u32 7, %v10174_v32 }
 0x2c4   :  { %6791 = vmatprep.subr.bf16.mxu1 %v9437_v5  ;;  %v10183_v5 = vld [vmem:[#allocation2] ss:$40 sps:$4 sm:$0xff]  }
 0x2c5   :  { %vm10196_vm2 = vcmp.eq.s32.totalorder %v10396_v1, 0 }
 0x2c6   :  { %6749 = vmatpush1.bf16.msra.mxu0 %v9432_v7 }
 0x2c7   :  { %6792 = vmatpush1.bf16.msra.mxu1 %v9435_v44  ;;  %6750 = vmatprep.subr.bf16.mxu0 %v9440_v8  ;;  %v9492_v44 = vld [vmem:[#allocation5 + $0xe60] ss:$48 sps:$4 sm:$0xff]  }
 0x2c8   :  { %6793 = vmatprep.subr.bf16.mxu1 %v9443_v9  ;;  %v9495_v8 = vld [vmem:[#allocation5 + $0x1460] ss:$48 sps:$4 sm:$0xff]   ;;  %v7214_v9 = vsel %vm10178_vm1, 0.0, %v10082_v34  ;;  %v7215_v34 = vsel %vm10178_vm1, 0.0, %v10090_v2 }
 0x2ca   :  { %6751 = vmatpush2.bf16.msra.mxu0 %v9438_v45 }
 0x2cb   :  { %6794 = vmatpush2.bf16.msra.mxu1 %v9441_v11  ;;  %6752 = vmatprep.subr.bf16.mxu0 %v9446_v12  ;;  %v9500_v11 = vld [vmem:[#allocation5 + $0xe04] ss:$48 sps:$4 sm:$0xff]  }
 0x2cc   :  { %6795 = vmatprep.subr.bf16.mxu1 %v9449_v13  ;;  %v9503_v12 = vld [vmem:[#allocation5 + $0x1404] ss:$48 sps:$4 sm:$0xff]  }
 0x2ce   :  { %6753 = vmatpush2.bf16.msra.mxu0 %v9444_v15 }
 0x2cf   :  { %6796 = vmatpush2.bf16.msra.mxu1 %v9447_v39  ;;  %6754 = vmatprep.subr.bf16.mxu0 %v9452_v17 }
 0x2d0   :  { %6797 = vmatprep.subr.bf16.mxu1 %v9455_v18  ;;  %v9498_v18 = vld [vmem:[#allocation5 + $0xe00] ss:$48 sps:$4 sm:$0xff]  }
 0x2d2   :  { %6755 = vmatpush2.bf16.msra.mxu0 %v9450_v19  ;;  %v9501_v19 = vld [vmem:[#allocation5 + $0x1400] ss:$48 sps:$4 sm:$0xff]  }
 0x2d3   :  { %6798 = vmatpush2.bf16.msra.mxu1 %v9453_v21  ;;  %6756 = vmatprep.subr.bf16.mxu0 %v9458_v49  ;;  %v7218_v21 = vsel %vm10196_vm2, 0.0, %v10086_v27  ;;  %v9512_v27 = vld [vmem:[#allocation5 + $0xd44] ss:$48 sps:$4 sm:$0xff]  }
 0x2d4   :  { %6799 = vmatprep.subr.bf16.mxu1 %v9461_v22  ;;  %v9509_v22 = vld [vmem:[#allocation5 + $0x13a4] ss:$48 sps:$4 sm:$0xff]  }
 0x2d6   :  { %6757 = vmatpush2.bf16.msra.mxu0 %v9456_v23 }
 0x2d7   :  { %6800 = vmatpush2.bf16.msra.mxu1 %v9459_v24  ;;  %6758 = vmatprep.subr.bf16.mxu0 %v9464_v25  ;;  %v9504_v25 = vld [vmem:[#allocation5 + $0xda0] ss:$48 sps:$4 sm:$0xff]  }
 0x2d8   :  { %6801 = vmatprep.subr.bf16.mxu1 %v9467_v29  ;;  %v9507_v29 = vld [vmem:[#allocation5 + $0x13a0] ss:$48 sps:$4 sm:$0xff]  }
 0x2da   :  { %6759 = vmatpush2.bf16.msra.mxu0 %v9462_v26  ;;  %v9515_v26 = vld [vmem:[#allocation5 + $0x1344] ss:$48 sps:$4 sm:$0xff]  }
 0x2db   :  { %6802 = vmatpush2.bf16.msra.mxu1 %v9465_v20  ;;  %6760 = vmatprep.subr.bf16.mxu0 %v9470_v55  ;;  %v9510_v20 = vld [vmem:[#allocation5 + $0xd40] ss:$48 sps:$4 sm:$0xff]  }
 0x2dc   :  { %6803 = vmatprep.subr.bf16.mxu1 %v9473_v33  ;;  %v9513_v55 = vld [vmem:[#allocation5 + $0x1340] ss:$48 sps:$4 sm:$0xff]   ;;  %v9521_v33 = vld [vmem:[#allocation5 + $0x12e4] ss:$48 sps:$4 sm:$0xff]  }
 0x2de   :  { %6761 = vmatpush2.bf16.msra.mxu0 %v9468_v35  ;;  %v9519_v35 = vld [vmem:[#allocation5 + $0x12e0] ss:$48 sps:$4 sm:$0xff]  }
 0x2df   :  { %6804 = vmatpush2.bf16.msra.mxu1 %v9471_v36  ;;  %6762 = vmatprep.subr.bf16.mxu0 %v9476_v16  ;;  %v9524_v36 = vld [vmem:[#allocation5 + $0xc84] ss:$48 sps:$4 sm:$0xff]  }
 0x2e0   :  { %6805 = vmatprep.subr.bf16.mxu1 %v9479_v10  ;;  %v9527_v16 = vld [vmem:[#allocation5 + $0x1284] ss:$48 sps:$4 sm:$0xff]   ;;  %v9522_v10 = vld [vmem:[#allocation5 + $0xc80] ss:$48 sps:$4 sm:$0xff]  }
 0x2e2   :  { %6763 = vmatpush2.bf16.msra.mxu0 %v9474_v43  ;;  %v9525_v43 = vld [vmem:[#allocation5 + $0x1280] ss:$48 sps:$4 sm:$0xff]  }
 0x2e3   :  { %6806 = vmatpush2.bf16.msra.mxu1 %v9477_v54  ;;  %6764 = vmatprep.subr.bf16.mxu0 %v9482_v50  ;;  %v9530_v54 = vld [vmem:[#allocation5 + $0xc24] ss:$48 sps:$4 sm:$0xff]  }
 0x2e4   :  { %6807 = vmatprep.subr.bf16.mxu1 %v9485_v61  ;;  %v9533_v50 = vld [vmem:[#allocation5 + $0x1224] ss:$48 sps:$4 sm:$0xff]   ;;  %v9528_v61 = vld [vmem:[#allocation5 + $0xc20] ss:$48 sps:$4 sm:$0xff]  }
 0x2e6   :  { %6765 = vmatpush2.bf16.msra.mxu0 %v9480_v51  ;;  %v9531_v51 = vld [vmem:[#allocation5 + $0x1220] ss:$48 sps:$4 sm:$0xff]  }
 0x2e7   :  { %6808 = vmatpush2.bf16.msra.mxu1 %v9483_v52  ;;  %6820 = vmatprep.subr.bf16.mxu0 %v9488_v53  ;;  %v9536_v52 = vld [vmem:[#allocation5 + $0x11c4] ss:$48 sps:$4 sm:$0xff]  }
 0x2e8   :  { %6863 = vmatprep.subr.bf16.mxu1 %v9491_v56  ;;  %v9539_v53 = vld [vmem:[#allocation5 + $0x17c4] ss:$48 sps:$4 sm:$0xff]   ;;  %v9534_v56 = vld [vmem:[#allocation5 + $0x11c0] ss:$48 sps:$4 sm:$0xff]  }
 0x2e9   :  { %v6510_v40 = vpop.f32.mrf.mxu0  ;;  %6767 = vmatmul.mubr.bf16.vlgmr.msra.gmra.mxu0 %v10183_v5 }
 0x2ea   :  { %6810 = vmatmul.mubr.bf16.vlgmr.msra.gmra.mxu1 %v10136_v47  ;;  %v6511_v7 = vadd.f32 %v6510_v40, %v10157_v28  ;;  %6821 = vmatpush1.bf16.msra.mxu0 %v9486_v6  ;;  %v10200_v28 = vld [vmem:[#allocation2 + $0x14] ss:$40 sps:$4 sm:$0xff]   ;;  %v9537_v6 = vld [vmem:[#allocation5 + $0x17c0] ss:$48 sps:$4 sm:$0xff]  }
 0x2eb   :  { %6864 = vmatpush1.bf16.msra.mxu1 %v9489_v60  ;;  %v6512_v45 = vpop.f32.mrf.mxu0  ;;  %6822 = vmatprep.subr.bf16.mxu0 %v9494_v62  ;;  %v9542_v60 = vld [vmem:[#allocation5 + $0x1164] ss:$48 sps:$4 sm:$0xff]   ;;  %v9543_v40 = vld [vmem:[#allocation5 + $0x1760] ss:$48 sps:$4 sm:$0xff]  }
 0x2ec   :  { %6865 = vmatprep.subr.bf16.mxu1 %v9497_v63  ;;  %v10191_v13 = vadd.f32 %v7214_v9, %v6511_v7  ;;  %v6513_v15 = vadd.f32 %v6512_v45, %v10164_v31  ;;  %6852 = vmatprep.mubr.bf16.mxu0 %v10200_v28  ;;  %v9545_v62 = vld [vmem:[#allocation5 + $0x1764] ss:$48 sps:$4 sm:$0xff]   ;;  %v9540_v63 = vld [vmem:[#allocation5 + $0x1160] ss:$48 sps:$4 sm:$0xff]  }
 0x2ed   :  { %6895 = vmatprep.mubr.bf16.mxu1 %v10144_v30  ;;  %v6514_v39 = vpop.f32.mrf.mxu0  ;;  %v9506_v30 = vld [vmem:[#allocation5 + $0xda4] ss:$48 sps:$4 sm:$0xff]   ;;  %v9549_v9 = vld [vmem:[#allocation5 + $0x1700] ss:$48 sps:$4 sm:$0xff]  }
 0x2ee   :  { %v10207_v17 = vadd.f32 %v7215_v34, %v6513_v15  ;;  %v6515_v31 = vadd.f32 %v6514_v39, %v10167_v38  ;;  %6823 = vmatpush1.bf16.msra.mxu0 %v9492_v44  ;;  %v7219_v38 = vsel %vm10196_vm2, 0.0, %v10094_v4  ;;  %v9516_v4 = vld [vmem:[#allocation5 + $0xce0] ss:$48 sps:$4 sm:$0xff]   ;;  %v9548_v7 = vld [vmem:[#allocation5 + $0x1104] ss:$48 sps:$4 sm:$0xff]  }
 0x2ef   :  { %6866 = vmatpush1.bf16.msra.mxu1 %v9495_v8  ;;  %v6516_v49 = vpop.f32.mrf.mxu0  ;;  %6824 = vmatprep.subr.bf16.mxu0 %v9500_v11  ;;  %v9551_v44 = vld [vmem:[#allocation5 + $0x1704] ss:$48 sps:$4 sm:$0xff]   ;;  %v9546_v8 = vld [vmem:[#allocation5 + $0x1100] ss:$48 sps:$4 sm:$0xff]  }
 0x2f0   :  { %6867 = vmatprep.subr.bf16.mxu1 %v9503_v12  ;;  %v10213_v23 = vadd.f32 %v7218_v21, %v6515_v31  ;;  %v6517_v2 = vadd.f32 %v6516_v49, %v10170_v46  ;;  %v9518_v46 = vld [vmem:[#allocation5 + $0xce4] ss:$48 sps:$4 sm:$0xff]   ;;  %v9552_v12 = vld [vmem:[#allocation5 + $0x10a0] ss:$48 sps:$4 sm:$0xff]  }
 0x2f1   :  { %v9554_v45 = vld [vmem:[#allocation5 + $0x10a4] ss:$48 sps:$4 sm:$0xff]   ;;  %v9555_v15 = vld [vmem:[#allocation5 + $0x16a0] ss:$48 sps:$4 sm:$0xff]  }
 0x2f2   :  { %v10219_v24 = vadd.f32 %v7219_v38, %v6517_v2  ;;  %6825 = vmatpush1.bf16.msra.mxu0 %v9498_v18  ;;  %v9557_v11 = vld [vmem:[#allocation5 + $0x16a4] ss:$48 sps:$4 sm:$0xff]   ;;  %v9558_v31 = vld [vmem:[#allocation5 + $0x1040] ss:$48 sps:$4 sm:$0xff]  }
 0x2f3   :  { %6868 = vmatpush1.bf16.msra.mxu1 %v9501_v19  ;;  %6826 = vmatprep.subr.bf16.mxu0 %v9506_v30  ;;  %v9560_v34 = vld [vmem:[#allocation5 + $0x1044] ss:$48 sps:$4 sm:$0xff]   ;;  %v9561_v18 = vld [vmem:[#allocation5 + $0x1640] ss:$48 sps:$4 sm:$0xff]  }
 0x2f4   :  { %6869 = vmatprep.subr.bf16.mxu1 %v9509_v22  ;;  %v9563_v39 = vld [vmem:[#allocation5 + $0x1644] ss:$48 sps:$4 sm:$0xff]   ;;  %v9564_v49 = vld [vmem:[#allocation5 + $0xfe0] ss:$48 sps:$4 sm:$0xff]  }
 0x2f5   :  { %v9566_v19 = vld [vmem:[#allocation5 + $0xfe4] ss:$48 sps:$4 sm:$0xff]   ;;  %v9567_v30 = vld [vmem:[#allocation5 + $0x15e0] ss:$48 sps:$4 sm:$0xff]  }
 0x2f6   :  { %6827 = vmatpush1.bf16.msra.mxu0 %v9504_v25  ;;  %v9569_v21 = vld [vmem:[#allocation5 + $0x15e4] ss:$48 sps:$4 sm:$0xff]   ;;  %v9570_v38 = vld [vmem:[#allocation5 + $0xf80] ss:$48 sps:$4 sm:$0xff]  }
 0x2f7   :  { %6870 = vmatpush1.bf16.msra.mxu1 %v9507_v29  ;;  %6828 = vmatprep.subr.bf16.mxu0 %v9512_v27  ;;  %v9572_v22 = vld [vmem:[#allocation5 + $0xf84] ss:$48 sps:$4 sm:$0xff]   ;;  %v9573_v25 = vld [vmem:[#allocation5 + $0x1580] ss:$48 sps:$4 sm:$0xff]  }
 0x2f8   :  { %6871 = vmatprep.subr.bf16.mxu1 %v9515_v26  ;;  %v9575_v2 = vld [vmem:[#allocation5 + $0x1584] ss:$48 sps:$4 sm:$0xff]   ;;  %v9576_v26 = vld [vmem:[#allocation5 + $0xf20] ss:$48 sps:$4 sm:$0xff]  }
 0x2f9   :  { %v9578_v29 = vld [vmem:[#allocation5 + $0xf24] ss:$48 sps:$4 sm:$0xff]  }
 0x2fa   :  { %6829 = vmatpush1.bf16.msra.mxu0 %v9510_v20  ;;  %v9581_v27 = vld [vmem:[#allocation5 + $0x1524] ss:$48 sps:$4 sm:$0xff]   ;;  %v9579_v20 = vld [vmem:[#allocation5 + $0x1520] ss:$48 sps:$4 sm:$0xff]  }
 0x2fb   :  { %6872 = vmatpush1.bf16.msra.mxu1 %v9513_v55  ;;  %6830 = vmatprep.subr.bf16.mxu0 %v9518_v46  ;;  %v9584_v55 = vld [vmem:[#allocation5 + $0x1ac4] ss:$48 sps:$4 sm:$0xff]   ;;  %v9587_v46 = vld [vmem:[#allocation5 + $0x2cc] ss:$48 sps:$4 sm:$0xff]  }
 0x2fc   :  { %6873 = vmatprep.subr.bf16.mxu1 %v9521_v33  ;;  %v9582_v33 = vld [vmem:[#allocation5 + $0x1ac0] ss:$48 sps:$4 sm:$0xff]  }
 0x2fe   :  { %6831 = vmatpush1.bf16.msra.mxu0 %v9516_v4  ;;  %v9585_v4 = vld [vmem:[#allocation5 + $0x2c8] ss:$48 sps:$4 sm:$0xff]  }
 0x2ff   :  { %6874 = vmatpush1.bf16.msra.mxu1 %v9519_v35  ;;  %6832 = vmatprep.subr.bf16.mxu0 %v9524_v36  ;;  %v9590_v35 = vld [vmem:[#allocation5 + $0x1a64] ss:$48 sps:$4 sm:$0xff]   ;;  %v9593_v36 = vld [vmem:[#allocation5 + $0x26c] ss:$48 sps:$4 sm:$0xff]  }
 0x300   :  { %6875 = vmatprep.subr.bf16.mxu1 %v9527_v16  ;;  %v10221_v16 = vld [vmem:[#allocation2 + $0x10] ss:$40 sps:$4 sm:$0xff]  }
 0x302   :  { %6833 = vmatpush1.bf16.msra.mxu0 %v9522_v10  ;;  %v9588_v10 = vld [vmem:[#allocation5 + $0x1a60] ss:$48 sps:$4 sm:$0xff]  }
 0x303   :  { %6876 = vmatpush1.bf16.msra.mxu1 %v9525_v43  ;;  %6834 = vmatprep.subr.bf16.mxu0 %v9530_v54  ;;  %v9591_v43 = vld [vmem:[#allocation5 + $0x268] ss:$48 sps:$4 sm:$0xff]   ;;  %v9596_v54 = vld [vmem:[#allocation5 + $0x1a04] ss:$48 sps:$4 sm:$0xff]  }
 0x304   :  { %6877 = vmatprep.subr.bf16.mxu1 %v9533_v50  ;;  %v9599_v50 = vld [vmem:[#allocation5 + $0x20c] ss:$48 sps:$4 sm:$0xff]  }
 0x306   :  { %6835 = vmatpush1.bf16.msra.mxu0 %v9528_v61  ;;  %v10225_v61 = vld [vmem:[#allocation2 + $0x24] ss:$40 sps:$4 sm:$0xff]  }
 0x307   :  { %6878 = vmatpush1.bf16.msra.mxu1 %v9531_v51  ;;  %6836 = vmatprep.subr.bf16.mxu0 %v9536_v52  ;;  %v9594_v51 = vld [vmem:[#allocation5 + $0x1a00] ss:$48 sps:$4 sm:$0xff]   ;;  %v9597_v52 = vld [vmem:[#allocation5 + $0x208] ss:$48 sps:$4 sm:$0xff]  }
 0x308   :  { %6879 = vmatprep.subr.bf16.mxu1 %v9539_v53  ;;  %v9605_v53 = vld [vmem:[#allocation5 + $0x1ac] ss:$48 sps:$4 sm:$0xff]  }
 0x30a   :  { %6837 = vmatpush2.bf16.msra.mxu0 %v9534_v56  ;;  %v9600_v56 = vld [vmem:[#allocation5 + $0x19a0] ss:$48 sps:$4 sm:$0xff]  }
 0x30b   :  { %6880 = vmatpush2.bf16.msra.mxu1 %v9537_v6  ;;  %6838 = vmatprep.subr.bf16.mxu0 %v9542_v60  ;;  %v9603_v6 = vld [vmem:[#allocation5 + $0x1a8] ss:$48 sps:$4 sm:$0xff]   ;;  %v9608_v60 = vld [vmem:[#allocation5 + $0x1944] ss:$48 sps:$4 sm:$0xff]  }
 0x30c   :  { %6881 = vmatprep.subr.bf16.mxu1 %v9545_v62  ;;  %v9611_v62 = vld [vmem:[#allocation5 + $0x14c] ss:$48 sps:$4 sm:$0xff]  }
 0x30e   :  { %6839 = vmatpush2.bf16.msra.mxu0 %v9540_v63  ;;  %v9606_v63 = vld [vmem:[#allocation5 + $0x1940] ss:$48 sps:$4 sm:$0xff]  }
 0x30f   :  { %6882 = vmatpush2.bf16.msra.mxu1 %v9543_v40  ;;  %6840 = vmatprep.subr.bf16.mxu0 %v9548_v7  ;;  %v9614_v40 = vld [vmem:[#allocation5 + $0x18e4] ss:$48 sps:$4 sm:$0xff]   ;;  %v9617_v7 = vld [vmem:[#allocation5 + $0xec] ss:$48 sps:$4 sm:$0xff]  }
 0x310   :  { %6883 = vmatprep.subr.bf16.mxu1 %v9551_v44  ;;  %v9612_v44 = vld [vmem:[#allocation5 + $0x18e0] ss:$48 sps:$4 sm:$0xff]  }
 0x312   :  { %6841 = vmatpush2.bf16.msra.mxu0 %v9546_v8  ;;  %v9615_v8 = vld [vmem:[#allocation5 + $0xe8] ss:$48 sps:$4 sm:$0xff]  }
 0x313   :  { %6884 = vmatpush2.bf16.msra.mxu1 %v9549_v9  ;;  %6842 = vmatprep.subr.bf16.mxu0 %v9554_v45  ;;  %v9620_v9 = vld [vmem:[#allocation5 + $0x1884] ss:$48 sps:$4 sm:$0xff]   ;;  %v9623_v45 = vld [vmem:[#allocation5 + $0x8c] ss:$48 sps:$4 sm:$0xff]  }
 0x314   :  { %6885 = vmatprep.subr.bf16.mxu1 %v9557_v11  ;;  %v9618_v11 = vld [vmem:[#allocation5 + $0x1880] ss:$48 sps:$4 sm:$0xff]  }
 0x316   :  { %6843 = vmatpush2.bf16.msra.mxu0 %v9552_v12  ;;  %v9621_v12 = vld [vmem:[#allocation5 + $0x88] ss:$48 sps:$4 sm:$0xff]  }
 0x317   :  { %6886 = vmatpush2.bf16.msra.mxu1 %v9555_v15  ;;  %6844 = vmatprep.subr.bf16.mxu0 %v9560_v34  ;;  %v9626_v15 = vld [vmem:[#allocation5 + $0x1824] ss:$48 sps:$4 sm:$0xff]   ;;  %v9629_v34 = vld [vmem:[#allocation5 + $0x2c] ss:$48 sps:$4 sm:$0xff]  }
 0x318   :  { %6887 = vmatprep.subr.bf16.mxu1 %v9563_v39  ;;  %v9624_v39 = vld [vmem:[#allocation5 + $0x1820] ss:$48 sps:$4 sm:$0xff]  }
 0x31a   :  { %6845 = vmatpush2.bf16.msra.mxu0 %v9558_v31  ;;  %v9627_v31 = vld [vmem:[#allocation5 + $0x28] ss:$48 sps:$4 sm:$0xff]  }
 0x31b   :  { %6888 = vmatpush2.bf16.msra.mxu1 %v9561_v18  ;;  %6846 = vmatprep.subr.bf16.mxu0 %v9566_v19  ;;  %v9632_v18 = vld [vmem:[#allocation5 + $0x1dc4] ss:$48 sps:$4 sm:$0xff]   ;;  %v9635_v19 = vld [vmem:[#allocation5 + $0x5cc] ss:$48 sps:$4 sm:$0xff]  }
 0x31c   :  { %6889 = vmatprep.subr.bf16.mxu1 %v9569_v21  ;;  %v9630_v21 = vld [vmem:[#allocation5 + $0x1dc0] ss:$48 sps:$4 sm:$0xff]  }
 0x31e   :  { %6847 = vmatpush2.bf16.msra.mxu0 %v9564_v49  ;;  %v9633_v49 = vld [vmem:[#allocation5 + $0x5c8] ss:$48 sps:$4 sm:$0xff]  }
 0x31f   :  { %6890 = vmatpush2.bf16.msra.mxu1 %v9567_v30  ;;  %6848 = vmatprep.subr.bf16.mxu0 %v9572_v22  ;;  %v9638_v30 = vld [vmem:[#allocation5 + $0x1d64] ss:$48 sps:$4 sm:$0xff]   ;;  %v9641_v22 = vld [vmem:[#allocation5 + $0x56c] ss:$48 sps:$4 sm:$0xff]  }
 0x320   :  { %6891 = vmatprep.subr.bf16.mxu1 %v9575_v2  ;;  %v9636_v2 = vld [vmem:[#allocation5 + $0x1d60] ss:$48 sps:$4 sm:$0xff]  }
 0x322   :  { %6849 = vmatpush2.bf16.msra.mxu0 %v9570_v38  ;;  %v9639_v38 = vld [vmem:[#allocation5 + $0x568] ss:$48 sps:$4 sm:$0xff]  }
 0x323   :  { %6892 = vmatpush2.bf16.msra.mxu1 %v9573_v25  ;;  %6850 = vmatprep.subr.bf16.mxu0 %v9578_v29  ;;  %v9644_v25 = vld [vmem:[#allocation5 + $0x1d04] ss:$48 sps:$4 sm:$0xff]   ;;  %v9647_v29 = vld [vmem:[#allocation5 + $0x50c] ss:$48 sps:$4 sm:$0xff]  }
 0x324   :  { %6893 = vmatprep.subr.bf16.mxu1 %v9581_v27  ;;  %v9642_v27 = vld [vmem:[#allocation5 + $0x1d00] ss:$48 sps:$4 sm:$0xff]  }
 0x326   :  { %6851 = vmatpush2.bf16.msra.mxu0 %v9576_v26  ;;  %v9645_v26 = vld [vmem:[#allocation5 + $0x508] ss:$48 sps:$4 sm:$0xff]  }
 0x327   :  { %6894 = vmatpush2.bf16.msra.mxu1 %v9579_v20  ;;  %6906 = vmatprep.subr.bf16.mxu0 %v9584_v55  ;;  %v9650_v20 = vld [vmem:[#allocation5 + $0x1ca4] ss:$48 sps:$4 sm:$0xff]   ;;  %v9653_v55 = vld [vmem:[#allocation5 + $0x4ac] ss:$48 sps:$4 sm:$0xff]  }
 0x328   :  { %6949 = vmatprep.subr.bf16.mxu1 %v9587_v46  ;;  %v9648_v46 = vld [vmem:[#allocation5 + $0x1ca0] ss:$48 sps:$4 sm:$0xff]  }
 0x329   :  { %6853 = vmatmul.mubr.bf16.vlgmr.msra.gmra.mxu0 %v10221_v16 }
 0x32a   :  { %6896 = vmatmul.mubr.bf16.vlgmr.msra.gmra.mxu1 %v10152_v59  ;;  %6907 = vmatpush1.bf16.msra.mxu0 %v9582_v33  ;;  %v9602_v59 = vld [vmem:[#allocation5 + $0x19a4] ss:$48 sps:$4 sm:$0xff]   ;;  %v9651_v33 = vld [vmem:[#allocation5 + $0x4a8] ss:$48 sps:$4 sm:$0xff]  }
 0x32b   :  { %6950 = vmatpush1.bf16.msra.mxu1 %v9585_v4  ;;  %6908 = vmatprep.subr.bf16.mxu0 %v9590_v35  ;;  %v9656_v4 = vld [vmem:[#allocation5 + $0x1c44] ss:$48 sps:$4 sm:$0xff]   ;;  %v9659_v35 = vld [vmem:[#allocation5 + $0x44c] ss:$48 sps:$4 sm:$0xff]  }
 0x32c   :  { %6951 = vmatprep.subr.bf16.mxu1 %v9593_v36  ;;  %6938 = vmatprep.mubr.bf16.mxu0 %v10225_v61  ;;  %v9654_v36 = vld [vmem:[#allocation5 + $0x1c40] ss:$48 sps:$4 sm:$0xff]  }
 0x32d   :  { %6981 = vmatprep.mubr.bf16.mxu1 %v10160_v48  ;;  %v9609_v48 = vld [vmem:[#allocation5 + $0x148] ss:$48 sps:$4 sm:$0xff]  }
 0x32e   :  { %6909 = vmatpush1.bf16.msra.mxu0 %v9588_v10  ;;  %v9657_v10 = vld [vmem:[#allocation5 + $0x448] ss:$48 sps:$4 sm:$0xff]  }
 0x32f   :  { %6952 = vmatpush1.bf16.msra.mxu1 %v9591_v43  ;;  %6910 = vmatprep.subr.bf16.mxu0 %v9596_v54  ;;  %v9662_v43 = vld [vmem:[#allocation5 + $0x1be4] ss:$48 sps:$4 sm:$0xff]   ;;  %v9665_v54 = vld [vmem:[#allocation5 + $0x3ec] ss:$48 sps:$4 sm:$0xff]  }
 0x330   :  { %6953 = vmatprep.subr.bf16.mxu1 %v9599_v50  ;;  %v9660_v50 = vld [vmem:[#allocation5 + $0x1be0] ss:$48 sps:$4 sm:$0xff]  }
 0x332   :  { %6911 = vmatpush1.bf16.msra.mxu0 %v9594_v51  ;;  %v9663_v51 = vld [vmem:[#allocation5 + $0x3e8] ss:$48 sps:$4 sm:$0xff]  }
 0x333   :  { %6954 = vmatpush1.bf16.msra.mxu1 %v9597_v52  ;;  %6912 = vmatprep.subr.bf16.mxu0 %v9602_v59  ;;  %v9668_v52 = vld [vmem:[#allocation5 + $0x1b84] ss:$48 sps:$4 sm:$0xff]   ;;  %v9671_v59 = vld [vmem:[#allocation5 + $0x38c] ss:$48 sps:$4 sm:$0xff]  }
 0x334   :  { %6955 = vmatprep.subr.bf16.mxu1 %v9605_v53  ;;  %v9666_v53 = vld [vmem:[#allocation5 + $0x1b80] ss:$48 sps:$4 sm:$0xff]  }
 0x336   :  { %6913 = vmatpush1.bf16.msra.mxu0 %v9600_v56  ;;  %v9669_v56 = vld [vmem:[#allocation5 + $0x388] ss:$48 sps:$4 sm:$0xff]  }
 0x337   :  { %6956 = vmatpush1.bf16.msra.mxu1 %v9603_v6  ;;  %6914 = vmatprep.subr.bf16.mxu0 %v9608_v60  ;;  %v9674_v6 = vld [vmem:[#allocation5 + $0x1b24] ss:$48 sps:$4 sm:$0xff]   ;;  %v9677_v60 = vld [vmem:[#allocation5 + $0x32c] ss:$48 sps:$4 sm:$0xff]  }
 0x338   :  { %6957 = vmatprep.subr.bf16.mxu1 %v9611_v62  ;;  %v9672_v62 = vld [vmem:[#allocation5 + $0x1b20] ss:$48 sps:$4 sm:$0xff]  }
 0x33a   :  { %6915 = vmatpush1.bf16.msra.mxu0 %v9606_v63  ;;  %v9675_v63 = vld [vmem:[#allocation5 + $0x328] ss:$48 sps:$4 sm:$0xff]  }
 0x33b   :  { %6958 = vmatpush1.bf16.msra.mxu1 %v9609_v48  ;;  %6916 = vmatprep.subr.bf16.mxu0 %v9614_v40  ;;  %v9680_v48 = vld [vmem:[#allocation5 + $0x8cc] ss:$48 sps:$4 sm:$0xff]  }
 0x33c   :  { %6959 = vmatprep.subr.bf16.mxu1 %v9617_v7  ;;  %v9683_v40 = vld [vmem:[#allocation5 + $0xecc] ss:$48 sps:$4 sm:$0xff]   ;;  %v9678_v7 = vld [vmem:[#allocation5 + $0x8c8] ss:$48 sps:$4 sm:$0xff]  }
 0x33e   :  { %6917 = vmatpush1.bf16.msra.mxu0 %v9612_v44  ;;  %v9681_v44 = vld [vmem:[#allocation5 + $0xec8] ss:$48 sps:$4 sm:$0xff]  }
 0x33f   :  { %6960 = vmatpush1.bf16.msra.mxu1 %v9615_v8  ;;  %6918 = vmatprep.subr.bf16.mxu0 %v9620_v9  ;;  %v9686_v8 = vld [vmem:[#allocation5 + $0x86c] ss:$48 sps:$4 sm:$0xff]  }
 0x340   :  { %6961 = vmatprep.subr.bf16.mxu1 %v9623_v45  ;;  %v9689_v9 = vld [vmem:[#allocation5 + $0xe6c] ss:$48 sps:$4 sm:$0xff]   ;;  %v10229_v45 = vld [vmem:[#allocation2 + $0x20] ss:$40 sps:$4 sm:$0xff]  }
 0x342   :  { %6919 = vmatpush1.bf16.msra.mxu0 %v9618_v11  ;;  %v9684_v11 = vld [vmem:[#allocation5 + $0x868] ss:$48 sps:$4 sm:$0xff]  }
 0x343   :  { %6962 = vmatpush1.bf16.msra.mxu1 %v9621_v12  ;;  %6920 = vmatprep.subr.bf16.mxu0 %v9626_v15  ;;  %v9687_v12 = vld [vmem:[#allocation5 + $0xe68] ss:$48 sps:$4 sm:$0xff]   ;;  %v9692_v15 = vld [vmem:[#allocation5 + $0x80c] ss:$48 sps:$4 sm:$0xff]  }
 0x344   :  { %6963 = vmatprep.subr.bf16.mxu1 %v9629_v34  ;;  %v9695_v34 = vld [vmem:[#allocation5 + $0xe0c] ss:$48 sps:$4 sm:$0xff]  }
 0x346   :  { %6921 = vmatpush1.bf16.msra.mxu0 %v9624_v39  ;;  %v9896_v39 = vld [vmem:[#allocation2 + $0xc] ss:$40 sps:$4 sm:$0xff]  }
 0x347   :  { %6964 = vmatpush1.bf16.msra.mxu1 %v9627_v31  ;;  %6922 = vmatprep.subr.bf16.mxu0 %v9632_v18  ;;  %v9690_v31 = vld [vmem:[#allocation5 + $0x808] ss:$48 sps:$4 sm:$0xff]  }
 0x348   :  { %6965 = vmatprep.subr.bf16.mxu1 %v9635_v19  ;;  %v9693_v18 = vld [vmem:[#allocation5 + $0xe08] ss:$48 sps:$4 sm:$0xff]   ;;  %v9698_v19 = vld [vmem:[#allocation5 + $0x7ac] ss:$48 sps:$4 sm:$0xff]  }
 0x34a   :  { %6923 = vmatpush2.bf16.msra.mxu0 %v9630_v21  ;;  %v9696_v21 = vld [vmem:[#allocation5 + $0x7a8] ss:$48 sps:$4 sm:$0xff]  }
 0x34b   :  { %6966 = vmatpush2.bf16.msra.mxu1 %v9633_v49  ;;  %6924 = vmatprep.subr.bf16.mxu0 %v9638_v30  ;;  %v9699_v49 = vld [vmem:[#allocation5 + $0xda8] ss:$48 sps:$4 sm:$0xff]   ;;  %v9704_v30 = vld [vmem:[#allocation5 + $0x74c] ss:$48 sps:$4 sm:$0xff]  }
 0x34c   :  { %6967 = vmatprep.subr.bf16.mxu1 %v9641_v22  ;;  %v9707_v22 = vld [vmem:[#allocation5 + $0xd4c] ss:$48 sps:$4 sm:$0xff]  }
 0x34e   :  { %6925 = vmatpush2.bf16.msra.mxu0 %v9636_v2  ;;  %v9702_v2 = vld [vmem:[#allocation5 + $0x748] ss:$48 sps:$4 sm:$0xff]  }
 0x34f   :  { %6968 = vmatpush2.bf16.msra.mxu1 %v9639_v38  ;;  %6926 = vmatprep.subr.bf16.mxu0 %v9644_v25  ;;  %v9710_v38 = vld [vmem:[#allocation5 + $0x6ec] ss:$48 sps:$4 sm:$0xff]  }
 0x350   :  { %6969 = vmatprep.subr.bf16.mxu1 %v9647_v29  ;;  %v9713_v25 = vld [vmem:[#allocation5 + $0xcec] ss:$48 sps:$4 sm:$0xff]   ;;  %v9708_v29 = vld [vmem:[#allocation5 + $0x6e8] ss:$48 sps:$4 sm:$0xff]  }
 0x352   :  { %6927 = vmatpush2.bf16.msra.mxu0 %v9642_v27  ;;  %v9711_v27 = vld [vmem:[#allocation5 + $0xce8] ss:$48 sps:$4 sm:$0xff]  }
 0x353   :  { %6970 = vmatpush2.bf16.msra.mxu1 %v9645_v26  ;;  %6928 = vmatprep.subr.bf16.mxu0 %v9650_v20  ;;  %v9716_v26 = vld [vmem:[#allocation5 + $0x68c] ss:$48 sps:$4 sm:$0xff]  }
 0x354   :  { %6971 = vmatprep.subr.bf16.mxu1 %v9653_v55  ;;  %v9719_v20 = vld [vmem:[#allocation5 + $0xc8c] ss:$48 sps:$4 sm:$0xff]   ;;  %v9714_v55 = vld [vmem:[#allocation5 + $0x688] ss:$48 sps:$4 sm:$0xff]  }
 0x356   :  { %6929 = vmatpush2.bf16.msra.mxu0 %v9648_v46  ;;  %v9717_v46 = vld [vmem:[#allocation5 + $0xc88] ss:$48 sps:$4 sm:$0xff]  }
 0x357   :  { %6972 = vmatpush2.bf16.msra.mxu1 %v9651_v33  ;;  %6930 = vmatprep.subr.bf16.mxu0 %v9656_v4  ;;  %v9722_v33 = vld [vmem:[#allocation5 + $0x62c] ss:$48 sps:$4 sm:$0xff]  }
 0x358   :  { %6973 = vmatprep.subr.bf16.mxu1 %v9659_v35  ;;  %v9725_v4 = vld [vmem:[#allocation5 + $0xc2c] ss:$48 sps:$4 sm:$0xff]   ;;  %v9720_v35 = vld [vmem:[#allocation5 + $0x628] ss:$48 sps:$4 sm:$0xff]  }
 0x35a   :  { %6931 = vmatpush2.bf16.msra.mxu0 %v9654_v36  ;;  %v9723_v36 = vld [vmem:[#allocation5 + $0xc28] ss:$48 sps:$4 sm:$0xff]  }
 0x35b   :  { %6974 = vmatpush2.bf16.msra.mxu1 %v9657_v10  ;;  %6932 = vmatprep.subr.bf16.mxu0 %v9662_v43  ;;  %v9728_v10 = vld [vmem:[#allocation5 + $0xbcc] ss:$48 sps:$4 sm:$0xff]  }
 0x35c   :  { %6975 = vmatprep.subr.bf16.mxu1 %v9665_v54  ;;  %v9731_v43 = vld [vmem:[#allocation5 + $0x11cc] ss:$48 sps:$4 sm:$0xff]   ;;  %v9726_v54 = vld [vmem:[#allocation5 + $0xbc8] ss:$48 sps:$4 sm:$0xff]  }
 0x35e   :  { %6933 = vmatpush2.bf16.msra.mxu0 %v9660_v50  ;;  %v9729_v50 = vld [vmem:[#allocation5 + $0x11c8] ss:$48 sps:$4 sm:$0xff]  }
 0x35f   :  { %6976 = vmatpush2.bf16.msra.mxu1 %v9663_v51  ;;  %6934 = vmatprep.subr.bf16.mxu0 %v9668_v52  ;;  %v9734_v51 = vld [vmem:[#allocation5 + $0xb6c] ss:$48 sps:$4 sm:$0xff]  }
 0x360   :  { %6977 = vmatprep.subr.bf16.mxu1 %v9671_v59  ;;  %v9737_v52 = vld [vmem:[#allocation5 + $0x116c] ss:$48 sps:$4 sm:$0xff]   ;;  %v9732_v59 = vld [vmem:[#allocation5 + $0xb68] ss:$48 sps:$4 sm:$0xff]  }
 0x362   :  { %6935 = vmatpush2.bf16.msra.mxu0 %v9666_v53  ;;  %v9735_v53 = vld [vmem:[#allocation5 + $0x1168] ss:$48 sps:$4 sm:$0xff]  }
 0x363   :  { %6978 = vmatpush2.bf16.msra.mxu1 %v9669_v56  ;;  %6936 = vmatprep.subr.bf16.mxu0 %v9674_v6  ;;  %v9740_v56 = vld [vmem:[#allocation5 + $0xb0c] ss:$48 sps:$4 sm:$0xff]  }
 0x364   :  { %6979 = vmatprep.subr.bf16.mxu1 %v9677_v60  ;;  %v9743_v6 = vld [vmem:[#allocation5 + $0x110c] ss:$48 sps:$4 sm:$0xff]   ;;  %v9738_v60 = vld [vmem:[#allocation5 + $0xb08] ss:$48 sps:$4 sm:$0xff]  }
 0x366   :  { %6937 = vmatpush2.bf16.msra.mxu0 %v9672_v62  ;;  %v9741_v62 = vld [vmem:[#allocation5 + $0x1108] ss:$48 sps:$4 sm:$0xff]  }
 0x367   :  { %6980 = vmatpush2.bf16.msra.mxu1 %v9675_v63  ;;  %6992 = vmatprep.subr.bf16.mxu0 %v9680_v48  ;;  %v9746_v63 = vld [vmem:[#allocation5 + $0xaac] ss:$48 sps:$4 sm:$0xff]  }
 0x368   :  { %7035 = vmatprep.subr.bf16.mxu1 %v9683_v40  ;;  %v9749_v48 = vld [vmem:[#allocation5 + $0x10ac] ss:$48 sps:$4 sm:$0xff]   ;;  %v9744_v40 = vld [vmem:[#allocation5 + $0xaa8] ss:$48 sps:$4 sm:$0xff]  }
 0x369   :  { %6939 = vmatmul.mubr.bf16.vlgmr.msra.gmra.mxu0 %v10229_v45 }
 0x36a   :  { %6982 = vmatmul.mubr.bf16.vlgmr.msra.gmra.mxu1 %v10183_v5  ;;  %6993 = vmatpush1.bf16.msra.mxu0 %v9678_v7  ;;  %v9701_v5 = vld [vmem:[#allocation5 + $0xdac] ss:$48 sps:$4 sm:$0xff]   ;;  %v9747_v7 = vld [vmem:[#allocation5 + $0x10a8] ss:$48 sps:$4 sm:$0xff]  }
 0x36b   :  { %7036 = vmatpush1.bf16.msra.mxu1 %v9681_v44  ;;  %6994 = vmatprep.subr.bf16.mxu0 %v9686_v8  ;;  %v9752_v44 = vld [vmem:[#allocation5 + $0xa4c] ss:$48 sps:$4 sm:$0xff]  }
 0x36c   :  { %7037 = vmatprep.subr.bf16.mxu1 %v9689_v9  ;;  %7024 = vmatprep.mubr.bf16.mxu0 %v9896_v39  ;;  %v9755_v8 = vld [vmem:[#allocation5 + $0x104c] ss:$48 sps:$4 sm:$0xff]   ;;  %v9750_v9 = vld [vmem:[#allocation5 + $0xa48] ss:$48 sps:$4 sm:$0xff]  }
 0x36d   :  { %7067 = vmatprep.mubr.bf16.mxu1 %v10200_v28  ;;  %v9705_v28 = vld [vmem:[#allocation5 + $0xd48] ss:$48 sps:$4 sm:$0xff]  }
 0x36e   :  { %6995 = vmatpush1.bf16.msra.mxu0 %v9684_v11  ;;  %v9753_v11 = vld [vmem:[#allocation5 + $0x1048] ss:$48 sps:$4 sm:$0xff]  }
 0x36f   :  { %7038 = vmatpush1.bf16.msra.mxu1 %v9687_v12  ;;  %6996 = vmatprep.subr.bf16.mxu0 %v9692_v15  ;;  %v9758_v12 = vld [vmem:[#allocation5 + $0x9ec] ss:$48 sps:$4 sm:$0xff]   ;;  %v9759_v39 = vld [vmem:[#allocation5 + $0xfe8] ss:$48 sps:$4 sm:$0xff]  }
 0x370   :  { %7039 = vmatprep.subr.bf16.mxu1 %v9695_v34  ;;  %v9761_v15 = vld [vmem:[#allocation5 + $0xfec] ss:$48 sps:$4 sm:$0xff]   ;;  %v9756_v34 = vld [vmem:[#allocation5 + $0x9e8] ss:$48 sps:$4 sm:$0xff]  }
 0x372   :  { %6997 = vmatpush1.bf16.msra.mxu0 %v9690_v31  ;;  %v9764_v31 = vld [vmem:[#allocation5 + $0x98c] ss:$48 sps:$4 sm:$0xff]  }
 0x373   :  { %7040 = vmatpush1.bf16.msra.mxu1 %v9693_v18  ;;  %6998 = vmatprep.subr.bf16.mxu0 %v9698_v19  ;;  %v9767_v18 = vld [vmem:[#allocation5 + $0xf8c] ss:$48 sps:$4 sm:$0xff]   ;;  %v9762_v19 = vld [vmem:[#allocation5 + $0x988] ss:$48 sps:$4 sm:$0xff]  }
 0x374   :  { %7041 = vmatprep.subr.bf16.mxu1 %v9701_v5  ;;  %v9765_v5 = vld [vmem:[#allocation5 + $0xf88] ss:$48 sps:$4 sm:$0xff]  }
 0x376   :  { %6999 = vmatpush1.bf16.msra.mxu0 %v9696_v21  ;;  %v9770_v21 = vld [vmem:[#allocation5 + $0x92c] ss:$48 sps:$4 sm:$0xff]  }
 0x377   :  { %7042 = vmatpush1.bf16.msra.mxu1 %v9699_v49  ;;  %7000 = vmatprep.subr.bf16.mxu0 %v9704_v30  ;;  %v9773_v49 = vld [vmem:[#allocation5 + $0xf2c] ss:$48 sps:$4 sm:$0xff]   ;;  %v9768_v30 = vld [vmem:[#allocation5 + $0x928] ss:$48 sps:$4 sm:$0xff]  }
 0x378   :  { %7043 = vmatprep.subr.bf16.mxu1 %v9707_v22  ;;  %v9771_v22 = vld [vmem:[#allocation5 + $0xf28] ss:$48 sps:$4 sm:$0xff]  }
 0x37a   :  { %7001 = vmatpush1.bf16.msra.mxu0 %v9702_v2  ;;  %v9776_v2 = vld [vmem:[#allocation5 + $0x14cc] ss:$48 sps:$4 sm:$0xff]  }
 0x37b   :  { %7044 = vmatpush1.bf16.msra.mxu1 %v9705_v28  ;;  %7002 = vmatprep.subr.bf16.mxu0 %v9710_v38  ;;  %v9779_v28 = vld [vmem:[#allocation5 + $0x1acc] ss:$48 sps:$4 sm:$0xff]   ;;  %v9774_v38 = vld [vmem:[#allocation5 + $0x14c8] ss:$48 sps:$4 sm:$0xff]  }
 0x37c   :  { %7045 = vmatprep.subr.bf16.mxu1 %v9713_v25  ;;  %v9777_v25 = vld [vmem:[#allocation5 + $0x1ac8] ss:$48 sps:$4 sm:$0xff]  }
 0x37e   :  { %7003 = vmatpush1.bf16.msra.mxu0 %v9708_v29  ;;  %v9782_v29 = vld [vmem:[#allocation5 + $0x146c] ss:$48 sps:$4 sm:$0xff]  }
 0x37f   :  { %7046 = vmatpush1.bf16.msra.mxu1 %v9711_v27  ;;  %7004 = vmatprep.subr.bf16.mxu0 %v9716_v26  ;;  %v9785_v27 = vld [vmem:[#allocation5 + $0x1a6c] ss:$48 sps:$4 sm:$0xff]   ;;  %v9897_v26 = vld [vmem:[#allocation2 + $0x8] ss:$40 sps:$4 sm:$0xff]  }
 0x380   :  { %7047 = vmatprep.subr.bf16.mxu1 %v9719_v20  ;;  %v9780_v20 = vld [vmem:[#allocation5 + $0x1468] ss:$48 sps:$4 sm:$0xff]  }
 0x382   :  { %7005 = vmatpush1.bf16.msra.mxu0 %v9714_v55  ;;  %v9783_v55 = vld [vmem:[#allocation5 + $0x1a68] ss:$48 sps:$4 sm:$0xff]  }
 0x383   :  { %7048 = vmatpush1.bf16.msra.mxu1 %v9717_v46  ;;  %7006 = vmatprep.subr.bf16.mxu0 %v9722_v33  ;;  %v9788_v46 = vld [vmem:[#allocation5 + $0x140c] ss:$48 sps:$4 sm:$0xff]  }
 0x384   :  { %7049 = vmatprep.subr.bf16.mxu1 %v9725_v4  ;;  %v9791_v33 = vld [vmem:[#allocation5 + $0x1a0c] ss:$48 sps:$4 sm:$0xff]  }
 0x385   :  { %v9898_v4 = vld [vmem:[#allocation2 + $0x1c] ss:$40 sps:$4 sm:$0xff]  }
 0x386   :  { %7007 = vmatpush1.bf16.msra.mxu0 %v9720_v35  ;;  %v9786_v35 = vld [vmem:[#allocation5 + $0x1408] ss:$48 sps:$4 sm:$0xff]  }
 0x387   :  { %7050 = vmatpush1.bf16.msra.mxu1 %v9723_v36  ;;  %7008 = vmatprep.subr.bf16.mxu0 %v9728_v10  ;;  %v9789_v36 = vld [vmem:[#allocation5 + $0x1a08] ss:$48 sps:$4 sm:$0xff]   ;;  %v9794_v10 = vld [vmem:[#allocation5 + $0x13ac] ss:$48 sps:$4 sm:$0xff]  }
 0x388   :  { %7051 = vmatprep.subr.bf16.mxu1 %v9731_v43  ;;  %v9792_v43 = vld [vmem:[#allocation5 + $0x13a8] ss:$48 sps:$4 sm:$0xff]  }
 0x38a   :  { %7009 = vmatpush2.bf16.msra.mxu0 %v9726_v54  ;;  %v9795_v54 = vld [vmem:[#allocation5 + $0x19a8] ss:$48 sps:$4 sm:$0xff]  }
 0x38b   :  { %7052 = vmatpush2.bf16.msra.mxu1 %v9729_v50  ;;  %7010 = vmatprep.subr.bf16.mxu0 %v9734_v51  ;;  %v9800_v50 = vld [vmem:[#allocation5 + $0x134c] ss:$48 sps:$4 sm:$0xff]  }
 0x38c   :  { %7053 = vmatprep.subr.bf16.mxu1 %v9737_v52  ;;  %v9803_v51 = vld [vmem:[#allocation5 + $0x194c] ss:$48 sps:$4 sm:$0xff]   ;;  %v9798_v52 = vld [vmem:[#allocation5 + $0x1348] ss:$48 sps:$4 sm:$0xff]  }
 0x38e   :  { %7011 = vmatpush2.bf16.msra.mxu0 %v9732_v59  ;;  %v9806_v59 = vld [vmem:[#allocation5 + $0x12ec] ss:$48 sps:$4 sm:$0xff]  }
 0x38f   :  { %7054 = vmatpush2.bf16.msra.mxu1 %v9735_v53  ;;  %7012 = vmatprep.subr.bf16.mxu0 %v9740_v56  ;;  %v9809_v53 = vld [vmem:[#allocation5 + $0x18ec] ss:$48 sps:$4 sm:$0xff]   ;;  %v9804_v56 = vld [vmem:[#allocation5 + $0x12e8] ss:$48 sps:$4 sm:$0xff]  }
 0x390   :  { %7055 = vmatprep.subr.bf16.mxu1 %v9743_v6  ;;  %v9807_v6 = vld [vmem:[#allocation5 + $0x18e8] ss:$48 sps:$4 sm:$0xff]  }
 0x392   :  { %7013 = vmatpush2.bf16.msra.mxu0 %v9738_v60  ;;  %v9812_v60 = vld [vmem:[#allocation5 + $0x128c] ss:$48 sps:$4 sm:$0xff]  }
 0x393   :  { %7056 = vmatpush2.bf16.msra.mxu1 %v9741_v62  ;;  %7014 = vmatprep.subr.bf16.mxu0 %v9746_v63  ;;  %v9815_v62 = vld [vmem:[#allocation5 + $0x188c] ss:$48 sps:$4 sm:$0xff]   ;;  %v9810_v63 = vld [vmem:[#allocation5 + $0x1288] ss:$48 sps:$4 sm:$0xff]  }
 0x394   :  { %7057 = vmatprep.subr.bf16.mxu1 %v9749_v48  ;;  %v9813_v48 = vld [vmem:[#allocation5 + $0x1888] ss:$48 sps:$4 sm:$0xff]  }
 0x396   :  { %7015 = vmatpush2.bf16.msra.mxu0 %v9744_v40  ;;  %v9818_v40 = vld [vmem:[#allocation5 + $0x122c] ss:$48 sps:$4 sm:$0xff]  }
 0x397   :  { %7058 = vmatpush2.bf16.msra.mxu1 %v9747_v7  ;;  %7016 = vmatprep.subr.bf16.mxu0 %v9752_v44  ;;  %v9821_v7 = vld [vmem:[#allocation5 + $0x182c] ss:$48 sps:$4 sm:$0xff]   ;;  %v9816_v44 = vld [vmem:[#allocation5 + $0x1228] ss:$48 sps:$4 sm:$0xff]  }
 0x398   :  { %7059 = vmatprep.subr.bf16.mxu1 %v9755_v8  ;;  %v9819_v8 = vld [vmem:[#allocation5 + $0x1828] ss:$48 sps:$4 sm:$0xff]  }
 0x39a   :  { %7017 = vmatpush2.bf16.msra.mxu0 %v9750_v9  ;;  %v9824_v9 = vld [vmem:[#allocation5 + $0x17cc] ss:$48 sps:$4 sm:$0xff]  }
 0x39b   :  { %7060 = vmatpush2.bf16.msra.mxu1 %v9753_v11  ;;  %7018 = vmatprep.subr.bf16.mxu0 %v9758_v12  ;;  %v9827_v11 = vld [vmem:[#allocation5 + $0x1dcc] ss:$48 sps:$4 sm:$0xff]   ;;  %v9822_v12 = vld [vmem:[#allocation5 + $0x17c8] ss:$48 sps:$4 sm:$0xff]  }
 0x39c   :  { %7061 = vmatprep.subr.bf16.mxu1 %v9761_v15  ;;  %v9825_v15 = vld [vmem:[#allocation5 + $0x1dc8] ss:$48 sps:$4 sm:$0xff]  }
 0x39e   :  { %7019 = vmatpush2.bf16.msra.mxu0 %v9756_v34  ;;  %v9830_v34 = vld [vmem:[#allocation5 + $0x176c] ss:$48 sps:$4 sm:$0xff]  }
 0x39f   :  { %7062 = vmatpush2.bf16.msra.mxu1 %v9759_v39  ;;  %7020 = vmatprep.subr.bf16.mxu0 %v9764_v31  ;;  %v9833_v39 = vld [vmem:[#allocation5 + $0x1d6c] ss:$48 sps:$4 sm:$0xff]   ;;  %v9828_v31 = vld [vmem:[#allocation5 + $0x1768] ss:$48 sps:$4 sm:$0xff]  }
 0x3a0   :  { %7063 = vmatprep.subr.bf16.mxu1 %v9767_v18  ;;  %v9831_v18 = vld [vmem:[#allocation5 + $0x1d68] ss:$48 sps:$4 sm:$0xff]  }
 0x3a2   :  { %7021 = vmatpush2.bf16.msra.mxu0 %v9762_v19  ;;  %v9836_v19 = vld [vmem:[#allocation5 + $0x170c] ss:$48 sps:$4 sm:$0xff]  }
 0x3a3   :  { %7064 = vmatpush2.bf16.msra.mxu1 %v9765_v5  ;;  %7022 = vmatprep.subr.bf16.mxu0 %v9770_v21  ;;  %v9839_v5 = vld [vmem:[#allocation5 + $0x1d0c] ss:$48 sps:$4 sm:$0xff]   ;;  %v9834_v21 = vld [vmem:[#allocation5 + $0x1708] ss:$48 sps:$4 sm:$0xff]  }
 0x3a4   :  { %7065 = vmatprep.subr.bf16.mxu1 %v9773_v49  ;;  %v9837_v49 = vld [vmem:[#allocation5 + $0x1d08] ss:$48 sps:$4 sm:$0xff]  }
 0x3a6   :  { %7023 = vmatpush2.bf16.msra.mxu0 %v9768_v30  ;;  %v9842_v30 = vld [vmem:[#allocation5 + $0x16ac] ss:$48 sps:$4 sm:$0xff]  }
 0x3a7   :  { %7066 = vmatpush2.bf16.msra.mxu1 %v9771_v22  ;;  %7078 = vmatprep.subr.bf16.mxu0 %v9776_v2  ;;  %v9845_v22 = vld [vmem:[#allocation5 + $0x1cac] ss:$48 sps:$4 sm:$0xff]   ;;  %v9840_v2 = vld [vmem:[#allocation5 + $0x16a8] ss:$48 sps:$4 sm:$0xff]  }
 0x3a8   :  { %7121 = vmatprep.subr.bf16.mxu1 %v9779_v28  ;;  %v9843_v28 = vld [vmem:[#allocation5 + $0x1ca8] ss:$48 sps:$4 sm:$0xff]  }
 0x3a9   :  { %7025 = vmatmul.mubr.bf16.vlgmr.msra.gmra.mxu0 %v9897_v26  ;;  %v9854_v26 = vld [vmem:[#allocation5 + $0x15ec] ss:$48 sps:$4 sm:$0xff]  }
 0x3aa   :  { %7068 = vmatmul.mubr.bf16.vlgmr.msra.gmra.mxu1 %v10221_v16  ;;  %7079 = vmatpush1.bf16.msra.mxu0 %v9774_v38  ;;  %v9797_v16 = vld [vmem:[#allocation5 + $0x19ac] ss:$48 sps:$4 sm:$0xff]  }
 0x3ab   :  { %7122 = vmatpush1.bf16.msra.mxu1 %v9777_v25  ;;  %7080 = vmatprep.subr.bf16.mxu0 %v9782_v29  ;;  %v9848_v38 = vld [vmem:[#allocation5 + $0x164c] ss:$48 sps:$4 sm:$0xff]   ;;  %v9846_v29 = vld [vmem:[#allocation5 + $0x1648] ss:$48 sps:$4 sm:$0xff]  }
 0x3ac   :  { %7123 = vmatprep.subr.bf16.mxu1 %v9785_v27  ;;  %7110 = vmatprep.mubr.bf16.mxu0 %v9898_v4  ;;  %v9851_v25 = vld [vmem:[#allocation5 + $0x1c4c] ss:$48 sps:$4 sm:$0xff]   ;;  %v9849_v27 = vld [vmem:[#allocation5 + $0x1c48] ss:$48 sps:$4 sm:$0xff]  }
 0x3ad   :  { %7153 = vmatprep.mubr.bf16.mxu1 %v10225_v61  ;;  %v9801_v61 = vld [vmem:[#allocation5 + $0x1948] ss:$48 sps:$4 sm:$0xff]   ;;  %v9863_v4 = vld [vmem:[#allocation5 + $0x1b8c] ss:$48 sps:$4 sm:$0xff]  }
 0x3ae   :  { %7081 = vmatpush1.bf16.msra.mxu0 %v9780_v20  ;;  %v9857_v20 = vld [vmem:[#allocation5 + $0x1bec] ss:$48 sps:$4 sm:$0xff]  }
 0x3af   :  { %7124 = vmatpush1.bf16.msra.mxu1 %v9783_v55  ;;  %7082 = vmatprep.subr.bf16.mxu0 %v9788_v46  ;;  %v9852_v55 = vld [vmem:[#allocation5 + $0x15e8] ss:$48 sps:$4 sm:$0xff]  }
 0x3b0   :  { %7125 = vmatprep.subr.bf16.mxu1 %v9791_v33  ;;  %v9855_v46 = vld [vmem:[#allocation5 + $0x1be8] ss:$48 sps:$4 sm:$0xff]   ;;  %v9860_v33 = vld [vmem:[#allocation5 + $0x158c] ss:$48 sps:$4 sm:$0xff]  }
 0x3b2   :  { %7083 = vmatpush1.bf16.msra.mxu0 %v9786_v35  ;;  %v9858_v35 = vld [vmem:[#allocation5 + $0x1588] ss:$48 sps:$4 sm:$0xff]  }
 0x3b3   :  { %7126 = vmatpush1.bf16.msra.mxu1 %v9789_v36  ;;  %7084 = vmatprep.subr.bf16.mxu0 %v9794_v10  ;;  %v9861_v36 = vld [vmem:[#allocation5 + $0x1b88] ss:$48 sps:$4 sm:$0xff]   ;;  %v9866_v10 = vld [vmem:[#allocation5 + $0x152c] ss:$48 sps:$4 sm:$0xff]  }
 0x3b4   :  { %7127 = vmatprep.subr.bf16.mxu1 %v9797_v16  ;;  %v9869_v16 = vld [vmem:[#allocation5 + $0x1b2c] ss:$48 sps:$4 sm:$0xff]  }
 0x3b6   :  { %7085 = vmatpush1.bf16.msra.mxu0 %v9792_v43  ;;  %v9864_v43 = vld [vmem:[#allocation5 + $0x1528] ss:$48 sps:$4 sm:$0xff]  }
 0x3b7   :  { %7128 = vmatpush1.bf16.msra.mxu1 %v9795_v54  ;;  %7086 = vmatprep.subr.bf16.mxu0 %v9800_v50  ;;  %v9867_v54 = vld [vmem:[#allocation5 + $0x1b28] ss:$48 sps:$4 sm:$0xff]   ;;  %v10236_v50 = vpop.f32.mrf.mxu1 }
 0x3b8   :  { %7129 = vmatprep.subr.bf16.mxu1 %v9803_v51  ;;  %v9899_v51 = vld [vmem:[#allocation2 + $0x18] ss:$40 sps:$4 sm:$0xff]  }
 0x3ba   :  { %7087 = vmatpush1.bf16.msra.mxu0 %v9798_v52  ;;  %v10239_v52 = vpop.f32.mrf.mxu1 }
 0x3bb   :  { %7130 = vmatpush1.bf16.msra.mxu1 %v9801_v61  ;;  %7088 = vmatprep.subr.bf16.mxu0 %v9806_v59  ;;  %v10243_v59 = vpop.f32.mrf.mxu0 }
 0x3bc   :  { %7131 = vmatprep.subr.bf16.mxu1 %v9809_v53  ;;  %v10241_v61 = vpop.f32.mrf.mxu1 }
 0x3be   :  { %7089 = vmatpush1.bf16.msra.mxu0 %v9804_v56  ;;  %v10245_v53 = vpop.f32.mrf.mxu1  ;;  %v10247_v56 = vpop.f32.mrf.mxu0 }
 0x3bf   :  { %7132 = vmatpush1.bf16.msra.mxu1 %v9807_v6  ;;  %7090 = vmatprep.subr.bf16.mxu0 %v9812_v60 }
 0x3c0   :  { %7133 = vmatprep.subr.bf16.mxu1 %v9815_v62  ;;  %v10249_v6 = vpop.f32.mrf.mxu1  ;;  %v10251_v60 = vpop.f32.mrf.mxu0 }
 0x3c2   :  { %7091 = vmatpush1.bf16.msra.mxu0 %v9810_v63  ;;  %v10253_v62 = vpop.f32.mrf.mxu1  ;;  %v10255_v63 = vpop.f32.mrf.mxu0 }
 0x3c3   :  { %7134 = vmatpush1.bf16.msra.mxu1 %v9813_v48  ;;  %7092 = vmatprep.subr.bf16.mxu0 %v9818_v40 }
 0x3c4   :  { %7135 = vmatprep.subr.bf16.mxu1 %v9821_v7  ;;  %v10257_v48 = vpop.f32.mrf.mxu1 }
 0x3c6   :  { %7093 = vmatpush1.bf16.msra.mxu0 %v9816_v44  ;;  %v10261_v40 = vpop.f32.mrf.mxu1 }
 0x3c7   :  { %7136 = vmatpush1.bf16.msra.mxu1 %v9819_v8  ;;  %7094 = vmatprep.subr.bf16.mxu0 %v9824_v9 }
 0x3c8   :  { %7137 = vmatprep.subr.bf16.mxu1 %v9827_v11  ;;  %v10265_v44 = vpop.f32.mrf.mxu1 }
 0x3ca   :  { %7095 = vmatpush2.bf16.msra.mxu0 %v9822_v12  ;;  %v10269_v9 = vpop.f32.mrf.mxu1 }
 0x3cb   :  { %7138 = vmatpush2.bf16.msra.mxu1 %v9825_v15  ;;  %7096 = vmatprep.subr.bf16.mxu0 %v9830_v34 }
 0x3cc   :  { %7139 = vmatprep.subr.bf16.mxu1 %v9833_v39  ;;  %v10273_v12 = vpop.f32.mrf.mxu1 }
 0x3ce   :  { %7097 = vmatpush2.bf16.msra.mxu0 %v9828_v31  ;;  %v10275_v34 = vpop.f32.mrf.mxu1 }
 0x3cf   :  { %7140 = vmatpush2.bf16.msra.mxu1 %v9831_v18  ;;  %7098 = vmatprep.subr.bf16.mxu0 %v9836_v19 }
 0x3d0   :  { %7141 = vmatprep.subr.bf16.mxu1 %v9839_v5  ;;  %v6811_v31 = vpop.f32.mrf.mxu1 }
 0x3d2   :  { %7099 = vmatpush2.bf16.msra.mxu0 %v9834_v21  ;;  %v6813_v19 = vpop.f32.mrf.mxu1 }
 0x3d3   :  { %7142 = vmatpush2.bf16.msra.mxu1 %v9837_v49  ;;  %7100 = vmatprep.subr.bf16.mxu0 %v9842_v30 }
 0x3d4   :  { %7143 = vmatprep.subr.bf16.mxu1 %v9845_v22  ;;  %v6815_v21 = vpop.f32.mrf.mxu1 }
 0x3d6   :  { %7101 = vmatpush2.bf16.msra.mxu0 %v9840_v2  ;;  %v6817_v30 = vpop.f32.mrf.mxu1 }
 0x3d7   :  { %7144 = vmatpush2.bf16.msra.mxu1 %v9843_v28  ;;  %7102 = vmatprep.subr.bf16.mxu0 %v9848_v38 }
 0x3d8   :  { %7145 = vmatprep.subr.bf16.mxu1 %v9851_v25 }
 0x3da   :  { %7103 = vmatpush2.bf16.msra.mxu0 %v9846_v29 }
 0x3db   :  { %7146 = vmatpush2.bf16.msra.mxu1 %v9849_v27  ;;  %7104 = vmatprep.subr.bf16.mxu0 %v9854_v26 }
 0x3dc   :  { %7147 = vmatprep.subr.bf16.mxu1 %v9857_v20 }
 0x3de   :  { %7105 = vmatpush2.bf16.msra.mxu0 %v9852_v55 }
 0x3df   :  { %7148 = vmatpush2.bf16.msra.mxu1 %v9855_v46  ;;  %7106 = vmatprep.subr.bf16.mxu0 %v9860_v33 }
 0x3e0   :  { %7149 = vmatprep.subr.bf16.mxu1 %v9863_v4 }
 0x3e2   :  { %7107 = vmatpush2.bf16.msra.mxu0 %v9858_v35 }
 0x3e3   :  { %7150 = vmatpush2.bf16.msra.mxu1 %v9861_v36  ;;  %7108 = vmatprep.subr.bf16.mxu0 %v9866_v10 }
 0x3e4   :  { %7151 = vmatprep.subr.bf16.mxu1 %v9869_v16 }
 0x3e6   :  { %7109 = vmatpush2.bf16.msra.mxu0 %v9864_v43 }
 0x3e7   :  { %7152 = vmatpush2.bf16.msra.mxu1 %v9867_v54 }
 0x3e9   :  { %7111 = vmatmul.mubr.bf16.vlgmr.msra.gmra.mxu0 %v9899_v51 }
 0x3ea   :  { %7154 = vmatmul.mubr.bf16.vlgmr.msra.gmra.mxu1 %v10229_v45  ;;  %v10259_v45 = vpop.f32.mrf.mxu0  ;;  %v6897_v2 = vpop.f32.mrf.mxu1 }
 0x3ec   :  { %v10263_v7 = vpop.f32.mrf.mxu0  ;;  %v6899_v25 = vpop.f32.mrf.mxu1 }
 0x3ee   :  { %v10267_v8 = vpop.f32.mrf.mxu0  ;;  %v6901_v4 = vpop.f32.mrf.mxu1 }
 0x3f0   :  { %v10271_v11 = vpop.f32.mrf.mxu0  ;;  %v6903_v3 = vpop.f32.mrf.mxu1 }
 0x3f2   :  { %v6768_v15 = vpop.f32.mrf.mxu0 }
 0x3f3   :  { %v6812_v38 = vadd.f32 %v6811_v31, %v6768_v15  ;;  %v7273_v15 = vsub.s32 0, %v10075_v14 }
 0x3f4   :  { %v6770_v39 = vpop.f32.mrf.mxu0 }
 0x3f5   :  { %v6814_v29 = vadd.f32 %v6813_v19, %v6770_v39  ;;  %v10278_v19 = vld [vmem:[#allocation7] sm:$0xf] }
 0x3f6   :  { %v6772_v18 = vpop.f32.mrf.mxu0 }
 0x3f7   :  { %v6816_v27 = vadd.f32 %v6815_v21, %v6772_v18 }
 0x3f8   :  { %v6774_v5 = vpop.f32.mrf.mxu0 }
 0x3f9   :  { %v6818_v55 = vadd.f32 %v6817_v30, %v6774_v5 }
 0x3fa   :  { %v6854_v49 = vpop.f32.mrf.mxu0 }
 0x3fb   :  { %v6855_v26 = vadd.f32 %v6854_v49, %v6812_v38  ;;  %v7277_v49 = vsub.s32 1, %v10075_v14 }
 0x3fc   :  { %v6856_v22 = vpop.f32.mrf.mxu0 }
 0x3fd   :  { %v6857_v46 = vadd.f32 %v6856_v22, %v6814_v29  ;;  %v6898_v36 = vadd.f32 %v6897_v2, %v6855_v26  ;;  %v10403_v22 = vand.u32 7, %v10174_v32  ;;  %v7278_v26 = vrot.slane %v10278_v19, %v7277_v49 }
 0x3fe   :  { %v6858_v28 = vpop.f32.mrf.mxu0 }
 0x3ff   :  { %v6859_v33 = vadd.f32 %v6858_v28, %v6816_v27  ;;  %v6900_v43 = vadd.f32 %v6899_v25, %v6857_v46  ;;  %vm10290_vm5 = vcmp.eq.s32.totalorder %v10403_v22, 7  ;;  %v7274_v28 = vrot.slane %v10278_v19, %v7273_v15 }
 0x400   :  { %v6860_v20 = vpop.f32.mrf.mxu0 }
 0x401   :  { %v6861_v10 = vadd.f32 %v6860_v20, %v6818_v55  ;;  %v6902_v54 = vadd.f32 %v6901_v4, %v6859_v33 }
 0x403   :  { %v6904_v31 = vadd.f32 %v6903_v3, %v6861_v10 }
 0x429   :  { %v6940_v35 = vpop.f32.mrf.mxu0 }
 0x42a   :  { %v6941_v51 = vadd.f32 %v6940_v35, %v6898_v36 }
 0x42b   :  { %v6942_v16 = vpop.f32.mrf.mxu0 }
 0x42c   :  { %v6943_v39 = vadd.f32 %v6942_v16, %v6900_v43  ;;  %v7224_v30 = vrot.slane %v6941_v51, 1 }
 0x42d   :  { %v6944_v1 = vpop.f32.mrf.mxu0 }
 0x42e   :  { %v6945_v18 = vadd.f32 %v6944_v1, %v6902_v54  ;;  %v7225_v57 = vrot.slane %v6943_v39, 1 }
 0x42f   :  { %v6946_v21 = vpop.f32.mrf.mxu0 }
 0x430   :  { %v7228_v1 = vrot.slane %v6945_v18, 1  ;;  %v6947_v2 = vadd.f32 %v6946_v21, %v6904_v31 }
 0x432   :  { %v7233_v38 = vsel %vm7232_vm4, %v7224_v30, %v7228_v1  ;;  %v7237_v25 = vsel %vm7232_vm4, %v7228_v1, %v7224_v30  ;;  %v7229_v29 = vrot.slane %v6947_v2, 1 }
 0x433   :  { %v7245_v27 = vsel %vm10282_vm3, 0.0, %v7233_v38  ;;  %v7249_v32 = vsel %vm10290_vm5, 0.0, %v7237_v25 }
 0x434   :  { %v7261_v20 = vadd.f32 %v10191_v13, %v7245_v27  ;;  %v7265_v55 = vadd.f32 %v10213_v23, %v7249_v32  ;;  %v7234_v46 = vsel %vm7232_vm4, %v7225_v57, %v7229_v29  ;;  %v7238_v33 = vsel %vm7232_vm4, %v7229_v29, %v7225_v57 }
 0x435   :  { %v7246_v4 = vsel %vm10282_vm3, 0.0, %v7234_v46  ;;  %v7250_v35 = vsel %vm10290_vm5, 0.0, %v7238_v33 }
 0x436   :  { %v7291_v36 = vadd.f32 %v7274_v28, %v7261_v20  ;;  %v7295_v10 = vadd.f32 %v7274_v28, %v7265_v55  ;;  %v7262_v16 = vadd.f32 %v10207_v17, %v7246_v4  ;;  %v7266_v13 = vadd.f32 %v10219_v24, %v7250_v35 }
 0x438   :  { %v7299_v43 = vmax.f32 %v7291_v36, 0.0  ;;  %v7303_v23 = vmax.f32 %v7295_v10, 0.0  ;;  %v7292_v54 = vadd.f32 %v7278_v26, %v7262_v16  ;;  %v7296_v51 = vadd.f32 %v7278_v26, %v7266_v13  ;;  %v6983_v16 = vpop.f32.mrf.mxu1 }
 0x43a   :  { %v7307_v15 = vrot.slane %v7299_v43, 4  ;;  %v7365_v31 = vrot.slane %v7303_v23, 4  ;;  %v7300_v39 = vmax.f32 %v7292_v54, 0.0  ;;  %v7304_v18 = vmax.f32 %v7296_v51, 0.0  ;;  %v6985_v13 = vpop.f32.mrf.mxu1 }
 0x43c   :  { %v7308_v21 = vmax.f32 %v7299_v43, %v7307_v15  ;;  %v7366_v49 = vmax.f32 %v7303_v23, %v7365_v31  ;;  %v7313_v30 = vrot.slane %v7300_v39, 4  ;;  %v7371_v22 = vrot.slane %v7304_v18, 4  ;;  %v6987_v43 = vpop.f32.mrf.mxu1 }
 0x43e   :  { %v7309_v1 = vrot.slane %v7308_v21, 2  ;;  %v7367_v2 = vrot.slane %v7366_v49, 2  ;;  %v7314_v57 = vmax.f32 %v7300_v39, %v7313_v30  ;;  %v7372_v28 = vmax.f32 %v7304_v18, %v7371_v22  ;;  %v6989_v23 = vpop.f32.mrf.mxu1 }
 0x43f   :  { %v6599_v30 = vadd.f32 %v10247_v56, %v10239_v52  ;;  %v6601_v22 = vadd.f32 %v10251_v60, %v10241_v61 }
 0x440   :  { %v7310_v38 = vmax.f32 %v7308_v21, %v7309_v1  ;;  %v7368_v17 = vmax.f32 %v7366_v49, %v7367_v2  ;;  %v7315_v25 = vrot.slane %v7314_v57, 2  ;;  %v7373_v24 = vrot.slane %v7372_v28, 2 }
 0x441   :  { %v6597_v49 = vadd.f32 %v10243_v59, %v10236_v50  ;;  %v6603_v2 = vadd.f32 %v10255_v63, %v10245_v53  ;;  %v6644_v50 = vadd.f32 %v10257_v48, %v6601_v22 }
 0x442   :  { %v7311_v29 = vrot.slane %v7310_v38, 1  ;;  %v7369_v27 = vrot.slane %v7368_v17, 1  ;;  %v7316_v32 = vmax.f32 %v7314_v57, %v7315_v25  ;;  %v7374_v26 = vmax.f32 %v7372_v28, %v7373_v24 }
 0x443   :  { %v6640_v25 = vadd.f32 %v10249_v6, %v6597_v49  ;;  %v6642_v24 = vadd.f32 %v10253_v62, %v6599_v30  ;;  %v6646_v61 = vadd.f32 %v10261_v40, %v6603_v2  ;;  %v6687_v63 = vadd.f32 %v10267_v8, %v6644_v50 }
 0x444   :  { %v7317_v20 = vrot.slane %v7316_v32, 1  ;;  %v7375_v55 = vrot.slane %v7374_v26, 1  ;;  %v10316_v46 = vmax.f32 %v7310_v38, %v7311_v29  ;;  %v10320_v4 = vmax.f32 %v7368_v17, %v7369_v27 }
 0x445   :  { %v6683_v60 = vadd.f32 %v10259_v45, %v6640_v25  ;;  %v6685_v53 = vadd.f32 %v10263_v7, %v6642_v24  ;;  %v6689_v62 = vadd.f32 %v10271_v11, %v6646_v61  ;;  %v6730_v45 = vadd.f32 %v10273_v12, %v6687_v63 }
 0x446   :  { %v10318_v33 = vmax.f32 %v7316_v32, %v7317_v20  ;;  %v10322_v35 = vmax.f32 %v7374_v26, %v7375_v55  ;;  %v7281_v7 = vsub.s32 2, %v10075_v14 }
 0x447   :  { %v6728_v40 = vadd.f32 %v10269_v9, %v6685_v53  ;;  %v6732_v9 = vadd.f32 %v10275_v34, %v6689_v62 }
 0x448   :  { %v7335_v36 = vcombine.low %v10316_v46, %v10318_v33  ;;  %v7393_v10 = vcombine.low %v10320_v4, %v10322_v35 }
 0x469   :  { %v7026_v54 = vpop.f32.mrf.mxu0 }
 0x46a   :  { %v7069_v51 = vpop.f32.mrf.mxu1  ;;  %v7027_v21 = vadd.f32 %v7026_v54, %v6983_v16  ;;  %v7216_v54 = vsel %vm10178_vm1, 0.0, %v10122_v37  ;;  %v7221_v37 = vsel %vm10196_vm2, 0.0, %v10134_v42 }
 0x46b   :  { %v7028_v15 = vpop.f32.mrf.mxu0 }
 0x46c   :  { %v7071_v31 = vpop.f32.mrf.mxu1  ;;  %v7029_v1 = vadd.f32 %v7028_v15, %v6985_v13  ;;  %v7070_v38 = vadd.f32 %v7069_v51, %v7027_v21 }
 0x46d   :  { %v7030_v39 = vpop.f32.mrf.mxu0 }
 0x46e   :  { %v7073_v18 = vpop.f32.mrf.mxu1  ;;  %v7031_v17 = vadd.f32 %v7030_v39, %v6987_v43  ;;  %v7072_v52 = vadd.f32 %v7071_v31, %v7029_v1  ;;  %v7217_v31 = vsel %vm10178_vm1, 0.0, %v10130_v41  ;;  %v7285_v39 = vsub.s32 3, %v10075_v14 }
 0x46f   :  { %v7032_v57 = vpop.f32.mrf.mxu0  ;;  %v7256_v22 = vadd.f32 %v7217_v31, %v6728_v40  ;;  %v7282_v41 = vrot.slane %v10278_v19, %v7281_v7 }
 0x470   :  { %v7075_v28 = vpop.f32.mrf.mxu1  ;;  %v7033_v56 = vadd.f32 %v7032_v57, %v6989_v23  ;;  %v7074_v6 = vadd.f32 %v7073_v18, %v7031_v17  ;;  %v6726_v23 = vadd.f32 %v10265_v44, %v6683_v60  ;;  %v7220_v44 = vsel %vm10196_vm2, 0.0, %v10126_v58 }
 0x471   :  { %v7259_v0 = vadd.f32 %v7220_v44, %v6730_v45  ;;  %v7260_v57 = vadd.f32 %v7221_v37, %v6732_v9 }
 0x472   :  { %v7076_v16 = vadd.f32 %v7075_v28, %v7033_v56  ;;  %v7255_v30 = vadd.f32 %v7216_v54, %v6726_v23  ;;  %v7286_v28 = vrot.slane %v10278_v19, %v7285_v39 }
 0x4a9   :  { %v7112_v59 = vpop.f32.mrf.mxu0 }
 0x4aa   :  { %v7155_v29 = vpop.f32.mrf.mxu1  ;;  %v7113_v27 = vadd.f32 %v7112_v59, %v7070_v38 }
 0x4ab   :  { %v7114_v32 = vpop.f32.mrf.mxu0 }
 0x4ac   :  { %v7157_v26 = vpop.f32.mrf.mxu1  ;;  %v7115_v20 = vadd.f32 %v7114_v32, %v7072_v52  ;;  %v7156_v13 = vadd.f32 %v7155_v29, %v7113_v27 }
 0x4ad   :  { %v7116_v48 = vpop.f32.mrf.mxu0 }
 0x4ae   :  { %v7159_v55 = vpop.f32.mrf.mxu1  ;;  %v7117_v43 = vadd.f32 %v7116_v48, %v7074_v6  ;;  %v7158_v51 = vadd.f32 %v7157_v26, %v7115_v20  ;;  %v7226_v18 = vrot.slane %v7156_v13, 1 }
 0x4af   :  { %v7118_v8 = vpop.f32.mrf.mxu0 }
 0x4b0   :  { %v7160_v11 = vadd.f32 %v7159_v55, %v7117_v43  ;;  %v7119_v15 = vadd.f32 %v7118_v8, %v7076_v16  ;;  %v7161_v12 = vpop.f32.mrf.mxu1  ;;  %v7227_v1 = vrot.slane %v7158_v51, 1  ;;  %v9993_v55 = vmov 1966171168  }
 0x4b1   :  { %v7338_v16 = vunpack.c.l.s4 %v9993_v55 }
 0x4b2   :  { %v7230_v21 = vrot.slane %v7160_v11, 1  ;;  %v7162_v49 = vadd.f32 %v7161_v12, %v7119_v15 }
 0x4b3   :  { %v7339_v54 = vunpack.c.0.s8 %v7338_v16 }
 0x4b4   :  { %v7235_v58 = vsel %vm7232_vm4, %v7226_v18, %v7230_v21  ;;  %v7239_v34 = vsel %vm7232_vm4, %v7230_v21, %v7226_v18  ;;  %v7231_v2 = vrot.slane %v7162_v49, 1 }
 0x4b5   :  { %v7247_v42 = vsel %vm10282_vm3, 0.0, %v7235_v58  ;;  %v7251_v47 = vsel %vm10290_vm5, 0.0, %v7239_v34  ;;  %v7342_v12 = vsub.s32 %v7339_v54, %v10075_v14  ;;  %v10406_v34 = vlaneseq }
 0x4b6   :  { %v7263_v38 = vadd.f32 %v7255_v30, %v7247_v42  ;;  %v7267_v17 = vadd.f32 %v7259_v0, %v7251_v47  ;;  %v7236_v25 = vsel %vm7232_vm4, %v7227_v1, %v7231_v2  ;;  %v7240_v24 = vsel %vm7232_vm4, %v7231_v2, %v7227_v1 }
 0x4b7   :  { %v7248_v50 = vsel %vm10282_vm3, 0.0, %v7236_v25  ;;  %v7252_v59 = vsel %vm10290_vm5, 0.0, %v7240_v24  ;;  %vm7362_vm6 = vcmp.lt.s32.totalorder %v10406_v34, 512 }
 0x4b8   :  { %v7293_v29 = vadd.f32 %v7282_v41, %v7263_v38  ;;  %v7297_v52 = vadd.f32 %v7282_v41, %v7267_v17  ;;  %v7264_v56 = vadd.f32 %v7256_v22, %v7248_v50  ;;  %v7268_v27 = vadd.f32 %v7260_v57, %v7252_v59 }
 0x4b9   :  { %v7343_v22 = vrot.slane %v7335_v36, %v7342_v12  ;;  %v7401_v41 = vrot.slane %v7393_v10, %v7342_v12 }
 0x4ba   :  { %v7301_v61 = vmax.f32 %v7293_v29, 0.0  ;;  %v7305_v19 = vmax.f32 %v7297_v52, 0.0  ;;  %v7294_v60 = vadd.f32 %v7286_v28, %v7264_v56  ;;  %v7298_v53 = vadd.f32 %v7286_v28, %v7268_v27 }
 0x4bc   :  { %v7319_v63 = vrot.slane %v7301_v61, 4  ;;  %v7377_v32 = vrot.slane %v7305_v19, 4  ;;  %v7302_v26 = vmax.f32 %v7294_v60, 0.0  ;;  %v7306_v6 = vmax.f32 %v7298_v53, 0.0 }
 0x4be   :  { %v7320_v20 = vmax.f32 %v7301_v61, %v7319_v63  ;;  %v7378_v62 = vmax.f32 %v7305_v19, %v7377_v32  ;;  %v7325_v48 = vrot.slane %v7302_v26, 4  ;;  %v7383_v5 = vrot.slane %v7306_v6, 4 }
 0x4c0   :  { %v7321_v3 = vrot.slane %v7320_v20, 2  ;;  %v7379_v13 = vrot.slane %v7378_v62, 2  ;;  %v7326_v43 = vmax.f32 %v7302_v26, %v7325_v48  ;;  %v7384_v23 = vmax.f32 %v7306_v6, %v7383_v5 }
 0x4c2   :  { %v7322_v40 = vmax.f32 %v7320_v20, %v7321_v3  ;;  %v7380_v45 = vmax.f32 %v7378_v62, %v7379_v13  ;;  %v7327_v7 = vrot.slane %v7326_v43, 2  ;;  %v7385_v8 = vrot.slane %v7384_v23, 2 }
 0x4c4   :  { %v7323_v51 = vrot.slane %v7322_v40, 1  ;;  %v7381_v11 = vrot.slane %v7380_v45, 1  ;;  %v7328_v15 = vmax.f32 %v7326_v43, %v7327_v7  ;;  %v7386_v31 = vmax.f32 %v7384_v23, %v7385_v8 }
 0x4c6   :  { %v7329_v44 = vrot.slane %v7328_v15, 1  ;;  %v7387_v9 = vrot.slane %v7386_v31, 1  ;;  %v7324_v39 = vmax.f32 %v7322_v40, %v7323_v51  ;;  %v7382_v18 = vmax.f32 %v7380_v45, %v7381_v11 }
 0x4c8   :  { %v7330_v37 = vmax.f32 %v7328_v15, %v7329_v44  ;;  %v7388_v21 = vmax.f32 %v7386_v31, %v7387_v9 }
 0x4ca   :  { %v7336_v49 = vcombine.low %v7324_v39, %v7330_v37  ;;  %v7394_v30 = vcombine.low %v7382_v18, %v7388_v21 }
 0x4cc   :  { %v7350_v0 = vrot.slane %v7336_v49, %v7342_v12  ;;  %v7408_v1 = vrot.slane %v7394_v30, %v7342_v12 }
 0x4ce   :  { %v7351_v58 = vcombine.low %v7343_v22, %v7350_v0  ;;  %v7409_v14 = vcombine.low %v7401_v41, %v7408_v1 }
 0x4d0   :  { %v7358_v2 = vrot.slane %v7351_v58, %v7342_v12  ;;  %v7416_v57 = vrot.slane %v7409_v14, %v7342_v12 }
 0x4d2   :  { %7364 = vst.msk [vmem:[#allocation8] ss:$2 sm:$0xf] %vm7362_vm6, %v7358_v2  ;;  %7419 = vst.msk [vmem:[#allocation8 + $0x1] ss:$2 sm:$0xf] %vm7362_vm6, %v7416_v57 }
 0x4d3   :  { %9971 = shalt.err (!%p9968_p5)
}
 0x4d4   :  { %7429 = dma.vmem_to_hbm [thread:$0]  %s7427_s2, 128, %s10394_s3, [#allocation4]  }
 0x4d5   :  { %9984 = dma.done.wait [#allocation4], 128  }
 0x4d6   :  { %9985 = vsyncadd [#allocation4], 4294967168 }
 0x4d7   :  { %7433 = vsyncpa [#allocation3], 1 }
 0x4d8   :  { %7434 = vsyncpa [#allocation6], 1 }
 0x4d9   :  { %7435 = vsyncpa [#allocation4], 1 }

</bundles_post_ra>
